<compile_context>
chip_gen: v7x
topology: tpu7x:2x2x1
jax: 0.10.0
libtpu: 0.0.40
codegen_flags: <defaults>
</compile_context>

<pallas_src>
import functools

import numpy as np
import jax
import jax.numpy as jnp
from jax import lax
from jax.experimental import pallas as pl
from jax.experimental.pallas import tpu as pltpu


# ----------------------------------------------------------------------------
# Helpers
# ----------------------------------------------------------------------------
def _shift_lanes(a, s):
    """result[..., p] = a[..., p + s], zero-filled at the ends (no wrap).

    `s` is a small static int (|s| <= W); lowers to a lane rotate + select,
    riding the XLU slot which is otherwise idle in this kernel.
    """
    if s == 0:
        return a
    n = a.shape[-1]
    z = jnp.zeros(a.shape[:-1] + (abs(s),), a.dtype)
    if s > 0:
        return jnp.concatenate([a[..., s:], z], axis=-1)
    return jnp.concatenate([z, a[..., : n + s]], axis=-1)


# ----------------------------------------------------------------------------
# Fused Block kernel: 6 x conv3x3(+bias,+ReLU) + 2x2 maxpool, channels-major
# ----------------------------------------------------------------------------
def _block_kernel(x_ref, w0_ref, wr_ref, b_ref, msk_ref, sel_ref,
                  feat_ref, pool_ref, *, W):
    """One full U-net Block for a single batch element.

    x_ref    : (1, Cin, H*W)      bf16  block input (channels-major, flat spatial)
    w0_ref   : (Cout, 9*Cin)      bf16  layer-0 weights (transposed im2col layout)
    wr_ref   : (5, Cout, 9*Cout)  bf16  layer-1..5 weights
    b_ref    : (6, Cout, 1)       f32   biases (column vectors -> lane splat)
    msk_ref  : (2, H*W)           bf16  0/1 column masks: [w>0 ; w<W-1]
    sel_ref  : (H*W, Ho*Wo)       bf16  one-hot 2x2-pool selection matrix
    feat_ref : (1, Cout, H*W)     f32   block feature (pre-pool), lane-dense
    pool_ref : (1, Cout, Ho*Wo)   bf16  pooled output (next block's input)
    """
    mask_l = msk_ref[0:1, :]      # zero on the w == 0   column (dx = -1 taps)
    mask_r = msk_ref[1:2, :]      # zero on the w == W-1 column (dx = +1 taps)

    def conv3x3(a, wmat, bias):
        """a: (Cin, HW) bf16 ; wmat: (Cout, 9*Cin) bf16 ; bias: (Cout, 1) f32."""
        taps = []
        for dy in (-1, 0, 1):
            # Row shift: zero-fill handles the top/bottom padding rows.
            row = _shift_lanes(a, dy * W)
            taps.append(_shift_lanes(row, -1) * mask_l)   # (dy, dx=-1)
            taps.append(row)                              # (dy, dx= 0)
            taps.append(_shift_lanes(row, +1) * mask_r)   # (dy, dx=+1)
        # Stack taps along the K / sublane axis -> a single MXU matmul with
        # K = 9*Cin and N = H*W (lane-dense).
        patches = jnp.concatenate(taps, axis=0)           # (9*Cin, HW) bf16
        y = jnp.dot(wmat, patches, preferred_element_type=jnp.float32)
        return y + bias                                    # (Cout, HW) f32

    # ---- layer 0 : Cin -> Cout, ReLU ---------------------------------------
    a = x_ref[0]                                           # (Cin, HW) bf16
    y = conv3x3(a, w0_ref[...], b_ref[0])
    a = jnp.maximum(y, 0.0).astype(jnp.bfloat16)           # ReLU in f32, then bf16

    # ---- layers 1..4 : Cout -> Cout, ReLU ----------------------------------
    for li in range(1, 5):
        y = conv3x3(a, wr_ref[li - 1], b_ref[li])
        a = jnp.maximum(y, 0.0).astype(jnp.bfloat16)

    # ---- layer 5 : Cout -> Cout, NO ReLU -> block feature -------------------
    y = conv3x3(a, wr_ref[4], b_ref[5])                    # (Cout, HW) f32
    feat_ref[0] = y.astype(feat_ref.dtype)

    # ---- fused 2x2 max-pool (stride 2), straight from registers -------------
    # Pairwise max along w then along h (flat lane shifts); the stride-2
    # compaction to (Cout, Ho*Wo) is one matmul with a one-hot selection
    # matrix (exact, since selecting 0/1 * bf16 values accumulates losslessly).
    mw = jnp.maximum(y, _shift_lanes(y, 1))
    mh = jnp.maximum(mw, _shift_lanes(mw, W))
    pooled = jnp.dot(mh.astype(jnp.bfloat16), sel_ref[...],
                     preferred_element_type=jnp.float32)
    pool_ref[0] = pooled.astype(pool_ref.dtype)


# ----------------------------------------------------------------------------
# Wrappers (glue: parameter packing, constant masks, free NCHW reshapes)
# ----------------------------------------------------------------------------
def _pack_block_params(block_params):
    """Pack the 6 (w, b) pairs into transposed-im2col bf16 weights."""
    w0, _ = block_params[0]
    cin, cout = w0.shape[2], w0.shape[3]
    # w is (3, 3, cin, cout) (HWIO); rows of the packed matrix follow
    # (ky, kx, ci) flattening -- the same order the kernel stacks its taps.
    w0p = jnp.transpose(w0.reshape(9 * cin, cout)).astype(jnp.bfloat16)
    wr = jnp.stack([jnp.transpose(w.reshape(9 * cout, cout))
                    for (w, _) in block_params[1:]]).astype(jnp.bfloat16)
    bs = jnp.stack([b.reshape(cout, 1) for (_, b) in block_params])   # (6,Cout,1) f32
    return w0p, wr, bs


def _col_masks(H, W):
    """(2, H*W) bf16 0/1 masks: row 0 -> (w > 0), row 1 -> (w < W-1)."""
    w = np.arange(H * W) % W
    m = np.stack([(w > 0), (w < W - 1)]).astype(np.float32)
    return jnp.asarray(m, jnp.bfloat16)


def _pool_select_matrix(H, W):
    """One-hot (H*W, Ho*Wo): column po selects flat position 2*ho*W + 2*wo."""
    Ho, Wo = H // 2, W // 2
    sel = np.zeros((H * W, Ho * Wo), np.float32)
    po = np.arange(Ho * Wo)
    sel[2 * (po // Wo) * W + 2 * (po % Wo), po] = 1.0
    return jnp.asarray(sel, jnp.bfloat16)


def block_forward(x, H, W, block_params):
    """x: (B, Cin, H*W) bf16 channels-major.

    Returns (feature f32 (B, Cout, H*W), pooled bf16 (B, Cout, Ho*Wo))."""
    assert H % 2 == 0 and W % 2 == 0, "2x2 max-pool requires even spatial dims"
    B, Cin, HW = x.shape
    assert HW == H * W
    Cout = block_params[0][0].shape[-1]
    Ho, Wo = H // 2, W // 2

    w0p, wr, bs = _pack_block_params(block_params)
    masks = _col_masks(H, W)
    sel = _pool_select_matrix(H, W)

    kern = functools.partial(_block_kernel, W=W)

    flops = (2 * B * HW * 9 * (Cin * Cout + 5 * Cout * Cout)
             + 2 * B * Cout * HW * (Ho * Wo))
    bytes_accessed = (B * Cin * HW * 2                       # input (bf16)
                      + (9 * Cin + 45 * Cout) * Cout * 2     # weights (bf16)
                      + 6 * Cout * 4                         # biases (f32)
                      + 2 * HW * 2 + HW * Ho * Wo * 2        # masks + pool select
                      + B * Cout * HW * 4                    # feature out (f32)
                      + B * Cout * Ho * Wo * 2)              # pooled out (bf16)

    feat, pooled = pl.pallas_call(
        kern,
        out_shape=(jax.ShapeDtypeStruct((B, Cout, HW), jnp.float32),
                   jax.ShapeDtypeStruct((B, Cout, Ho * Wo), jnp.bfloat16)),
        grid=(B,),
        in_specs=[
            pl.BlockSpec((1, Cin, HW), lambda i: (i, 0, 0)),
            pl.BlockSpec((Cout, 9 * Cin), lambda i: (0, 0)),
            pl.BlockSpec((5, Cout, 9 * Cout), lambda i: (0, 0, 0)),
            pl.BlockSpec((6, Cout, 1), lambda i: (0, 0, 0)),
            pl.BlockSpec((2, HW), lambda i: (0, 0)),
            pl.BlockSpec((HW, Ho * Wo), lambda i: (0, 0)),
        ],
        out_specs=(
            pl.BlockSpec((1, Cout, HW), lambda i: (i, 0, 0)),
            pl.BlockSpec((1, Cout, Ho * Wo), lambda i: (i, 0, 0)),
        ),
        compiler_params=pltpu.CompilerParams(dimension_semantics=("parallel",)),
        cost_estimate=pl.CostEstimate(flops=flops, transcendentals=0,
                                      bytes_accessed=bytes_accessed),
    )(x, w0p, wr, bs, masks, sel)
    return feat, pooled


def encoder_forward(x_nchw, params):
    """U-net encoder.  Input NCHW f32; returns per-block features, NCHW f32."""
    B, C, H, W = x_nchw.shape
    x = x_nchw.reshape(B, C, H * W).astype(jnp.bfloat16)     # channels-major, flat
    ftrs = []
    for block_params in params:
        feat, x = block_forward(x, H, W, block_params)       # feat f32, x bf16
        ftrs.append(feat.reshape(B, feat.shape[1], H, W))    # free reshape -> NCHW
        H, W = H // 2, W // 2
    return ftrs


# ----------------------------------------------------------------------------
# Parameter init (deterministic, PyTorch Conv2d-style uniform)
# ----------------------------------------------------------------------------
def init_encoder_params(key, chs):
    params = []
    for bi in range(len(chs) - 1):
        layer_chs = [chs[bi]] + [chs[bi + 1]] * 6
        block = []
        for li in range(6):
            key, kw, kb = jax.random.split(key, 3)
            cin, cout = layer_chs[li], layer_chs[li + 1]
            bound = 1.0 / np.sqrt(cin * 9)
            w = jax.random.uniform(kw, (3, 3, cin, cout), jnp.float32,
                                   -bound, bound)
            b = jax.random.uniform(kb, (cout,), jnp.float32, -bound, bound)
            block.append((w, b))
        params.append(block)
    return params


# ----------------------------------------------------------------------------
# Pure-JAX reference (matches the kernel's bf16 cast points)
# ----------------------------------------------------------------------------
def _ref_conv3x3(x, w, b):
    y = lax.conv_general_dilated(
        x.astype(jnp.bfloat16), w.astype(jnp.bfloat16),
        window_strides=(1, 1), padding="SAME",
        dimension_numbers=("NHWC", "HWIO", "NHWC"),
        preferred_element_type=jnp.float32)
    return y + b[None, None, None, :]


def _ref_maxpool2(x):
    return lax.reduce_window(x, -jnp.inf, lax.max,
                             (1, 2, 2, 1), (1, 2, 2, 1), "VALID")


def ref_encoder_forward(x_nchw, params):
    x = jnp.transpose(x_nchw, (0, 2, 3, 1)).astype(jnp.bfloat16)
    ftrs = []
    for block_params in params:
        h = x.astype(jnp.float32)
        for i, (w, b) in enumerate(block_params):
            y = _ref_conv3x3(h, w, b)                 # f32
            h = jnp.maximum(y, 0.0) if i < len(block_params) - 1 else y
        ftrs.append(jnp.transpose(h, (0, 3, 1, 2)))   # NHWC -> NCHW
        x = _ref_maxpool2(h).astype(jnp.bfloat16)
    return ftrs


# ----------------------------------------------------------------------------
if __name__ == "__main__":
    chs = (4, 8, 16)          # scaled-down version of the default channel list
    B, H, W = 2, 16, 16

    key = jax.random.PRNGKey(0)
    key, kx = jax.random.split(key)
    x = jax.random.normal(kx, (B, chs[0], H, W), jnp.float32)   # NCHW input

    params = init_encoder_params(jax.random.PRNGKey(1), chs)

    ftrs = jax.jit(encoder_forward)(x, params)
    ftrs = [jax.block_until_ready(f) for f in ftrs]

    ref = ref_encoder_forward(x, params)
    for got, want in zip(ftrs, ref):
        assert got.shape == want.shape, (got.shape, want.shape)
        # bf16 MXU path vs reference: loose tolerance (summation order differs).
        np.testing.assert_allclose(np.asarray(got), np.asarray(want),
                                   rtol=2e-2, atol=2e-2)

    print("KERNEL_OK")
</pallas_src>

<mosaic_0001>
module attributes {stable_mosaic.version = 11 : i64} {
  func.func @_block_kernel(%arg0: i32, %arg1: memref<1x4x256xbf16, #tpu.memory_space<vmem>>, %arg2: memref<8x36xbf16, #tpu.memory_space<vmem>>, %arg3: memref<5x8x72xbf16, #tpu.memory_space<vmem>>, %arg4: memref<6x8x1xf32, #tpu.memory_space<vmem>>, %arg5: memref<2x256xbf16, #tpu.memory_space<vmem>>, %arg6: memref<256x64xbf16, #tpu.memory_space<vmem>>, %arg7: memref<1x8x256xf32, #tpu.memory_space<vmem>>, %arg8: memref<1x8x64xbf16, #tpu.memory_space<vmem>>) attributes {dimension_semantics = [#tpu.dimension_semantics<parallel>], iteration_bounds = array<i64: 2>, scalar_prefetch = 0 : i64, scratch_operands = 0 : i64, tpu.core_type = #tpu.core_type<tc>, window_params = [{transform_indices = @transform_0, window_bounds = array<i64: 1, 4, 256>}, {pipeline_mode = #tpu.pipeline_mode<synchronous>, transform_indices = @transform_1, window_bounds = array<i64: 8, 36>}, {pipeline_mode = #tpu.pipeline_mode<synchronous>, transform_indices = @transform_2, window_bounds = array<i64: 5, 8, 72>}, {pipeline_mode = #tpu.pipeline_mode<synchronous>, transform_indices = @transform_3, window_bounds = array<i64: 6, 8, 1>}, {pipeline_mode = #tpu.pipeline_mode<synchronous>, transform_indices = @transform_4, window_bounds = array<i64: 2, 256>}, {pipeline_mode = #tpu.pipeline_mode<synchronous>, transform_indices = @transform_5, window_bounds = array<i64: 256, 64>}, {transform_indices = @transform_6, window_bounds = array<i64: 1, 8, 256>}, {transform_indices = @transform_7, window_bounds = array<i64: 1, 8, 64>}]} {
    %c0 = arith.constant 0 : index
    %c0_0 = arith.constant 0 : index
    %0 = vector.load %arg5[%c0, %c0_0] : memref<2x256xbf16, #tpu.memory_space<vmem>>, vector<1x256xbf16>
    %c1 = arith.constant 1 : index
    %c0_1 = arith.constant 0 : index
    %1 = vector.load %arg5[%c1, %c0_1] : memref<2x256xbf16, #tpu.memory_space<vmem>>, vector<1x256xbf16>
    %c0_2 = arith.constant 0 : index
    %c0_3 = arith.constant 0 : index
    %c0_4 = arith.constant 0 : index
    %2 = vector.load %arg1[%c0_2, %c0_3, %c0_4] : memref<1x4x256xbf16, #tpu.memory_space<vmem>>, vector<1x4x256xbf16>
    %3 = vector.shape_cast %2 : vector<1x4x256xbf16> to vector<4x256xbf16>
    %c0_5 = arith.constant 0 : index
    %c0_6 = arith.constant 0 : index
    %4 = vector.load %arg2[%c0_5, %c0_6] : memref<8x36xbf16, #tpu.memory_space<vmem>>, vector<8x36xbf16>
    %c0_7 = arith.constant 0 : index
    %c0_8 = arith.constant 0 : index
    %c0_9 = arith.constant 0 : index
    %5 = vector.load %arg4[%c0_7, %c0_8, %c0_9] : memref<6x8x1xf32, #tpu.memory_space<vmem>>, vector<1x8x1xf32>
    %6 = vector.shape_cast %5 : vector<1x8x1xf32> to vector<8x1xf32>
    %cst = arith.constant 0.000000e+00 : bf16
    %7 = vector.broadcast %cst : bf16 to vector<4x16xbf16>
    %8 = vector.extract_strided_slice %3 {offsets = [0, 0], sizes = [4, 240], strides = [1, 1]} : vector<4x256xbf16> to vector<4x240xbf16>
    %9 = tpu.concatenate %7, %8 in 1 : vector<4x16xbf16>, vector<4x240xbf16> -> vector<4x256xbf16>
    %cst_10 = arith.constant 0.000000e+00 : bf16
    %10 = vector.broadcast %cst_10 : bf16 to vector<4x1xbf16>
    %11 = vector.extract_strided_slice %9 {offsets = [0, 0], sizes = [4, 255], strides = [1, 1]} : vector<4x256xbf16> to vector<4x255xbf16>
    %12 = tpu.concatenate %10, %11 in 1 : vector<4x1xbf16>, vector<4x255xbf16> -> vector<4x256xbf16>
    %13 = vector.broadcast %0 : vector<1x256xbf16> to vector<4x256xbf16>
    %14 = arith.mulf %12, %13 : vector<4x256xbf16>
    %cst_11 = arith.constant 0.000000e+00 : bf16
    %15 = vector.broadcast %cst_11 : bf16 to vector<4x1xbf16>
    %16 = vector.extract_strided_slice %9 {offsets = [0, 1], sizes = [4, 255], strides = [1, 1]} : vector<4x256xbf16> to vector<4x255xbf16>
    %17 = tpu.concatenate %16, %15 in 1 : vector<4x255xbf16>, vector<4x1xbf16> -> vector<4x256xbf16>
    %18 = vector.broadcast %1 : vector<1x256xbf16> to vector<4x256xbf16>
    %19 = arith.mulf %17, %18 : vector<4x256xbf16>
    %cst_12 = arith.constant 0.000000e+00 : bf16
    %20 = vector.broadcast %cst_12 : bf16 to vector<4x1xbf16>
    %21 = vector.extract_strided_slice %3 {offsets = [0, 0], sizes = [4, 255], strides = [1, 1]} : vector<4x256xbf16> to vector<4x255xbf16>
    %22 = tpu.concatenate %20, %21 in 1 : vector<4x1xbf16>, vector<4x255xbf16> -> vector<4x256xbf16>
    %23 = vector.broadcast %0 : vector<1x256xbf16> to vector<4x256xbf16>
    %24 = arith.mulf %22, %23 : vector<4x256xbf16>
    %cst_13 = arith.constant 0.000000e+00 : bf16
    %25 = vector.broadcast %cst_13 : bf16 to vector<4x1xbf16>
    %26 = vector.extract_strided_slice %3 {offsets = [0, 1], sizes = [4, 255], strides = [1, 1]} : vector<4x256xbf16> to vector<4x255xbf16>
    %27 = tpu.concatenate %26, %25 in 1 : vector<4x255xbf16>, vector<4x1xbf16> -> vector<4x256xbf16>
    %28 = vector.broadcast %1 : vector<1x256xbf16> to vector<4x256xbf16>
    %29 = arith.mulf %27, %28 : vector<4x256xbf16>
    %cst_14 = arith.constant 0.000000e+00 : bf16
    %30 = vector.broadcast %cst_14 : bf16 to vector<4x16xbf16>
    %31 = vector.extract_strided_slice %3 {offsets = [0, 16], sizes = [4, 240], strides = [1, 1]} : vector<4x256xbf16> to vector<4x240xbf16>
    %32 = tpu.concatenate %31, %30 in 1 : vector<4x240xbf16>, vector<4x16xbf16> -> vector<4x256xbf16>
    %cst_15 = arith.constant 0.000000e+00 : bf16
    %33 = vector.broadcast %cst_15 : bf16 to vector<4x1xbf16>
    %34 = vector.extract_strided_slice %32 {offsets = [0, 0], sizes = [4, 255], strides = [1, 1]} : vector<4x256xbf16> to vector<4x255xbf16>
    %35 = tpu.concatenate %33, %34 in 1 : vector<4x1xbf16>, vector<4x255xbf16> -> vector<4x256xbf16>
    %36 = vector.broadcast %0 : vector<1x256xbf16> to vector<4x256xbf16>
    %37 = arith.mulf %35, %36 : vector<4x256xbf16>
    %cst_16 = arith.constant 0.000000e+00 : bf16
    %38 = vector.broadcast %cst_16 : bf16 to vector<4x1xbf16>
    %39 = vector.extract_strided_slice %32 {offsets = [0, 1], sizes = [4, 255], strides = [1, 1]} : vector<4x256xbf16> to vector<4x255xbf16>
    %40 = tpu.concatenate %39, %38 in 1 : vector<4x255xbf16>, vector<4x1xbf16> -> vector<4x256xbf16>
    %41 = vector.broadcast %1 : vector<1x256xbf16> to vector<4x256xbf16>
    %42 = arith.mulf %40, %41 : vector<4x256xbf16>
    %43 = tpu.concatenate %14, %9, %19, %24, %3, %29, %37, %32, %42 in 0 : vector<4x256xbf16>, vector<4x256xbf16>, vector<4x256xbf16>, vector<4x256xbf16>, vector<4x256xbf16>, vector<4x256xbf16>, vector<4x256xbf16>, vector<4x256xbf16>, vector<4x256xbf16> -> vector<36x256xbf16>
    %cst_17 = arith.constant dense<0.000000e+00> : vector<8x256xf32>
    %44 = tpu.matmul %4, %43, %cst_17 {dimension_numbers = #tpu.dot_dimension_numbers<[1], [0], [0], [1], [0, 0, 1, 1], [], []>} : vector<8x36xbf16>, vector<36x256xbf16>, vector<8x256xf32> -> vector<8x256xf32>
    %45 = vector.broadcast %6 : vector<8x1xf32> to vector<8x256xf32>
    %46 = arith.addf %44, %45 : vector<8x256xf32>
    %cst_18 = arith.constant 0.000000e+00 : f32
    %47 = vector.broadcast %cst_18 : f32 to vector<8x256xf32>
    %48 = arith.maximumf %46, %47 : vector<8x256xf32>
    %49 = arith.truncf %48 : vector<8x256xf32> to vector<8x256xbf16>
    %c0_19 = arith.constant 0 : index
    %c0_20 = arith.constant 0 : index
    %c0_21 = arith.constant 0 : index
    %50 = vector.load %arg3[%c0_19, %c0_20, %c0_21] : memref<5x8x72xbf16, #tpu.memory_space<vmem>>, vector<1x8x72xbf16>
    %51 = vector.shape_cast %50 : vector<1x8x72xbf16> to vector<8x72xbf16>
    %c1_22 = arith.constant 1 : index
    %c0_23 = arith.constant 0 : index
    %c0_24 = arith.constant 0 : index
    %52 = vector.load %arg4[%c1_22, %c0_23, %c0_24] : memref<6x8x1xf32, #tpu.memory_space<vmem>>, vector<1x8x1xf32>
    %53 = vector.shape_cast %52 : vector<1x8x1xf32> to vector<8x1xf32>
    %cst_25 = arith.constant 0.000000e+00 : bf16
    %54 = vector.broadcast %cst_25 : bf16 to vector<8x16xbf16>
    %55 = vector.extract_strided_slice %49 {offsets = [0, 0], sizes = [8, 240], strides = [1, 1]} : vector<8x256xbf16> to vector<8x240xbf16>
    %56 = tpu.concatenate %54, %55 in 1 : vector<8x16xbf16>, vector<8x240xbf16> -> vector<8x256xbf16>
    %cst_26 = arith.constant 0.000000e+00 : bf16
    %57 = vector.broadcast %cst_26 : bf16 to vector<8x1xbf16>
    %58 = vector.extract_strided_slice %56 {offsets = [0, 0], sizes = [8, 255], strides = [1, 1]} : vector<8x256xbf16> to vector<8x255xbf16>
    %59 = tpu.concatenate %57, %58 in 1 : vector<8x1xbf16>, vector<8x255xbf16> -> vector<8x256xbf16>
    %60 = vector.broadcast %0 : vector<1x256xbf16> to vector<8x256xbf16>
    %61 = arith.mulf %59, %60 : vector<8x256xbf16>
    %cst_27 = arith.constant 0.000000e+00 : bf16
    %62 = vector.broadcast %cst_27 : bf16 to vector<8x1xbf16>
    %63 = vector.extract_strided_slice %56 {offsets = [0, 1], sizes = [8, 255], strides = [1, 1]} : vector<8x256xbf16> to vector<8x255xbf16>
    %64 = tpu.concatenate %63, %62 in 1 : vector<8x255xbf16>, vector<8x1xbf16> -> vector<8x256xbf16>
    %65 = vector.broadcast %1 : vector<1x256xbf16> to vector<8x256xbf16>
    %66 = arith.mulf %64, %65 : vector<8x256xbf16>
    %cst_28 = arith.constant 0.000000e+00 : bf16
    %67 = vector.broadcast %cst_28 : bf16 to vector<8x1xbf16>
    %68 = vector.extract_strided_slice %49 {offsets = [0, 0], sizes = [8, 255], strides = [1, 1]} : vector<8x256xbf16> to vector<8x255xbf16>
    %69 = tpu.concatenate %67, %68 in 1 : vector<8x1xbf16>, vector<8x255xbf16> -> vector<8x256xbf16>
    %70 = vector.broadcast %0 : vector<1x256xbf16> to vector<8x256xbf16>
    %71 = arith.mulf %69, %70 : vector<8x256xbf16>
    %cst_29 = arith.constant 0.000000e+00 : bf16
    %72 = vector.broadcast %cst_29 : bf16 to vector<8x1xbf16>
    %73 = vector.extract_strided_slice %49 {offsets = [0, 1], sizes = [8, 255], strides = [1, 1]} : vector<8x256xbf16> to vector<8x255xbf16>
    %74 = tpu.concatenate %73, %72 in 1 : vector<8x255xbf16>, vector<8x1xbf16> -> vector<8x256xbf16>
    %75 = vector.broadcast %1 : vector<1x256xbf16> to vector<8x256xbf16>
    %76 = arith.mulf %74, %75 : vector<8x256xbf16>
    %cst_30 = arith.constant 0.000000e+00 : bf16
    %77 = vector.broadcast %cst_30 : bf16 to vector<8x16xbf16>
    %78 = vector.extract_strided_slice %49 {offsets = [0, 16], sizes = [8, 240], strides = [1, 1]} : vector<8x256xbf16> to vector<8x240xbf16>
    %79 = tpu.concatenate %78, %77 in 1 : vector<8x240xbf16>, vector<8x16xbf16> -> vector<8x256xbf16>
    %cst_31 = arith.constant 0.000000e+00 : bf16
    %80 = vector.broadcast %cst_31 : bf16 to vector<8x1xbf16>
    %81 = vector.extract_strided_slice %79 {offsets = [0, 0], sizes = [8, 255], strides = [1, 1]} : vector<8x256xbf16> to vector<8x255xbf16>
    %82 = tpu.concatenate %80, %81 in 1 : vector<8x1xbf16>, vector<8x255xbf16> -> vector<8x256xbf16>
    %83 = vector.broadcast %0 : vector<1x256xbf16> to vector<8x256xbf16>
    %84 = arith.mulf %82, %83 : vector<8x256xbf16>
    %cst_32 = arith.constant 0.000000e+00 : bf16
    %85 = vector.broadcast %cst_32 : bf16 to vector<8x1xbf16>
    %86 = vector.extract_strided_slice %79 {offsets = [0, 1], sizes = [8, 255], strides = [1, 1]} : vector<8x256xbf16> to vector<8x255xbf16>
    %87 = tpu.concatenate %86, %85 in 1 : vector<8x255xbf16>, vector<8x1xbf16> -> vector<8x256xbf16>
    %88 = vector.broadcast %1 : vector<1x256xbf16> to vector<8x256xbf16>
    %89 = arith.mulf %87, %88 : vector<8x256xbf16>
    %90 = tpu.concatenate %61, %56, %66, %71, %49, %76, %84, %79, %89 in 0 : vector<8x256xbf16>, vector<8x256xbf16>, vector<8x256xbf16>, vector<8x256xbf16>, vector<8x256xbf16>, vector<8x256xbf16>, vector<8x256xbf16>, vector<8x256xbf16>, vector<8x256xbf16> -> vector<72x256xbf16>
    %cst_33 = arith.constant dense<0.000000e+00> : vector<8x256xf32>
    %91 = tpu.matmul %51, %90, %cst_33 {dimension_numbers = #tpu.dot_dimension_numbers<[1], [0], [0], [1], [0, 0, 1, 1], [], []>} : vector<8x72xbf16>, vector<72x256xbf16>, vector<8x256xf32> -> vector<8x256xf32>
    %92 = vector.broadcast %53 : vector<8x1xf32> to vector<8x256xf32>
    %93 = arith.addf %91, %92 : vector<8x256xf32>
    %cst_34 = arith.constant 0.000000e+00 : f32
    %94 = vector.broadcast %cst_34 : f32 to vector<8x256xf32>
    %95 = arith.maximumf %93, %94 : vector<8x256xf32>
    %96 = arith.truncf %95 : vector<8x256xf32> to vector<8x256xbf16>
    %c1_35 = arith.constant 1 : index
    %c0_36 = arith.constant 0 : index
    %c0_37 = arith.constant 0 : index
    %97 = vector.load %arg3[%c1_35, %c0_36, %c0_37] : memref<5x8x72xbf16, #tpu.memory_space<vmem>>, vector<1x8x72xbf16>
    %98 = vector.shape_cast %97 : vector<1x8x72xbf16> to vector<8x72xbf16>
    %c2 = arith.constant 2 : index
    %c0_38 = arith.constant 0 : index
    %c0_39 = arith.constant 0 : index
    %99 = vector.load %arg4[%c2, %c0_38, %c0_39] : memref<6x8x1xf32, #tpu.memory_space<vmem>>, vector<1x8x1xf32>
    %100 = vector.shape_cast %99 : vector<1x8x1xf32> to vector<8x1xf32>
    %cst_40 = arith.constant 0.000000e+00 : bf16
    %101 = vector.broadcast %cst_40 : bf16 to vector<8x16xbf16>
    %102 = vector.extract_strided_slice %96 {offsets = [0, 0], sizes = [8, 240], strides = [1, 1]} : vector<8x256xbf16> to vector<8x240xbf16>
    %103 = tpu.concatenate %101, %102 in 1 : vector<8x16xbf16>, vector<8x240xbf16> -> vector<8x256xbf16>
    %cst_41 = arith.constant 0.000000e+00 : bf16
    %104 = vector.broadcast %cst_41 : bf16 to vector<8x1xbf16>
    %105 = vector.extract_strided_slice %103 {offsets = [0, 0], sizes = [8, 255], strides = [1, 1]} : vector<8x256xbf16> to vector<8x255xbf16>
    %106 = tpu.concatenate %104, %105 in 1 : vector<8x1xbf16>, vector<8x255xbf16> -> vector<8x256xbf16>
    %107 = vector.broadcast %0 : vector<1x256xbf16> to vector<8x256xbf16>
    %108 = arith.mulf %106, %107 : vector<8x256xbf16>
    %cst_42 = arith.constant 0.000000e+00 : bf16
    %109 = vector.broadcast %cst_42 : bf16 to vector<8x1xbf16>
    %110 = vector.extract_strided_slice %103 {offsets = [0, 1], sizes = [8, 255], strides = [1, 1]} : vector<8x256xbf16> to vector<8x255xbf16>
    %111 = tpu.concatenate %110, %109 in 1 : vector<8x255xbf16>, vector<8x1xbf16> -> vector<8x256xbf16>
    %112 = vector.broadcast %1 : vector<1x256xbf16> to vector<8x256xbf16>
    %113 = arith.mulf %111, %112 : vector<8x256xbf16>
    %cst_43 = arith.constant 0.000000e+00 : bf16
    %114 = vector.broadcast %cst_43 : bf16 to vector<8x1xbf16>
    %115 = vector.extract_strided_slice %96 {offsets = [0, 0], sizes = [8, 255], strides = [1, 1]} : vector<8x256xbf16> to vector<8x255xbf16>
    %116 = tpu.concatenate %114, %115 in 1 : vector<8x1xbf16>, vector<8x255xbf16> -> vector<8x256xbf16>
    %117 = vector.broadcast %0 : vector<1x256xbf16> to vector<8x256xbf16>
    %118 = arith.mulf %116, %117 : vector<8x256xbf16>
    %cst_44 = arith.constant 0.000000e+00 : bf16
    %119 = vector.broadcast %cst_44 : bf16 to vector<8x1xbf16>
    %120 = vector.extract_strided_slice %96 {offsets = [0, 1], sizes = [8, 255], strides = [1, 1]} : vector<8x256xbf16> to vector<8x255xbf16>
    %121 = tpu.concatenate %120, %119 in 1 : vector<8x255xbf16>, vector<8x1xbf16> -> vector<8x256xbf16>
    %122 = vector.broadcast %1 : vector<1x256xbf16> to vector<8x256xbf16>
    %123 = arith.mulf %121, %122 : vector<8x256xbf16>
    %cst_45 = arith.constant 0.000000e+00 : bf16
    %124 = vector.broadcast %cst_45 : bf16 to vector<8x16xbf16>
    %125 = vector.extract_strided_slice %96 {offsets = [0, 16], sizes = [8, 240], strides = [1, 1]} : vector<8x256xbf16> to vector<8x240xbf16>
    %126 = tpu.concatenate %125, %124 in 1 : vector<8x240xbf16>, vector<8x16xbf16> -> vector<8x256xbf16>
    %cst_46 = arith.constant 0.000000e+00 : bf16
    %127 = vector.broadcast %cst_46 : bf16 to vector<8x1xbf16>
    %128 = vector.extract_strided_slice %126 {offsets = [0, 0], sizes = [8, 255], strides = [1, 1]} : vector<8x256xbf16> to vector<8x255xbf16>
    %129 = tpu.concatenate %127, %128 in 1 : vector<8x1xbf16>, vector<8x255xbf16> -> vector<8x256xbf16>
    %130 = vector.broadcast %0 : vector<1x256xbf16> to vector<8x256xbf16>
    %131 = arith.mulf %129, %130 : vector<8x256xbf16>
    %cst_47 = arith.constant 0.000000e+00 : bf16
    %132 = vector.broadcast %cst_47 : bf16 to vector<8x1xbf16>
    %133 = vector.extract_strided_slice %126 {offsets = [0, 1], sizes = [8, 255], strides = [1, 1]} : vector<8x256xbf16> to vector<8x255xbf16>
    %134 = tpu.concatenate %133, %132 in 1 : vector<8x255xbf16>, vector<8x1xbf16> -> vector<8x256xbf16>
    %135 = vector.broadcast %1 : vector<1x256xbf16> to vector<8x256xbf16>
    %136 = arith.mulf %134, %135 : vector<8x256xbf16>
    %137 = tpu.concatenate %108, %103, %113, %118, %96, %123, %131, %126, %136 in 0 : vector<8x256xbf16>, vector<8x256xbf16>, vector<8x256xbf16>, vector<8x256xbf16>, vector<8x256xbf16>, vector<8x256xbf16>, vector<8x256xbf16>, vector<8x256xbf16>, vector<8x256xbf16> -> vector<72x256xbf16>
    %cst_48 = arith.constant dense<0.000000e+00> : vector<8x256xf32>
    %138 = tpu.matmul %98, %137, %cst_48 {dimension_numbers = #tpu.dot_dimension_numbers<[1], [0], [0], [1], [0, 0, 1, 1], [], []>} : vector<8x72xbf16>, vector<72x256xbf16>, vector<8x256xf32> -> vector<8x256xf32>
    %139 = vector.broadcast %100 : vector<8x1xf32> to vector<8x256xf32>
    %140 = arith.addf %138, %139 : vector<8x256xf32>
    %cst_49 = arith.constant 0.000000e+00 : f32
    %141 = vector.broadcast %cst_49 : f32 to vector<8x256xf32>
    %142 = arith.maximumf %140, %141 : vector<8x256xf32>
    %143 = arith.truncf %142 : vector<8x256xf32> to vector<8x256xbf16>
    %c2_50 = arith.constant 2 : index
    %c0_51 = arith.constant 0 : index
    %c0_52 = arith.constant 0 : index
    %144 = vector.load %arg3[%c2_50, %c0_51, %c0_52] : memref<5x8x72xbf16, #tpu.memory_space<vmem>>, vector<1x8x72xbf16>
    %145 = vector.shape_cast %144 : vector<1x8x72xbf16> to vector<8x72xbf16>
    %c3 = arith.constant 3 : index
    %c0_53 = arith.constant 0 : index
    %c0_54 = arith.constant 0 : index
    %146 = vector.load %arg4[%c3, %c0_53, %c0_54] : memref<6x8x1xf32, #tpu.memory_space<vmem>>, vector<1x8x1xf32>
    %147 = vector.shape_cast %146 : vector<1x8x1xf32> to vector<8x1xf32>
    %cst_55 = arith.constant 0.000000e+00 : bf16
    %148 = vector.broadcast %cst_55 : bf16 to vector<8x16xbf16>
    %149 = vector.extract_strided_slice %143 {offsets = [0, 0], sizes = [8, 240], strides = [1, 1]} : vector<8x256xbf16> to vector<8x240xbf16>
    %150 = tpu.concatenate %148, %149 in 1 : vector<8x16xbf16>, vector<8x240xbf16> -> vector<8x256xbf16>
    %cst_56 = arith.constant 0.000000e+00 : bf16
    %151 = vector.broadcast %cst_56 : bf16 to vector<8x1xbf16>
    %152 = vector.extract_strided_slice %150 {offsets = [0, 0], sizes = [8, 255], strides = [1, 1]} : vector<8x256xbf16> to vector<8x255xbf16>
    %153 = tpu.concatenate %151, %152 in 1 : vector<8x1xbf16>, vector<8x255xbf16> -> vector<8x256xbf16>
    %154 = vector.broadcast %0 : vector<1x256xbf16> to vector<8x256xbf16>
    %155 = arith.mulf %153, %154 : vector<8x256xbf16>
    %cst_57 = arith.constant 0.000000e+00 : bf16
    %156 = vector.broadcast %cst_57 : bf16 to vector<8x1xbf16>
    %157 = vector.extract_strided_slice %150 {offsets = [0, 1], sizes = [8, 255], strides = [1, 1]} : vector<8x256xbf16> to vector<8x255xbf16>
    %158 = tpu.concatenate %157, %156 in 1 : vector<8x255xbf16>, vector<8x1xbf16> -> vector<8x256xbf16>
    %159 = vector.broadcast %1 : vector<1x256xbf16> to vector<8x256xbf16>
    %160 = arith.mulf %158, %159 : vector<8x256xbf16>
    %cst_58 = arith.constant 0.000000e+00 : bf16
    %161 = vector.broadcast %cst_58 : bf16 to vector<8x1xbf16>
    %162 = vector.extract_strided_slice %143 {offsets = [0, 0], sizes = [8, 255], strides = [1, 1]} : vector<8x256xbf16> to vector<8x255xbf16>
    %163 = tpu.concatenate %161, %162 in 1 : vector<8x1xbf16>, vector<8x255xbf16> -> vector<8x256xbf16>
    %164 = vector.broadcast %0 : vector<1x256xbf16> to vector<8x256xbf16>
    %165 = arith.mulf %163, %164 : vector<8x256xbf16>
    %cst_59 = arith.constant 0.000000e+00 : bf16
    %166 = vector.broadcast %cst_59 : bf16 to vector<8x1xbf16>
    %167 = vector.extract_strided_slice %143 {offsets = [0, 1], sizes = [8, 255], strides = [1, 1]} : vector<8x256xbf16> to vector<8x255xbf16>
    %168 = tpu.concatenate %167, %166 in 1 : vector<8x255xbf16>, vector<8x1xbf16> -> vector<8x256xbf16>
    %169 = vector.broadcast %1 : vector<1x256xbf16> to vector<8x256xbf16>
    %170 = arith.mulf %168, %169 : vector<8x256xbf16>
    %cst_60 = arith.constant 0.000000e+00 : bf16
    %171 = vector.broadcast %cst_60 : bf16 to vector<8x16xbf16>
    %172 = vector.extract_strided_slice %143 {offsets = [0, 16], sizes = [8, 240], strides = [1, 1]} : vector<8x256xbf16> to vector<8x240xbf16>
    %173 = tpu.concatenate %172, %171 in 1 : vector<8x240xbf16>, vector<8x16xbf16> -> vector<8x256xbf16>
    %cst_61 = arith.constant 0.000000e+00 : bf16
    %174 = vector.broadcast %cst_61 : bf16 to vector<8x1xbf16>
    %175 = vector.extract_strided_slice %173 {offsets = [0, 0], sizes = [8, 255], strides = [1, 1]} : vector<8x256xbf16> to vector<8x255xbf16>
    %176 = tpu.concatenate %174, %175 in 1 : vector<8x1xbf16>, vector<8x255xbf16> -> vector<8x256xbf16>
    %177 = vector.broadcast %0 : vector<1x256xbf16> to vector<8x256xbf16>
    %178 = arith.mulf %176, %177 : vector<8x256xbf16>
    %cst_62 = arith.constant 0.000000e+00 : bf16
    %179 = vector.broadcast %cst_62 : bf16 to vector<8x1xbf16>
    %180 = vector.extract_strided_slice %173 {offsets = [0, 1], sizes = [8, 255], strides = [1, 1]} : vector<8x256xbf16> to vector<8x255xbf16>
    %181 = tpu.concatenate %180, %179 in 1 : vector<8x255xbf16>, vector<8x1xbf16> -> vector<8x256xbf16>
    %182 = vector.broadcast %1 : vector<1x256xbf16> to vector<8x256xbf16>
    %183 = arith.mulf %181, %182 : vector<8x256xbf16>
    %184 = tpu.concatenate %155, %150, %160, %165, %143, %170, %178, %173, %183 in 0 : vector<8x256xbf16>, vector<8x256xbf16>, vector<8x256xbf16>, vector<8x256xbf16>, vector<8x256xbf16>, vector<8x256xbf16>, vector<8x256xbf16>, vector<8x256xbf16>, vector<8x256xbf16> -> vector<72x256xbf16>
    %cst_63 = arith.constant dense<0.000000e+00> : vector<8x256xf32>
    %185 = tpu.matmul %145, %184, %cst_63 {dimension_numbers = #tpu.dot_dimension_numbers<[1], [0], [0], [1], [0, 0, 1, 1], [], []>} : vector<8x72xbf16>, vector<72x256xbf16>, vector<8x256xf32> -> vector<8x256xf32>
    %186 = vector.broadcast %147 : vector<8x1xf32> to vector<8x256xf32>
    %187 = arith.addf %185, %186 : vector<8x256xf32>
    %cst_64 = arith.constant 0.000000e+00 : f32
    %188 = vector.broadcast %cst_64 : f32 to vector<8x256xf32>
    %189 = arith.maximumf %187, %188 : vector<8x256xf32>
    %190 = arith.truncf %189 : vector<8x256xf32> to vector<8x256xbf16>
    %c3_65 = arith.constant 3 : index
    %c0_66 = arith.constant 0 : index
    %c0_67 = arith.constant 0 : index
    %191 = vector.load %arg3[%c3_65, %c0_66, %c0_67] : memref<5x8x72xbf16, #tpu.memory_space<vmem>>, vector<1x8x72xbf16>
    %192 = vector.shape_cast %191 : vector<1x8x72xbf16> to vector<8x72xbf16>
    %c4 = arith.constant 4 : index
    %c0_68 = arith.constant 0 : index
    %c0_69 = arith.constant 0 : index
    %193 = vector.load %arg4[%c4, %c0_68, %c0_69] : memref<6x8x1xf32, #tpu.memory_space<vmem>>, vector<1x8x1xf32>
    %194 = vector.shape_cast %193 : vector<1x8x1xf32> to vector<8x1xf32>
    %cst_70 = arith.constant 0.000000e+00 : bf16
    %195 = vector.broadcast %cst_70 : bf16 to vector<8x16xbf16>
    %196 = vector.extract_strided_slice %190 {offsets = [0, 0], sizes = [8, 240], strides = [1, 1]} : vector<8x256xbf16> to vector<8x240xbf16>
    %197 = tpu.concatenate %195, %196 in 1 : vector<8x16xbf16>, vector<8x240xbf16> -> vector<8x256xbf16>
    %cst_71 = arith.constant 0.000000e+00 : bf16
    %198 = vector.broadcast %cst_71 : bf16 to vector<8x1xbf16>
    %199 = vector.extract_strided_slice %197 {offsets = [0, 0], sizes = [8, 255], strides = [1, 1]} : vector<8x256xbf16> to vector<8x255xbf16>
    %200 = tpu.concatenate %198, %199 in 1 : vector<8x1xbf16>, vector<8x255xbf16> -> vector<8x256xbf16>
    %201 = vector.broadcast %0 : vector<1x256xbf16> to vector<8x256xbf16>
    %202 = arith.mulf %200, %201 : vector<8x256xbf16>
    %cst_72 = arith.constant 0.000000e+00 : bf16
    %203 = vector.broadcast %cst_72 : bf16 to vector<8x1xbf16>
    %204 = vector.extract_strided_slice %197 {offsets = [0, 1], sizes = [8, 255], strides = [1, 1]} : vector<8x256xbf16> to vector<8x255xbf16>
    %205 = tpu.concatenate %204, %203 in 1 : vector<8x255xbf16>, vector<8x1xbf16> -> vector<8x256xbf16>
    %206 = vector.broadcast %1 : vector<1x256xbf16> to vector<8x256xbf16>
    %207 = arith.mulf %205, %206 : vector<8x256xbf16>
    %cst_73 = arith.constant 0.000000e+00 : bf16
    %208 = vector.broadcast %cst_73 : bf16 to vector<8x1xbf16>
    %209 = vector.extract_strided_slice %190 {offsets = [0, 0], sizes = [8, 255], strides = [1, 1]} : vector<8x256xbf16> to vector<8x255xbf16>
    %210 = tpu.concatenate %208, %209 in 1 : vector<8x1xbf16>, vector<8x255xbf16> -> vector<8x256xbf16>
    %211 = vector.broadcast %0 : vector<1x256xbf16> to vector<8x256xbf16>
    %212 = arith.mulf %210, %211 : vector<8x256xbf16>
    %cst_74 = arith.constant 0.000000e+00 : bf16
    %213 = vector.broadcast %cst_74 : bf16 to vector<8x1xbf16>
    %214 = vector.extract_strided_slice %190 {offsets = [0, 1], sizes = [8, 255], strides = [1, 1]} : vector<8x256xbf16> to vector<8x255xbf16>
    %215 = tpu.concatenate %214, %213 in 1 : vector<8x255xbf16>, vector<8x1xbf16> -> vector<8x256xbf16>
    %216 = vector.broadcast %1 : vector<1x256xbf16> to vector<8x256xbf16>
    %217 = arith.mulf %215, %216 : vector<8x256xbf16>
    %cst_75 = arith.constant 0.000000e+00 : bf16
    %218 = vector.broadcast %cst_75 : bf16 to vector<8x16xbf16>
    %219 = vector.extract_strided_slice %190 {offsets = [0, 16], sizes = [8, 240], strides = [1, 1]} : vector<8x256xbf16> to vector<8x240xbf16>
    %220 = tpu.concatenate %219, %218 in 1 : vector<8x240xbf16>, vector<8x16xbf16> -> vector<8x256xbf16>
    %cst_76 = arith.constant 0.000000e+00 : bf16
    %221 = vector.broadcast %cst_76 : bf16 to vector<8x1xbf16>
    %222 = vector.extract_strided_slice %220 {offsets = [0, 0], sizes = [8, 255], strides = [1, 1]} : vector<8x256xbf16> to vector<8x255xbf16>
    %223 = tpu.concatenate %221, %222 in 1 : vector<8x1xbf16>, vector<8x255xbf16> -> vector<8x256xbf16>
    %224 = vector.broadcast %0 : vector<1x256xbf16> to vector<8x256xbf16>
    %225 = arith.mulf %223, %224 : vector<8x256xbf16>
    %cst_77 = arith.constant 0.000000e+00 : bf16
    %226 = vector.broadcast %cst_77 : bf16 to vector<8x1xbf16>
    %227 = vector.extract_strided_slice %220 {offsets = [0, 1], sizes = [8, 255], strides = [1, 1]} : vector<8x256xbf16> to vector<8x255xbf16>
    %228 = tpu.concatenate %227, %226 in 1 : vector<8x255xbf16>, vector<8x1xbf16> -> vector<8x256xbf16>
    %229 = vector.broadcast %1 : vector<1x256xbf16> to vector<8x256xbf16>
    %230 = arith.mulf %228, %229 : vector<8x256xbf16>
    %231 = tpu.concatenate %202, %197, %207, %212, %190, %217, %225, %220, %230 in 0 : vector<8x256xbf16>, vector<8x256xbf16>, vector<8x256xbf16>, vector<8x256xbf16>, vector<8x256xbf16>, vector<8x256xbf16>, vector<8x256xbf16>, vector<8x256xbf16>, vector<8x256xbf16> -> vector<72x256xbf16>
    %cst_78 = arith.constant dense<0.000000e+00> : vector<8x256xf32>
    %232 = tpu.matmul %192, %231, %cst_78 {dimension_numbers = #tpu.dot_dimension_numbers<[1], [0], [0], [1], [0, 0, 1, 1], [], []>} : vector<8x72xbf16>, vector<72x256xbf16>, vector<8x256xf32> -> vector<8x256xf32>
    %233 = vector.broadcast %194 : vector<8x1xf32> to vector<8x256xf32>
    %234 = arith.addf %232, %233 : vector<8x256xf32>
    %cst_79 = arith.constant 0.000000e+00 : f32
    %235 = vector.broadcast %cst_79 : f32 to vector<8x256xf32>
    %236 = arith.maximumf %234, %235 : vector<8x256xf32>
    %237 = arith.truncf %236 : vector<8x256xf32> to vector<8x256xbf16>
    %c4_80 = arith.constant 4 : index
    %c0_81 = arith.constant 0 : index
    %c0_82 = arith.constant 0 : index
    %238 = vector.load %arg3[%c4_80, %c0_81, %c0_82] : memref<5x8x72xbf16, #tpu.memory_space<vmem>>, vector<1x8x72xbf16>
    %239 = vector.shape_cast %238 : vector<1x8x72xbf16> to vector<8x72xbf16>
    %c5 = arith.constant 5 : index
    %c0_83 = arith.constant 0 : index
    %c0_84 = arith.constant 0 : index
    %240 = vector.load %arg4[%c5, %c0_83, %c0_84] : memref<6x8x1xf32, #tpu.memory_space<vmem>>, vector<1x8x1xf32>
    %241 = vector.shape_cast %240 : vector<1x8x1xf32> to vector<8x1xf32>
    %cst_85 = arith.constant 0.000000e+00 : bf16
    %242 = vector.broadcast %cst_85 : bf16 to vector<8x16xbf16>
    %243 = vector.extract_strided_slice %237 {offsets = [0, 0], sizes = [8, 240], strides = [1, 1]} : vector<8x256xbf16> to vector<8x240xbf16>
    %244 = tpu.concatenate %242, %243 in 1 : vector<8x16xbf16>, vector<8x240xbf16> -> vector<8x256xbf16>
    %cst_86 = arith.constant 0.000000e+00 : bf16
    %245 = vector.broadcast %cst_86 : bf16 to vector<8x1xbf16>
    %246 = vector.extract_strided_slice %244 {offsets = [0, 0], sizes = [8, 255], strides = [1, 1]} : vector<8x256xbf16> to vector<8x255xbf16>
    %247 = tpu.concatenate %245, %246 in 1 : vector<8x1xbf16>, vector<8x255xbf16> -> vector<8x256xbf16>
    %248 = vector.broadcast %0 : vector<1x256xbf16> to vector<8x256xbf16>
    %249 = arith.mulf %247, %248 : vector<8x256xbf16>
    %cst_87 = arith.constant 0.000000e+00 : bf16
    %250 = vector.broadcast %cst_87 : bf16 to vector<8x1xbf16>
    %251 = vector.extract_strided_slice %244 {offsets = [0, 1], sizes = [8, 255], strides = [1, 1]} : vector<8x256xbf16> to vector<8x255xbf16>
    %252 = tpu.concatenate %251, %250 in 1 : vector<8x255xbf16>, vector<8x1xbf16> -> vector<8x256xbf16>
    %253 = vector.broadcast %1 : vector<1x256xbf16> to vector<8x256xbf16>
    %254 = arith.mulf %252, %253 : vector<8x256xbf16>
    %cst_88 = arith.constant 0.000000e+00 : bf16
    %255 = vector.broadcast %cst_88 : bf16 to vector<8x1xbf16>
    %256 = vector.extract_strided_slice %237 {offsets = [0, 0], sizes = [8, 255], strides = [1, 1]} : vector<8x256xbf16> to vector<8x255xbf16>
    %257 = tpu.concatenate %255, %256 in 1 : vector<8x1xbf16>, vector<8x255xbf16> -> vector<8x256xbf16>
    %258 = vector.broadcast %0 : vector<1x256xbf16> to vector<8x256xbf16>
    %259 = arith.mulf %257, %258 : vector<8x256xbf16>
    %cst_89 = arith.constant 0.000000e+00 : bf16
    %260 = vector.broadcast %cst_89 : bf16 to vector<8x1xbf16>
    %261 = vector.extract_strided_slice %237 {offsets = [0, 1], sizes = [8, 255], strides = [1, 1]} : vector<8x256xbf16> to vector<8x255xbf16>
    %262 = tpu.concatenate %261, %260 in 1 : vector<8x255xbf16>, vector<8x1xbf16> -> vector<8x256xbf16>
    %263 = vector.broadcast %1 : vector<1x256xbf16> to vector<8x256xbf16>
    %264 = arith.mulf %262, %263 : vector<8x256xbf16>
    %cst_90 = arith.constant 0.000000e+00 : bf16
    %265 = vector.broadcast %cst_90 : bf16 to vector<8x16xbf16>
    %266 = vector.extract_strided_slice %237 {offsets = [0, 16], sizes = [8, 240], strides = [1, 1]} : vector<8x256xbf16> to vector<8x240xbf16>
    %267 = tpu.concatenate %266, %265 in 1 : vector<8x240xbf16>, vector<8x16xbf16> -> vector<8x256xbf16>
    %cst_91 = arith.constant 0.000000e+00 : bf16
    %268 = vector.broadcast %cst_91 : bf16 to vector<8x1xbf16>
    %269 = vector.extract_strided_slice %267 {offsets = [0, 0], sizes = [8, 255], strides = [1, 1]} : vector<8x256xbf16> to vector<8x255xbf16>
    %270 = tpu.concatenate %268, %269 in 1 : vector<8x1xbf16>, vector<8x255xbf16> -> vector<8x256xbf16>
    %271 = vector.broadcast %0 : vector<1x256xbf16> to vector<8x256xbf16>
    %272 = arith.mulf %270, %271 : vector<8x256xbf16>
    %cst_92 = arith.constant 0.000000e+00 : bf16
    %273 = vector.broadcast %cst_92 : bf16 to vector<8x1xbf16>
    %274 = vector.extract_strided_slice %267 {offsets = [0, 1], sizes = [8, 255], strides = [1, 1]} : vector<8x256xbf16> to vector<8x255xbf16>
    %275 = tpu.concatenate %274, %273 in 1 : vector<8x255xbf16>, vector<8x1xbf16> -> vector<8x256xbf16>
    %276 = vector.broadcast %1 : vector<1x256xbf16> to vector<8x256xbf16>
    %277 = arith.mulf %275, %276 : vector<8x256xbf16>
    %278 = tpu.concatenate %249, %244, %254, %259, %237, %264, %272, %267, %277 in 0 : vector<8x256xbf16>, vector<8x256xbf16>, vector<8x256xbf16>, vector<8x256xbf16>, vector<8x256xbf16>, vector<8x256xbf16>, vector<8x256xbf16>, vector<8x256xbf16>, vector<8x256xbf16> -> vector<72x256xbf16>
    %cst_93 = arith.constant dense<0.000000e+00> : vector<8x256xf32>
    %279 = tpu.matmul %239, %278, %cst_93 {dimension_numbers = #tpu.dot_dimension_numbers<[1], [0], [0], [1], [0, 0, 1, 1], [], []>} : vector<8x72xbf16>, vector<72x256xbf16>, vector<8x256xf32> -> vector<8x256xf32>
    %280 = vector.broadcast %241 : vector<8x1xf32> to vector<8x256xf32>
    %281 = arith.addf %279, %280 : vector<8x256xf32>
    %c0_94 = arith.constant 0 : index
    %c0_95 = arith.constant 0 : index
    %c0_96 = arith.constant 0 : index
    %282 = vector.load %arg7[%c0_94, %c0_95, %c0_96] : memref<1x8x256xf32, #tpu.memory_space<vmem>>, vector<1x8x256xf32>
    %283 = vector.shape_cast %282 : vector<1x8x256xf32> to vector<8x256xf32>
    %284 = vector.shape_cast %281 : vector<8x256xf32> to vector<1x8x256xf32>
    tpu.vector_store %arg7[%c0_94, %c0_95, %c0_96], %284 {strides = array<i32>} : memref<1x8x256xf32, #tpu.memory_space<vmem>>, vector<1x8x256xf32>,
    %cst_97 = arith.constant 0.000000e+00 : f32
    %285 = vector.broadcast %cst_97 : f32 to vector<8x1xf32>
    %286 = vector.extract_strided_slice %281 {offsets = [0, 1], sizes = [8, 255], strides = [1, 1]} : vector<8x256xf32> to vector<8x255xf32>
    %287 = tpu.concatenate %286, %285 in 1 : vector<8x255xf32>, vector<8x1xf32> -> vector<8x256xf32>
    %288 = arith.maximumf %281, %287 : vector<8x256xf32>
    %cst_98 = arith.constant 0.000000e+00 : f32
    %289 = vector.broadcast %cst_98 : f32 to vector<8x16xf32>
    %290 = vector.extract_strided_slice %288 {offsets = [0, 16], sizes = [8, 240], strides = [1, 1]} : vector<8x256xf32> to vector<8x240xf32>
    %291 = tpu.concatenate %290, %289 in 1 : vector<8x240xf32>, vector<8x16xf32> -> vector<8x256xf32>
    %292 = arith.maximumf %288, %291 : vector<8x256xf32>
    %293 = arith.truncf %292 : vector<8x256xf32> to vector<8x256xbf16>
    %c0_99 = arith.constant 0 : index
    %c0_100 = arith.constant 0 : index
    %294 = vector.load %arg6[%c0_99, %c0_100] : memref<256x64xbf16, #tpu.memory_space<vmem>>, vector<256x64xbf16>
    %cst_101 = arith.constant dense<0.000000e+00> : vector<8x64xf32>
    %295 = tpu.matmul %293, %294, %cst_101 {dimension_numbers = #tpu.dot_dimension_numbers<[1], [0], [0], [1], [0, 0, 1, 1], [], []>} : vector<8x256xbf16>, vector<256x64xbf16>, vector<8x64xf32> -> vector<8x64xf32>
    %296 = arith.truncf %295 : vector<8x64xf32> to vector<8x64xbf16>
    %c0_102 = arith.constant 0 : index
    %c0_103 = arith.constant 0 : index
    %c0_104 = arith.constant 0 : index
    %297 = vector.load %arg8[%c0_102, %c0_103, %c0_104] : memref<1x8x64xbf16, #tpu.memory_space<vmem>>, vector<1x8x64xbf16>
    %298 = vector.shape_cast %297 : vector<1x8x64xbf16> to vector<8x64xbf16>
    %299 = vector.shape_cast %296 : vector<8x64xbf16> to vector<1x8x64xbf16>
    tpu.vector_store %arg8[%c0_102, %c0_103, %c0_104], %299 {strides = array<i32>} : memref<1x8x64xbf16, #tpu.memory_space<vmem>>, vector<1x8x64xbf16>,
    return
  }
  func.func @transform_0(%arg0: i32) -> (i32, i32, i32) {
    %c0_i32 = arith.constant 0 : i32
    %c0_i32_0 = arith.constant 0 : i32
    %c0_i32_1 = arith.constant 0 : i32
    return %arg0, %c0_i32, %c0_i32_0 : i32, i32, i32
  }
  func.func @transform_1(%arg0: i32) -> (i32, i32) {
    %c0_i32 = arith.constant 0 : i32
    %c0_i32_0 = arith.constant 0 : i32
    %c0_i32_1 = arith.constant 0 : i32
    return %c0_i32, %c0_i32_0 : i32, i32
  }
  func.func @transform_2(%arg0: i32) -> (i32, i32, i32) {
    %c0_i32 = arith.constant 0 : i32
    %c0_i32_0 = arith.constant 0 : i32
    %c0_i32_1 = arith.constant 0 : i32
    %c0_i32_2 = arith.constant 0 : i32
    return %c0_i32, %c0_i32_0, %c0_i32_1 : i32, i32, i32
  }
  func.func @transform_3(%arg0: i32) -> (i32, i32, i32) {
    %c0_i32 = arith.constant 0 : i32
    %c0_i32_0 = arith.constant 0 : i32
    %c0_i32_1 = arith.constant 0 : i32
    %c0_i32_2 = arith.constant 0 : i32
    return %c0_i32, %c0_i32_0, %c0_i32_1 : i32, i32, i32
  }
  func.func @transform_4(%arg0: i32) -> (i32, i32) {
    %c0_i32 = arith.constant 0 : i32
    %c0_i32_0 = arith.constant 0 : i32
    %c0_i32_1 = arith.constant 0 : i32
    return %c0_i32, %c0_i32_0 : i32, i32
  }
  func.func @transform_5(%arg0: i32) -> (i32, i32) {
    %c0_i32 = arith.constant 0 : i32
    %c0_i32_0 = arith.constant 0 : i32
    %c0_i32_1 = arith.constant 0 : i32
    return %c0_i32, %c0_i32_0 : i32, i32
  }
  func.func @transform_6(%arg0: i32) -> (i32, i32, i32) {
    %c0_i32 = arith.constant 0 : i32
    %c0_i32_0 = arith.constant 0 : i32
    %c0_i32_1 = arith.constant 0 : i32
    return %arg0, %c0_i32, %c0_i32_0 : i32, i32, i32
  }
  func.func @transform_7(%arg0: i32) -> (i32, i32, i32) {
    %c0_i32 = arith.constant 0 : i32
    %c0_i32_0 = arith.constant 0 : i32
    %c0_i32_1 = arith.constant 0 : i32
    return %arg0, %c0_i32, %c0_i32_0 : i32, i32, i32
  }
}

module attributes {stable_mosaic.version = 11 : i64} {
  func.func @_block_kernel(%arg0: i32, %arg1: memref<1x8x64xbf16, #tpu.memory_space<vmem>>, %arg2: memref<16x72xbf16, #tpu.memory_space<vmem>>, %arg3: memref<5x16x144xbf16, #tpu.memory_space<vmem>>, %arg4: memref<6x16x1xf32, #tpu.memory_space<vmem>>, %arg5: memref<2x64xbf16, #tpu.memory_space<vmem>>, %arg6: memref<64x16xbf16, #tpu.memory_space<vmem>>, %arg7: memref<1x16x64xf32, #tpu.memory_space<vmem>>, %arg8: memref<1x16x16xbf16, #tpu.memory_space<vmem>>) attributes {dimension_semantics = [#tpu.dimension_semantics<parallel>], iteration_bounds = array<i64: 2>, scalar_prefetch = 0 : i64, scratch_operands = 0 : i64, tpu.core_type = #tpu.core_type<tc>, window_params = [{transform_indices = @transform_0, window_bounds = array<i64: 1, 8, 64>}, {pipeline_mode = #tpu.pipeline_mode<synchronous>, transform_indices = @transform_1, window_bounds = array<i64: 16, 72>}, {pipeline_mode = #tpu.pipeline_mode<synchronous>, transform_indices = @transform_2, window_bounds = array<i64: 5, 16, 144>}, {pipeline_mode = #tpu.pipeline_mode<synchronous>, transform_indices = @transform_3, window_bounds = array<i64: 6, 16, 1>}, {pipeline_mode = #tpu.pipeline_mode<synchronous>, transform_indices = @transform_4, window_bounds = array<i64: 2, 64>}, {pipeline_mode = #tpu.pipeline_mode<synchronous>, transform_indices = @transform_5, window_bounds = array<i64: 64, 16>}, {transform_indices = @transform_6, window_bounds = array<i64: 1, 16, 64>}, {transform_indices = @transform_7, window_bounds = array<i64: 1, 16, 16>}]} {
    %c0 = arith.constant 0 : index
    %c0_0 = arith.constant 0 : index
    %0 = vector.load %arg5[%c0, %c0_0] : memref<2x64xbf16, #tpu.memory_space<vmem>>, vector<1x64xbf16>
    %c1 = arith.constant 1 : index
    %c0_1 = arith.constant 0 : index
    %1 = vector.load %arg5[%c1, %c0_1] : memref<2x64xbf16, #tpu.memory_space<vmem>>, vector<1x64xbf16>
    %c0_2 = arith.constant 0 : index
    %c0_3 = arith.constant 0 : index
    %c0_4 = arith.constant 0 : index
    %2 = vector.load %arg1[%c0_2, %c0_3, %c0_4] : memref<1x8x64xbf16, #tpu.memory_space<vmem>>, vector<1x8x64xbf16>
    %3 = vector.shape_cast %2 : vector<1x8x64xbf16> to vector<8x64xbf16>
    %c0_5 = arith.constant 0 : index
    %c0_6 = arith.constant 0 : index
    %4 = vector.load %arg2[%c0_5, %c0_6] : memref<16x72xbf16, #tpu.memory_space<vmem>>, vector<16x72xbf16>
    %c0_7 = arith.constant 0 : index
    %c0_8 = arith.constant 0 : index
    %c0_9 = arith.constant 0 : index
    %5 = vector.load %arg4[%c0_7, %c0_8, %c0_9] : memref<6x16x1xf32, #tpu.memory_space<vmem>>, vector<1x16x1xf32>
    %6 = vector.shape_cast %5 : vector<1x16x1xf32> to vector<16x1xf32>
    %cst = arith.constant 0.000000e+00 : bf16
    %7 = vector.broadcast %cst : bf16 to vector<8x8xbf16>
    %8 = vector.extract_strided_slice %3 {offsets = [0, 0], sizes = [8, 56], strides = [1, 1]} : vector<8x64xbf16> to vector<8x56xbf16>
    %9 = tpu.concatenate %7, %8 in 1 : vector<8x8xbf16>, vector<8x56xbf16> -> vector<8x64xbf16>
    %cst_10 = arith.constant 0.000000e+00 : bf16
    %10 = vector.broadcast %cst_10 : bf16 to vector<8x1xbf16>
    %11 = vector.extract_strided_slice %9 {offsets = [0, 0], sizes = [8, 63], strides = [1, 1]} : vector<8x64xbf16> to vector<8x63xbf16>
    %12 = tpu.concatenate %10, %11 in 1 : vector<8x1xbf16>, vector<8x63xbf16> -> vector<8x64xbf16>
    %13 = vector.broadcast %0 : vector<1x64xbf16> to vector<8x64xbf16>
    %14 = arith.mulf %12, %13 : vector<8x64xbf16>
    %cst_11 = arith.constant 0.000000e+00 : bf16
    %15 = vector.broadcast %cst_11 : bf16 to vector<8x1xbf16>
    %16 = vector.extract_strided_slice %9 {offsets = [0, 1], sizes = [8, 63], strides = [1, 1]} : vector<8x64xbf16> to vector<8x63xbf16>
    %17 = tpu.concatenate %16, %15 in 1 : vector<8x63xbf16>, vector<8x1xbf16> -> vector<8x64xbf16>
    %18 = vector.broadcast %1 : vector<1x64xbf16> to vector<8x64xbf16>
    %19 = arith.mulf %17, %18 : vector<8x64xbf16>
    %cst_12 = arith.constant 0.000000e+00 : bf16
    %20 = vector.broadcast %cst_12 : bf16 to vector<8x1xbf16>
    %21 = vector.extract_strided_slice %3 {offsets = [0, 0], sizes = [8, 63], strides = [1, 1]} : vector<8x64xbf16> to vector<8x63xbf16>
    %22 = tpu.concatenate %20, %21 in 1 : vector<8x1xbf16>, vector<8x63xbf16> -> vector<8x64xbf16>
    %23 = vector.broadcast %0 : vector<1x64xbf16> to vector<8x64xbf16>
    %24 = arith.mulf %22, %23 : vector<8x64xbf16>
    %cst_13 = arith.constant 0.000000e+00 : bf16
    %25 = vector.broadcast %cst_13 : bf16 to vector<8x1xbf16>
    %26 = vector.extract_strided_slice %3 {offsets = [0, 1], sizes = [8, 63], strides = [1, 1]} : vector<8x64xbf16> to vector<8x63xbf16>
    %27 = tpu.concatenate %26, %25 in 1 : vector<8x63xbf16>, vector<8x1xbf16> -> vector<8x64xbf16>
    %28 = vector.broadcast %1 : vector<1x64xbf16> to vector<8x64xbf16>
    %29 = arith.mulf %27, %28 : vector<8x64xbf16>
    %cst_14 = arith.constant 0.000000e+00 : bf16
    %30 = vector.broadcast %cst_14 : bf16 to vector<8x8xbf16>
    %31 = vector.extract_strided_slice %3 {offsets = [0, 8], sizes = [8, 56], strides = [1, 1]} : vector<8x64xbf16> to vector<8x56xbf16>
    %32 = tpu.concatenate %31, %30 in 1 : vector<8x56xbf16>, vector<8x8xbf16> -> vector<8x64xbf16>
    %cst_15 = arith.constant 0.000000e+00 : bf16
    %33 = vector.broadcast %cst_15 : bf16 to vector<8x1xbf16>
    %34 = vector.extract_strided_slice %32 {offsets = [0, 0], sizes = [8, 63], strides = [1, 1]} : vector<8x64xbf16> to vector<8x63xbf16>
    %35 = tpu.concatenate %33, %34 in 1 : vector<8x1xbf16>, vector<8x63xbf16> -> vector<8x64xbf16>
    %36 = vector.broadcast %0 : vector<1x64xbf16> to vector<8x64xbf16>
    %37 = arith.mulf %35, %36 : vector<8x64xbf16>
    %cst_16 = arith.constant 0.000000e+00 : bf16
    %38 = vector.broadcast %cst_16 : bf16 to vector<8x1xbf16>
    %39 = vector.extract_strided_slice %32 {offsets = [0, 1], sizes = [8, 63], strides = [1, 1]} : vector<8x64xbf16> to vector<8x63xbf16>
    %40 = tpu.concatenate %39, %38 in 1 : vector<8x63xbf16>, vector<8x1xbf16> -> vector<8x64xbf16>
    %41 = vector.broadcast %1 : vector<1x64xbf16> to vector<8x64xbf16>
    %42 = arith.mulf %40, %41 : vector<8x64xbf16>
    %43 = tpu.concatenate %14, %9, %19, %24, %3, %29, %37, %32, %42 in 0 : vector<8x64xbf16>, vector<8x64xbf16>, vector<8x64xbf16>, vector<8x64xbf16>, vector<8x64xbf16>, vector<8x64xbf16>, vector<8x64xbf16>, vector<8x64xbf16>, vector<8x64xbf16> -> vector<72x64xbf16>
    %cst_17 = arith.constant dense<0.000000e+00> : vector<16x64xf32>
    %44 = tpu.matmul %4, %43, %cst_17 {dimension_numbers = #tpu.dot_dimension_numbers<[1], [0], [0], [1], [0, 0, 1, 1], [], []>} : vector<16x72xbf16>, vector<72x64xbf16>, vector<16x64xf32> -> vector<16x64xf32>
    %45 = vector.broadcast %6 : vector<16x1xf32> to vector<16x64xf32>
    %46 = arith.addf %44, %45 : vector<16x64xf32>
    %cst_18 = arith.constant 0.000000e+00 : f32
    %47 = vector.broadcast %cst_18 : f32 to vector<16x64xf32>
    %48 = arith.maximumf %46, %47 : vector<16x64xf32>
    %49 = arith.truncf %48 : vector<16x64xf32> to vector<16x64xbf16>
    %c0_19 = arith.constant 0 : index
    %c0_20 = arith.constant 0 : index
    %c0_21 = arith.constant 0 : index
    %50 = vector.load %arg3[%c0_19, %c0_20, %c0_21] : memref<5x16x144xbf16, #tpu.memory_space<vmem>>, vector<1x16x144xbf16>
    %51 = vector.shape_cast %50 : vector<1x16x144xbf16> to vector<16x144xbf16>
    %c1_22 = arith.constant 1 : index
    %c0_23 = arith.constant 0 : index
    %c0_24 = arith.constant 0 : index
    %52 = vector.load %arg4[%c1_22, %c0_23, %c0_24] : memref<6x16x1xf32, #tpu.memory_space<vmem>>, vector<1x16x1xf32>
    %53 = vector.shape_cast %52 : vector<1x16x1xf32> to vector<16x1xf32>
    %cst_25 = arith.constant 0.000000e+00 : bf16
    %54 = vector.broadcast %cst_25 : bf16 to vector<16x8xbf16>
    %55 = vector.extract_strided_slice %49 {offsets = [0, 0], sizes = [16, 56], strides = [1, 1]} : vector<16x64xbf16> to vector<16x56xbf16>
    %56 = tpu.concatenate %54, %55 in 1 : vector<16x8xbf16>, vector<16x56xbf16> -> vector<16x64xbf16>
    %cst_26 = arith.constant 0.000000e+00 : bf16
    %57 = vector.broadcast %cst_26 : bf16 to vector<16x1xbf16>
    %58 = vector.extract_strided_slice %56 {offsets = [0, 0], sizes = [16, 63], strides = [1, 1]} : vector<16x64xbf16> to vector<16x63xbf16>
    %59 = tpu.concatenate %57, %58 in 1 : vector<16x1xbf16>, vector<16x63xbf16> -> vector<16x64xbf16>
    %60 = vector.broadcast %0 : vector<1x64xbf16> to vector<16x64xbf16>
    %61 = arith.mulf %59, %60 : vector<16x64xbf16>
    %cst_27 = arith.constant 0.000000e+00 : bf16
    %62 = vector.broadcast %cst_27 : bf16 to vector<16x1xbf16>
    %63 = vector.extract_strided_slice %56 {offsets = [0, 1], sizes = [16, 63], strides = [1, 1]} : vector<16x64xbf16> to vector<16x63xbf16>
    %64 = tpu.concatenate %63, %62 in 1 : vector<16x63xbf16>, vector<16x1xbf16> -> vector<16x64xbf16>
    %65 = vector.broadcast %1 : vector<1x64xbf16> to vector<16x64xbf16>
    %66 = arith.mulf %64, %65 : vector<16x64xbf16>
    %cst_28 = arith.constant 0.000000e+00 : bf16
    %67 = vector.broadcast %cst_28 : bf16 to vector<16x1xbf16>
    %68 = vector.extract_strided_slice %49 {offsets = [0, 0], sizes = [16, 63], strides = [1, 1]} : vector<16x64xbf16> to vector<16x63xbf16>
    %69 = tpu.concatenate %67, %68 in 1 : vector<16x1xbf16>, vector<16x63xbf16> -> vector<16x64xbf16>
    %70 = vector.broadcast %0 : vector<1x64xbf16> to vector<16x64xbf16>
    %71 = arith.mulf %69, %70 : vector<16x64xbf16>
    %cst_29 = arith.constant 0.000000e+00 : bf16
    %72 = vector.broadcast %cst_29 : bf16 to vector<16x1xbf16>
    %73 = vector.extract_strided_slice %49 {offsets = [0, 1], sizes = [16, 63], strides = [1, 1]} : vector<16x64xbf16> to vector<16x63xbf16>
    %74 = tpu.concatenate %73, %72 in 1 : vector<16x63xbf16>, vector<16x1xbf16> -> vector<16x64xbf16>
    %75 = vector.broadcast %1 : vector<1x64xbf16> to vector<16x64xbf16>
    %76 = arith.mulf %74, %75 : vector<16x64xbf16>
    %cst_30 = arith.constant 0.000000e+00 : bf16
    %77 = vector.broadcast %cst_30 : bf16 to vector<16x8xbf16>
    %78 = vector.extract_strided_slice %49 {offsets = [0, 8], sizes = [16, 56], strides = [1, 1]} : vector<16x64xbf16> to vector<16x56xbf16>
    %79 = tpu.concatenate %78, %77 in 1 : vector<16x56xbf16>, vector<16x8xbf16> -> vector<16x64xbf16>
    %cst_31 = arith.constant 0.000000e+00 : bf16
    %80 = vector.broadcast %cst_31 : bf16 to vector<16x1xbf16>
    %81 = vector.extract_strided_slice %79 {offsets = [0, 0], sizes = [16, 63], strides = [1, 1]} : vector<16x64xbf16> to vector<16x63xbf16>
    %82 = tpu.concatenate %80, %81 in 1 : vector<16x1xbf16>, vector<16x63xbf16> -> vector<16x64xbf16>
    %83 = vector.broadcast %0 : vector<1x64xbf16> to vector<16x64xbf16>
    %84 = arith.mulf %82, %83 : vector<16x64xbf16>
    %cst_32 = arith.constant 0.000000e+00 : bf16
    %85 = vector.broadcast %cst_32 : bf16 to vector<16x1xbf16>
    %86 = vector.extract_strided_slice %79 {offsets = [0, 1], sizes = [16, 63], strides = [1, 1]} : vector<16x64xbf16> to vector<16x63xbf16>
    %87 = tpu.concatenate %86, %85 in 1 : vector<16x63xbf16>, vector<16x1xbf16> -> vector<16x64xbf16>
    %88 = vector.broadcast %1 : vector<1x64xbf16> to vector<16x64xbf16>
    %89 = arith.mulf %87, %88 : vector<16x64xbf16>
    %90 = tpu.concatenate %61, %56, %66, %71, %49, %76, %84, %79, %89 in 0 : vector<16x64xbf16>, vector<16x64xbf16>, vector<16x64xbf16>, vector<16x64xbf16>, vector<16x64xbf16>, vector<16x64xbf16>, vector<16x64xbf16>, vector<16x64xbf16>, vector<16x64xbf16> -> vector<144x64xbf16>
    %cst_33 = arith.constant dense<0.000000e+00> : vector<16x64xf32>
    %91 = tpu.matmul %51, %90, %cst_33 {dimension_numbers = #tpu.dot_dimension_numbers<[1], [0], [0], [1], [0, 0, 1, 1], [], []>} : vector<16x144xbf16>, vector<144x64xbf16>, vector<16x64xf32> -> vector<16x64xf32>
    %92 = vector.broadcast %53 : vector<16x1xf32> to vector<16x64xf32>
    %93 = arith.addf %91, %92 : vector<16x64xf32>
    %cst_34 = arith.constant 0.000000e+00 : f32
    %94 = vector.broadcast %cst_34 : f32 to vector<16x64xf32>
    %95 = arith.maximumf %93, %94 : vector<16x64xf32>
    %96 = arith.truncf %95 : vector<16x64xf32> to vector<16x64xbf16>
    %c1_35 = arith.constant 1 : index
    %c0_36 = arith.constant 0 : index
    %c0_37 = arith.constant 0 : index
    %97 = vector.load %arg3[%c1_35, %c0_36, %c0_37] : memref<5x16x144xbf16, #tpu.memory_space<vmem>>, vector<1x16x144xbf16>
    %98 = vector.shape_cast %97 : vector<1x16x144xbf16> to vector<16x144xbf16>
    %c2 = arith.constant 2 : index
    %c0_38 = arith.constant 0 : index
    %c0_39 = arith.constant 0 : index
    %99 = vector.load %arg4[%c2, %c0_38, %c0_39] : memref<6x16x1xf32, #tpu.memory_space<vmem>>, vector<1x16x1xf32>
    %100 = vector.shape_cast %99 : vector<1x16x1xf32> to vector<16x1xf32>
    %cst_40 = arith.constant 0.000000e+00 : bf16
    %101 = vector.broadcast %cst_40 : bf16 to vector<16x8xbf16>
    %102 = vector.extract_strided_slice %96 {offsets = [0, 0], sizes = [16, 56], strides = [1, 1]} : vector<16x64xbf16> to vector<16x56xbf16>
    %103 = tpu.concatenate %101, %102 in 1 : vector<16x8xbf16>, vector<16x56xbf16> -> vector<16x64xbf16>
    %cst_41 = arith.constant 0.000000e+00 : bf16
    %104 = vector.broadcast %cst_41 : bf16 to vector<16x1xbf16>
    %105 = vector.extract_strided_slice %103 {offsets = [0, 0], sizes = [16, 63], strides = [1, 1]} : vector<16x64xbf16> to vector<16x63xbf16>
    %106 = tpu.concatenate %104, %105 in 1 : vector<16x1xbf16>, vector<16x63xbf16> -> vector<16x64xbf16>
    %107 = vector.broadcast %0 : vector<1x64xbf16> to vector<16x64xbf16>
    %108 = arith.mulf %106, %107 : vector<16x64xbf16>
    %cst_42 = arith.constant 0.000000e+00 : bf16
    %109 = vector.broadcast %cst_42 : bf16 to vector<16x1xbf16>
    %110 = vector.extract_strided_slice %103 {offsets = [0, 1], sizes = [16, 63], strides = [1, 1]} : vector<16x64xbf16> to vector<16x63xbf16>
    %111 = tpu.concatenate %110, %109 in 1 : vector<16x63xbf16>, vector<16x1xbf16> -> vector<16x64xbf16>
    %112 = vector.broadcast %1 : vector<1x64xbf16> to vector<16x64xbf16>
    %113 = arith.mulf %111, %112 : vector<16x64xbf16>
    %cst_43 = arith.constant 0.000000e+00 : bf16
    %114 = vector.broadcast %cst_43 : bf16 to vector<16x1xbf16>
    %115 = vector.extract_strided_slice %96 {offsets = [0, 0], sizes = [16, 63], strides = [1, 1]} : vector<16x64xbf16> to vector<16x63xbf16>
    %116 = tpu.concatenate %114, %115 in 1 : vector<16x1xbf16>, vector<16x63xbf16> -> vector<16x64xbf16>
    %117 = vector.broadcast %0 : vector<1x64xbf16> to vector<16x64xbf16>
    %118 = arith.mulf %116, %117 : vector<16x64xbf16>
    %cst_44 = arith.constant 0.000000e+00 : bf16
    %119 = vector.broadcast %cst_44 : bf16 to vector<16x1xbf16>
    %120 = vector.extract_strided_slice %96 {offsets = [0, 1], sizes = [16, 63], strides = [1, 1]} : vector<16x64xbf16> to vector<16x63xbf16>
    %121 = tpu.concatenate %120, %119 in 1 : vector<16x63xbf16>, vector<16x1xbf16> -> vector<16x64xbf16>
    %122 = vector.broadcast %1 : vector<1x64xbf16> to vector<16x64xbf16>
    %123 = arith.mulf %121, %122 : vector<16x64xbf16>
    %cst_45 = arith.constant 0.000000e+00 : bf16
    %124 = vector.broadcast %cst_45 : bf16 to vector<16x8xbf16>
    %125 = vector.extract_strided_slice %96 {offsets = [0, 8], sizes = [16, 56], strides = [1, 1]} : vector<16x64xbf16> to vector<16x56xbf16>
    %126 = tpu.concatenate %125, %124 in 1 : vector<16x56xbf16>, vector<16x8xbf16> -> vector<16x64xbf16>
    %cst_46 = arith.constant 0.000000e+00 : bf16
    %127 = vector.broadcast %cst_46 : bf16 to vector<16x1xbf16>
    %128 = vector.extract_strided_slice %126 {offsets = [0, 0], sizes = [16, 63], strides = [1, 1]} : vector<16x64xbf16> to vector<16x63xbf16>
    %129 = tpu.concatenate %127, %128 in 1 : vector<16x1xbf16>, vector<16x63xbf16> -> vector<16x64xbf16>
    %130 = vector.broadcast %0 : vector<1x64xbf16> to vector<16x64xbf16>
    %131 = arith.mulf %129, %130 : vector<16x64xbf16>
    %cst_47 = arith.constant 0.000000e+00 : bf16
    %132 = vector.broadcast %cst_47 : bf16 to vector<16x1xbf16>
    %133 = vector.extract_strided_slice %126 {offsets = [0, 1], sizes = [16, 63], strides = [1, 1]} : vector<16x64xbf16> to vector<16x63xbf16>
    %134 = tpu.concatenate %133, %132 in 1 : vector<16x63xbf16>, vector<16x1xbf16> -> vector<16x64xbf16>
    %135 = vector.broadcast %1 : vector<1x64xbf16> to vector<16x64xbf16>
    %136 = arith.mulf %134, %135 : vector<16x64xbf16>
    %137 = tpu.concatenate %108, %103, %113, %118, %96, %123, %131, %126, %136 in 0 : vector<16x64xbf16>, vector<16x64xbf16>, vector<16x64xbf16>, vector<16x64xbf16>, vector<16x64xbf16>, vector<16x64xbf16>, vector<16x64xbf16>, vector<16x64xbf16>, vector<16x64xbf16> -> vector<144x64xbf16>
    %cst_48 = arith.constant dense<0.000000e+00> : vector<16x64xf32>
    %138 = tpu.matmul %98, %137, %cst_48 {dimension_numbers = #tpu.dot_dimension_numbers<[1], [0], [0], [1], [0, 0, 1, 1], [], []>} : vector<16x144xbf16>, vector<144x64xbf16>, vector<16x64xf32> -> vector<16x64xf32>
    %139 = vector.broadcast %100 : vector<16x1xf32> to vector<16x64xf32>
    %140 = arith.addf %138, %139 : vector<16x64xf32>
    %cst_49 = arith.constant 0.000000e+00 : f32
    %141 = vector.broadcast %cst_49 : f32 to vector<16x64xf32>
    %142 = arith.maximumf %140, %141 : vector<16x64xf32>
    %143 = arith.truncf %142 : vector<16x64xf32> to vector<16x64xbf16>
    %c2_50 = arith.constant 2 : index
    %c0_51 = arith.constant 0 : index
    %c0_52 = arith.constant 0 : index
    %144 = vector.load %arg3[%c2_50, %c0_51, %c0_52] : memref<5x16x144xbf16, #tpu.memory_space<vmem>>, vector<1x16x144xbf16>
    %145 = vector.shape_cast %144 : vector<1x16x144xbf16> to vector<16x144xbf16>
    %c3 = arith.constant 3 : index
    %c0_53 = arith.constant 0 : index
    %c0_54 = arith.constant 0 : index
    %146 = vector.load %arg4[%c3, %c0_53, %c0_54] : memref<6x16x1xf32, #tpu.memory_space<vmem>>, vector<1x16x1xf32>
    %147 = vector.shape_cast %146 : vector<1x16x1xf32> to vector<16x1xf32>
    %cst_55 = arith.constant 0.000000e+00 : bf16
    %148 = vector.broadcast %cst_55 : bf16 to vector<16x8xbf16>
    %149 = vector.extract_strided_slice %143 {offsets = [0, 0], sizes = [16, 56], strides = [1, 1]} : vector<16x64xbf16> to vector<16x56xbf16>
    %150 = tpu.concatenate %148, %149 in 1 : vector<16x8xbf16>, vector<16x56xbf16> -> vector<16x64xbf16>
    %cst_56 = arith.constant 0.000000e+00 : bf16
    %151 = vector.broadcast %cst_56 : bf16 to vector<16x1xbf16>
    %152 = vector.extract_strided_slice %150 {offsets = [0, 0], sizes = [16, 63], strides = [1, 1]} : vector<16x64xbf16> to vector<16x63xbf16>
    %153 = tpu.concatenate %151, %152 in 1 : vector<16x1xbf16>, vector<16x63xbf16> -> vector<16x64xbf16>
    %154 = vector.broadcast %0 : vector<1x64xbf16> to vector<16x64xbf16>
    %155 = arith.mulf %153, %154 : vector<16x64xbf16>
    %cst_57 = arith.constant 0.000000e+00 : bf16
    %156 = vector.broadcast %cst_57 : bf16 to vector<16x1xbf16>
    %157 = vector.extract_strided_slice %150 {offsets = [0, 1], sizes = [16, 63], strides = [1, 1]} : vector<16x64xbf16> to vector<16x63xbf16>
    %158 = tpu.concatenate %157, %156 in 1 : vector<16x63xbf16>, vector<16x1xbf16> -> vector<16x64xbf16>
    %159 = vector.broadcast %1 : vector<1x64xbf16> to vector<16x64xbf16>
    %160 = arith.mulf %158, %159 : vector<16x64xbf16>
    %cst_58 = arith.constant 0.000000e+00 : bf16
    %161 = vector.broadcast %cst_58 : bf16 to vector<16x1xbf16>
    %162 = vector.extract_strided_slice %143 {offsets = [0, 0], sizes = [16, 63], strides = [1, 1]} : vector<16x64xbf16> to vector<16x63xbf16>
    %163 = tpu.concatenate %161, %162 in 1 : vector<16x1xbf16>, vector<16x63xbf16> -> vector<16x64xbf16>
    %164 = vector.broadcast %0 : vector<1x64xbf16> to vector<16x64xbf16>
    %165 = arith.mulf %163, %164 : vector<16x64xbf16>
    %cst_59 = arith.constant 0.000000e+00 : bf16
    %166 = vector.broadcast %cst_59 : bf16 to vector<16x1xbf16>
    %167 = vector.extract_strided_slice %143 {offsets = [0, 1], sizes = [16, 63], strides = [1, 1]} : vector<16x64xbf16> to vector<16x63xbf16>
    %168 = tpu.concatenate %167, %166 in 1 : vector<16x63xbf16>, vector<16x1xbf16> -> vector<16x64xbf16>
    %169 = vector.broadcast %1 : vector<1x64xbf16> to vector<16x64xbf16>
    %170 = arith.mulf %168, %169 : vector<16x64xbf16>
    %cst_60 = arith.constant 0.000000e+00 : bf16
    %171 = vector.broadcast %cst_60 : bf16 to vector<16x8xbf16>
    %172 = vector.extract_strided_slice %143 {offsets = [0, 8], sizes = [16, 56], strides = [1, 1]} : vector<16x64xbf16> to vector<16x56xbf16>
    %173 = tpu.concatenate %172, %171 in 1 : vector<16x56xbf16>, vector<16x8xbf16> -> vector<16x64xbf16>
    %cst_61 = arith.constant 0.000000e+00 : bf16
    %174 = vector.broadcast %cst_61 : bf16 to vector<16x1xbf16>
    %175 = vector.extract_strided_slice %173 {offsets = [0, 0], sizes = [16, 63], strides = [1, 1]} : vector<16x64xbf16> to vector<16x63xbf16>
    %176 = tpu.concatenate %174, %175 in 1 : vector<16x1xbf16>, vector<16x63xbf16> -> vector<16x64xbf16>
    %177 = vector.broadcast %0 : vector<1x64xbf16> to vector<16x64xbf16>
    %178 = arith.mulf %176, %177 : vector<16x64xbf16>
    %cst_62 = arith.constant 0.000000e+00 : bf16
    %179 = vector.broadcast %cst_62 : bf16 to vector<16x1xbf16>
    %180 = vector.extract_strided_slice %173 {offsets = [0, 1], sizes = [16, 63], strides = [1, 1]} : vector<16x64xbf16> to vector<16x63xbf16>
    %181 = tpu.concatenate %180, %179 in 1 : vector<16x63xbf16>, vector<16x1xbf16> -> vector<16x64xbf16>
    %182 = vector.broadcast %1 : vector<1x64xbf16> to vector<16x64xbf16>
    %183 = arith.mulf %181, %182 : vector<16x64xbf16>
    %184 = tpu.concatenate %155, %150, %160, %165, %143, %170, %178, %173, %183 in 0 : vector<16x64xbf16>, vector<16x64xbf16>, vector<16x64xbf16>, vector<16x64xbf16>, vector<16x64xbf16>, vector<16x64xbf16>, vector<16x64xbf16>, vector<16x64xbf16>, vector<16x64xbf16> -> vector<144x64xbf16>
    %cst_63 = arith.constant dense<0.000000e+00> : vector<16x64xf32>
    %185 = tpu.matmul %145, %184, %cst_63 {dimension_numbers = #tpu.dot_dimension_numbers<[1], [0], [0], [1], [0, 0, 1, 1], [], []>} : vector<16x144xbf16>, vector<144x64xbf16>, vector<16x64xf32> -> vector<16x64xf32>
    %186 = vector.broadcast %147 : vector<16x1xf32> to vector<16x64xf32>
    %187 = arith.addf %185, %186 : vector<16x64xf32>
    %cst_64 = arith.constant 0.000000e+00 : f32
    %188 = vector.broadcast %cst_64 : f32 to vector<16x64xf32>
    %189 = arith.maximumf %187, %188 : vector<16x64xf32>
    %190 = arith.truncf %189 : vector<16x64xf32> to vector<16x64xbf16>
    %c3_65 = arith.constant 3 : index
    %c0_66 = arith.constant 0 : index
    %c0_67 = arith.constant 0 : index
    %191 = vector.load %arg3[%c3_65, %c0_66, %c0_67] : memref<5x16x144xbf16, #tpu.memory_space<vmem>>, vector<1x16x144xbf16>
    %192 = vector.shape_cast %191 : vector<1x16x144xbf16> to vector<16x144xbf16>
    %c4 = arith.constant 4 : index
    %c0_68 = arith.constant 0 : index
    %c0_69 = arith.constant 0 : index
    %193 = vector.load %arg4[%c4, %c0_68, %c0_69] : memref<6x16x1xf32, #tpu.memory_space<vmem>>, vector<1x16x1xf32>
    %194 = vector.shape_cast %193 : vector<1x16x1xf32> to vector<16x1xf32>
    %cst_70 = arith.constant 0.000000e+00 : bf16
    %195 = vector.broadcast %cst_70 : bf16 to vector<16x8xbf16>
    %196 = vector.extract_strided_slice %190 {offsets = [0, 0], sizes = [16, 56], strides = [1, 1]} : vector<16x64xbf16> to vector<16x56xbf16>
    %197 = tpu.concatenate %195, %196 in 1 : vector<16x8xbf16>, vector<16x56xbf16> -> vector<16x64xbf16>
    %cst_71 = arith.constant 0.000000e+00 : bf16
    %198 = vector.broadcast %cst_71 : bf16 to vector<16x1xbf16>
    %199 = vector.extract_strided_slice %197 {offsets = [0, 0], sizes = [16, 63], strides = [1, 1]} : vector<16x64xbf16> to vector<16x63xbf16>
    %200 = tpu.concatenate %198, %199 in 1 : vector<16x1xbf16>, vector<16x63xbf16> -> vector<16x64xbf16>
    %201 = vector.broadcast %0 : vector<1x64xbf16> to vector<16x64xbf16>
    %202 = arith.mulf %200, %201 : vector<16x64xbf16>
    %cst_72 = arith.constant 0.000000e+00 : bf16
    %203 = vector.broadcast %cst_72 : bf16 to vector<16x1xbf16>
    %204 = vector.extract_strided_slice %197 {offsets = [0, 1], sizes = [16, 63], strides = [1, 1]} : vector<16x64xbf16> to vector<16x63xbf16>
    %205 = tpu.concatenate %204, %203 in 1 : vector<16x63xbf16>, vector<16x1xbf16> -> vector<16x64xbf16>
    %206 = vector.broadcast %1 : vector<1x64xbf16> to vector<16x64xbf16>
    %207 = arith.mulf %205, %206 : vector<16x64xbf16>
    %cst_73 = arith.constant 0.000000e+00 : bf16
    %208 = vector.broadcast %cst_73 : bf16 to vector<16x1xbf16>
    %209 = vector.extract_strided_slice %190 {offsets = [0, 0], sizes = [16, 63], strides = [1, 1]} : vector<16x64xbf16> to vector<16x63xbf16>
    %210 = tpu.concatenate %208, %209 in 1 : vector<16x1xbf16>, vector<16x63xbf16> -> vector<16x64xbf16>
    %211 = vector.broadcast %0 : vector<1x64xbf16> to vector<16x64xbf16>
    %212 = arith.mulf %210, %211 : vector<16x64xbf16>
    %cst_74 = arith.constant 0.000000e+00 : bf16
    %213 = vector.broadcast %cst_74 : bf16 to vector<16x1xbf16>
    %214 = vector.extract_strided_slice %190 {offsets = [0, 1], sizes = [16, 63], strides = [1, 1]} : vector<16x64xbf16> to vector<16x63xbf16>
    %215 = tpu.concatenate %214, %213 in 1 : vector<16x63xbf16>, vector<16x1xbf16> -> vector<16x64xbf16>
    %216 = vector.broadcast %1 : vector<1x64xbf16> to vector<16x64xbf16>
    %217 = arith.mulf %215, %216 : vector<16x64xbf16>
    %cst_75 = arith.constant 0.000000e+00 : bf16
    %218 = vector.broadcast %cst_75 : bf16 to vector<16x8xbf16>
    %219 = vector.extract_strided_slice %190 {offsets = [0, 8], sizes = [16, 56], strides = [1, 1]} : vector<16x64xbf16> to vector<16x56xbf16>
    %220 = tpu.concatenate %219, %218 in 1 : vector<16x56xbf16>, vector<16x8xbf16> -> vector<16x64xbf16>
    %cst_76 = arith.constant 0.000000e+00 : bf16
    %221 = vector.broadcast %cst_76 : bf16 to vector<16x1xbf16>
    %222 = vector.extract_strided_slice %220 {offsets = [0, 0], sizes = [16, 63], strides = [1, 1]} : vector<16x64xbf16> to vector<16x63xbf16>
    %223 = tpu.concatenate %221, %222 in 1 : vector<16x1xbf16>, vector<16x63xbf16> -> vector<16x64xbf16>
    %224 = vector.broadcast %0 : vector<1x64xbf16> to vector<16x64xbf16>
    %225 = arith.mulf %223, %224 : vector<16x64xbf16>
    %cst_77 = arith.constant 0.000000e+00 : bf16
    %226 = vector.broadcast %cst_77 : bf16 to vector<16x1xbf16>
    %227 = vector.extract_strided_slice %220 {offsets = [0, 1], sizes = [16, 63], strides = [1, 1]} : vector<16x64xbf16> to vector<16x63xbf16>
    %228 = tpu.concatenate %227, %226 in 1 : vector<16x63xbf16>, vector<16x1xbf16> -> vector<16x64xbf16>
    %229 = vector.broadcast %1 : vector<1x64xbf16> to vector<16x64xbf16>
    %230 = arith.mulf %228, %229 : vector<16x64xbf16>
    %231 = tpu.concatenate %202, %197, %207, %212, %190, %217, %225, %220, %230 in 0 : vector<16x64xbf16>, vector<16x64xbf16>, vector<16x64xbf16>, vector<16x64xbf16>, vector<16x64xbf16>, vector<16x64xbf16>, vector<16x64xbf16>, vector<16x64xbf16>, vector<16x64xbf16> -> vector<144x64xbf16>
    %cst_78 = arith.constant dense<0.000000e+00> : vector<16x64xf32>
    %232 = tpu.matmul %192, %231, %cst_78 {dimension_numbers = #tpu.dot_dimension_numbers<[1], [0], [0], [1], [0, 0, 1, 1], [], []>} : vector<16x144xbf16>, vector<144x64xbf16>, vector<16x64xf32> -> vector<16x64xf32>
    %233 = vector.broadcast %194 : vector<16x1xf32> to vector<16x64xf32>
    %234 = arith.addf %232, %233 : vector<16x64xf32>
    %cst_79 = arith.constant 0.000000e+00 : f32
    %235 = vector.broadcast %cst_79 : f32 to vector<16x64xf32>
    %236 = arith.maximumf %234, %235 : vector<16x64xf32>
    %237 = arith.truncf %236 : vector<16x64xf32> to vector<16x64xbf16>
    %c4_80 = arith.constant 4 : index
    %c0_81 = arith.constant 0 : index
    %c0_82 = arith.constant 0 : index
    %238 = vector.load %arg3[%c4_80, %c0_81, %c0_82] : memref<5x16x144xbf16, #tpu.memory_space<vmem>>, vector<1x16x144xbf16>
    %239 = vector.shape_cast %238 : vector<1x16x144xbf16> to vector<16x144xbf16>
    %c5 = arith.constant 5 : index
    %c0_83 = arith.constant 0 : index
    %c0_84 = arith.constant 0 : index
    %240 = vector.load %arg4[%c5, %c0_83, %c0_84] : memref<6x16x1xf32, #tpu.memory_space<vmem>>, vector<1x16x1xf32>
    %241 = vector.shape_cast %240 : vector<1x16x1xf32> to vector<16x1xf32>
    %cst_85 = arith.constant 0.000000e+00 : bf16
    %242 = vector.broadcast %cst_85 : bf16 to vector<16x8xbf16>
    %243 = vector.extract_strided_slice %237 {offsets = [0, 0], sizes = [16, 56], strides = [1, 1]} : vector<16x64xbf16> to vector<16x56xbf16>
    %244 = tpu.concatenate %242, %243 in 1 : vector<16x8xbf16>, vector<16x56xbf16> -> vector<16x64xbf16>
    %cst_86 = arith.constant 0.000000e+00 : bf16
    %245 = vector.broadcast %cst_86 : bf16 to vector<16x1xbf16>
    %246 = vector.extract_strided_slice %244 {offsets = [0, 0], sizes = [16, 63], strides = [1, 1]} : vector<16x64xbf16> to vector<16x63xbf16>
    %247 = tpu.concatenate %245, %246 in 1 : vector<16x1xbf16>, vector<16x63xbf16> -> vector<16x64xbf16>
    %248 = vector.broadcast %0 : vector<1x64xbf16> to vector<16x64xbf16>
    %249 = arith.mulf %247, %248 : vector<16x64xbf16>
    %cst_87 = arith.constant 0.000000e+00 : bf16
    %250 = vector.broadcast %cst_87 : bf16 to vector<16x1xbf16>
    %251 = vector.extract_strided_slice %244 {offsets = [0, 1], sizes = [16, 63], strides = [1, 1]} : vector<16x64xbf16> to vector<16x63xbf16>
    %252 = tpu.concatenate %251, %250 in 1 : vector<16x63xbf16>, vector<16x1xbf16> -> vector<16x64xbf16>
    %253 = vector.broadcast %1 : vector<1x64xbf16> to vector<16x64xbf16>
    %254 = arith.mulf %252, %253 : vector<16x64xbf16>
    %cst_88 = arith.constant 0.000000e+00 : bf16
    %255 = vector.broadcast %cst_88 : bf16 to vector<16x1xbf16>
    %256 = vector.extract_strided_slice %237 {offsets = [0, 0], sizes = [16, 63], strides = [1, 1]} : vector<16x64xbf16> to vector<16x63xbf16>
    %257 = tpu.concatenate %255, %256 in 1 : vector<16x1xbf16>, vector<16x63xbf16> -> vector<16x64xbf16>
    %258 = vector.broadcast %0 : vector<1x64xbf16> to vector<16x64xbf16>
    %259 = arith.mulf %257, %258 : vector<16x64xbf16>
    %cst_89 = arith.constant 0.000000e+00 : bf16
    %260 = vector.broadcast %cst_89 : bf16 to vector<16x1xbf16>
    %261 = vector.extract_strided_slice %237 {offsets = [0, 1], sizes = [16, 63], strides = [1, 1]} : vector<16x64xbf16> to vector<16x63xbf16>
    %262 = tpu.concatenate %261, %260 in 1 : vector<16x63xbf16>, vector<16x1xbf16> -> vector<16x64xbf16>
    %263 = vector.broadcast %1 : vector<1x64xbf16> to vector<16x64xbf16>
    %264 = arith.mulf %262, %263 : vector<16x64xbf16>
    %cst_90 = arith.constant 0.000000e+00 : bf16
    %265 = vector.broadcast %cst_90 : bf16 to vector<16x8xbf16>
    %266 = vector.extract_strided_slice %237 {offsets = [0, 8], sizes = [16, 56], strides = [1, 1]} : vector<16x64xbf16> to vector<16x56xbf16>
    %267 = tpu.concatenate %266, %265 in 1 : vector<16x56xbf16>, vector<16x8xbf16> -> vector<16x64xbf16>
    %cst_91 = arith.constant 0.000000e+00 : bf16
    %268 = vector.broadcast %cst_91 : bf16 to vector<16x1xbf16>
    %269 = vector.extract_strided_slice %267 {offsets = [0, 0], sizes = [16, 63], strides = [1, 1]} : vector<16x64xbf16> to vector<16x63xbf16>
    %270 = tpu.concatenate %268, %269 in 1 : vector<16x1xbf16>, vector<16x63xbf16> -> vector<16x64xbf16>
    %271 = vector.broadcast %0 : vector<1x64xbf16> to vector<16x64xbf16>
    %272 = arith.mulf %270, %271 : vector<16x64xbf16>
    %cst_92 = arith.constant 0.000000e+00 : bf16
    %273 = vector.broadcast %cst_92 : bf16 to vector<16x1xbf16>
    %274 = vector.extract_strided_slice %267 {offsets = [0, 1], sizes = [16, 63], strides = [1, 1]} : vector<16x64xbf16> to vector<16x63xbf16>
    %275 = tpu.concatenate %274, %273 in 1 : vector<16x63xbf16>, vector<16x1xbf16> -> vector<16x64xbf16>
    %276 = vector.broadcast %1 : vector<1x64xbf16> to vector<16x64xbf16>
    %277 = arith.mulf %275, %276 : vector<16x64xbf16>
    %278 = tpu.concatenate %249, %244, %254, %259, %237, %264, %272, %267, %277 in 0 : vector<16x64xbf16>, vector<16x64xbf16>, vector<16x64xbf16>, vector<16x64xbf16>, vector<16x64xbf16>, vector<16x64xbf16>, vector<16x64xbf16>, vector<16x64xbf16>, vector<16x64xbf16> -> vector<144x64xbf16>
    %cst_93 = arith.constant dense<0.000000e+00> : vector<16x64xf32>
    %279 = tpu.matmul %239, %278, %cst_93 {dimension_numbers = #tpu.dot_dimension_numbers<[1], [0], [0], [1], [0, 0, 1, 1], [], []>} : vector<16x144xbf16>, vector<144x64xbf16>, vector<16x64xf32> -> vector<16x64xf32>
    %280 = vector.broadcast %241 : vector<16x1xf32> to vector<16x64xf32>
    %281 = arith.addf %279, %280 : vector<16x64xf32>
    %c0_94 = arith.constant 0 : index
    %c0_95 = arith.constant 0 : index
    %c0_96 = arith.constant 0 : index
    %282 = vector.load %arg7[%c0_94, %c0_95, %c0_96] : memref<1x16x64xf32, #tpu.memory_space<vmem>>, vector<1x16x64xf32>
    %283 = vector.shape_cast %282 : vector<1x16x64xf32> to vector<16x64xf32>
    %284 = vector.shape_cast %281 : vector<16x64xf32> to vector<1x16x64xf32>
    tpu.vector_store %arg7[%c0_94, %c0_95, %c0_96], %284 {strides = array<i32>} : memref<1x16x64xf32, #tpu.memory_space<vmem>>, vector<1x16x64xf32>,
    %cst_97 = arith.constant 0.000000e+00 : f32
    %285 = vector.broadcast %cst_97 : f32 to vector<16x1xf32>
    %286 = vector.extract_strided_slice %281 {offsets = [0, 1], sizes = [16, 63], strides = [1, 1]} : vector<16x64xf32> to vector<16x63xf32>
    %287 = tpu.concatenate %286, %285 in 1 : vector<16x63xf32>, vector<16x1xf32> -> vector<16x64xf32>
    %288 = arith.maximumf %281, %287 : vector<16x64xf32>
    %cst_98 = arith.constant 0.000000e+00 : f32
    %289 = vector.broadcast %cst_98 : f32 to vector<16x8xf32>
    %290 = vector.extract_strided_slice %288 {offsets = [0, 8], sizes = [16, 56], strides = [1, 1]} : vector<16x64xf32> to vector<16x56xf32>
    %291 = tpu.concatenate %290, %289 in 1 : vector<16x56xf32>, vector<16x8xf32> -> vector<16x64xf32>
    %292 = arith.maximumf %288, %291 : vector<16x64xf32>
    %293 = arith.truncf %292 : vector<16x64xf32> to vector<16x64xbf16>
    %c0_99 = arith.constant 0 : index
    %c0_100 = arith.constant 0 : index
    %294 = vector.load %arg6[%c0_99, %c0_100] : memref<64x16xbf16, #tpu.memory_space<vmem>>, vector<64x16xbf16>
    %cst_101 = arith.constant dense<0.000000e+00> : vector<16x16xf32>
    %295 = tpu.matmul %293, %294, %cst_101 {dimension_numbers = #tpu.dot_dimension_numbers<[1], [0], [0], [1], [0, 0, 1, 1], [], []>} : vector<16x64xbf16>, vector<64x16xbf16>, vector<16x16xf32> -> vector<16x16xf32>
    %296 = arith.truncf %295 : vector<16x16xf32> to vector<16x16xbf16>
    %c0_102 = arith.constant 0 : index
    %c0_103 = arith.constant 0 : index
    %c0_104 = arith.constant 0 : index
    %297 = vector.load %arg8[%c0_102, %c0_103, %c0_104] : memref<1x16x16xbf16, #tpu.memory_space<vmem>>, vector<1x16x16xbf16>
    %298 = vector.shape_cast %297 : vector<1x16x16xbf16> to vector<16x16xbf16>
    %299 = vector.shape_cast %296 : vector<16x16xbf16> to vector<1x16x16xbf16>
    tpu.vector_store %arg8[%c0_102, %c0_103, %c0_104], %299 {strides = array<i32>} : memref<1x16x16xbf16, #tpu.memory_space<vmem>>, vector<1x16x16xbf16>,
    return
  }
  func.func @transform_0(%arg0: i32) -> (i32, i32, i32) {
    %c0_i32 = arith.constant 0 : i32
    %c0_i32_0 = arith.constant 0 : i32
    %c0_i32_1 = arith.constant 0 : i32
    return %arg0, %c0_i32, %c0_i32_0 : i32, i32, i32
  }
  func.func @transform_1(%arg0: i32) -> (i32, i32) {
    %c0_i32 = arith.constant 0 : i32
    %c0_i32_0 = arith.constant 0 : i32
    %c0_i32_1 = arith.constant 0 : i32
    return %c0_i32, %c0_i32_0 : i32, i32
  }
  func.func @transform_2(%arg0: i32) -> (i32, i32, i32) {
    %c0_i32 = arith.constant 0 : i32
    %c0_i32_0 = arith.constant 0 : i32
    %c0_i32_1 = arith.constant 0 : i32
    %c0_i32_2 = arith.constant 0 : i32
    return %c0_i32, %c0_i32_0, %c0_i32_1 : i32, i32, i32
  }
  func.func @transform_3(%arg0: i32) -> (i32, i32, i32) {
    %c0_i32 = arith.constant 0 : i32
    %c0_i32_0 = arith.constant 0 : i32
    %c0_i32_1 = arith.constant 0 : i32
    %c0_i32_2 = arith.constant 0 : i32
    return %c0_i32, %c0_i32_0, %c0_i32_1 : i32, i32, i32
  }
  func.func @transform_4(%arg0: i32) -> (i32, i32) {
    %c0_i32 = arith.constant 0 : i32
    %c0_i32_0 = arith.constant 0 : i32
    %c0_i32_1 = arith.constant 0 : i32
    return %c0_i32, %c0_i32_0 : i32, i32
  }
  func.func @transform_5(%arg0: i32) -> (i32, i32) {
    %c0_i32 = arith.constant 0 : i32
    %c0_i32_0 = arith.constant 0 : i32
    %c0_i32_1 = arith.constant 0 : i32
    return %c0_i32, %c0_i32_0 : i32, i32
  }
  func.func @transform_6(%arg0: i32) -> (i32, i32, i32) {
    %c0_i32 = arith.constant 0 : i32
    %c0_i32_0 = arith.constant 0 : i32
    %c0_i32_1 = arith.constant 0 : i32
    return %arg0, %c0_i32, %c0_i32_0 : i32, i32, i32
  }
  func.func @transform_7(%arg0: i32) -> (i32, i32, i32) {
    %c0_i32 = arith.constant 0 : i32
    %c0_i32_0 = arith.constant 0 : i32
    %c0_i32_1 = arith.constant 0 : i32
    return %arg0, %c0_i32, %c0_i32_0 : i32, i32, i32
  }
}

</mosaic_0001>

<bundles_post_ra>
// kernel: encoder_forward.2
= control target key start
LH: loop header
LB: loop body
LE: loop exit
PB: predicated region body
PF: predicated region fallthrough
CT: control target
= control target key end

     0   :  { %s1968_s24 = smov 0   ;;  %s2569_s0 = inlined_call_operand.vmem [shape: bf16[2,4,256], index: 0, kind: input, shape index: {}]   ;;  %s2570_s1 = inlined_call_operand.vmem [shape: bf16[8,36], index: 1, kind: input, shape index: {}]   ;;  %s2571_s2 = inlined_call_operand.vmem [shape: bf16[5,8,72], index: 2, kind: input, shape index: {}]   ;;  %s2572_s3 = inlined_call_operand.vmem [shape: f32[6,8,1], index: 3, kind: input, shape index: {}]   ;;  %s2573_s4 = inlined_call_operand.vmem [shape: bf16[2,256], index: 4, kind: input, shape index: {}]   ;;  %s2574_s5 = inlined_call_operand.vmem [shape: bf16[256,64], index: 5, kind: input, shape index: {}]   ;;  %s2575_s6 = inlined_call_operand.vmem [shape: f32[2,8,256], index: 6, kind: output, shape index: {0}]   ;;  %s2576_s7 = inlined_call_operand.vmem [shape: bf16[2,8,64], index: 7, kind: output, shape index: {1}]  }
   0x1 LB: > { %s1797_s25 = sadd.s32 4294967295, %s1920_s24   ;;  %p1801_p0 = scmp.ge.s32.totalorder %s1920_s24, 1  ;;  %s1920_s24 = sphi %s1968_s24, %s18_s24  }
   0x2   : > { %p240_p1 = scmp.lt.s32.totalorder %s1920_s24, 3 }
   0x4   : > { %p241_p2 = pnand %p1801_p0, %p240_p1 }
   0x5   : > { %p276_p3 = scmp.lt.s32.totalorder (!%p241_p2), %s1797_s25, 1  ;;  %s1922_s30 = smov (!%p241_p2), 16   ;;  %vm308_vm0 = vcmask (!%p241_p2), 130048   ;;  %vm418_vm1 = vcmask (!%p241_p2), 916480   ;;  %v1926_v10 = vmov (!%p241_p2), 0   ;;  %v294_v11 = vld [vmem:[%s2572_s3] sm:$0xff] (!%p241_p2)  ;;  %v338_v14 = vlaneseq (!%p241_p2) }
   0x6   : > { %244 = sbr.rel (%p241_p2) target bundleno = 3333 (0xd05), region = 44  ;;  %s1923_s8 = smov (!%p241_p2), 112   ;;  %548 = vmatprep.mubr.bf16.mxu1 (!%p241_p2), %v1926_v10  ;;  %1886 = vset.pattern.permute.xlu0 (!%p241_p2), %v1926_v10  ;;  %v1927_v12 = vmov (!%p241_p2), 1966171168   ;;  %vm319_vm2 = vcmask (!%p241_p2), 7168   ;;  %vm369_vm3 = vcmask (!%p241_p2), 1039360  }
   0x7   : > { %s1924_s9 = smov (!%p241_p2), 1   ;;  %s1925_s10 = smov (!%p241_p2), 127   ;;  %930 = vmatprep.mubr.bf16.mxu0 (!%p241_p2), %v1926_v10  ;;  %1887 = vset.pattern.permute.xlu1 (!%p241_p2), %v1926_v10  ;;  %v336_v13 = vunpack.c.l.s4 (!%p241_p2), %v1927_v12  ;;  %v339_v16 = vshrl.u32 (!%p241_p2), %v338_v14, 7  ;;  %vm466_vm4 = vcmask (!%p241_p2), 1041408   ;;  %vm473_vm5 = vcmask (!%p241_p2), 1043456  }
   0x8   : > { %v1808_v17 = vld.sshfl [vmem:[%s2573_s4] sm:$0x11 pattern:$0x75316420] (!%p241_p2)  ;;  %vm478_vm6 = vcmask (!%p241_p2), 1045504   ;;  %vm506_vm7 = vcmask (!%p241_p2), 293888  }
   0x9   : > { %v337_v15 = vunpack.c.0.s8 (!%p241_p2), %v336_v13  ;;  %v334_v19 = vcombine.high (!%p241_p2), %v1808_v17, %v1808_v17  ;;  %v354_v29 = vsub.s32 (!%p241_p2), 0, %v339_v16  ;;  %vm697_vm8 = vcmask (!%p241_p2), 588800  }
   0xa   : > { %vm1709_vm9 = vcmask (!%p241_p2), 519168  }
   0xb   : > { %v340_v20 = vsub.s32 (!%p241_p2), %v337_v15, %v339_v16 }
   0xd   : > { %s2578_s25 = smov (!%p276_p3, %s1797_s25), 1  ;;  %v341_v23 = vrot.slane %v1808_v17, %v340_v20  ;;  %v348_v24 = vrot.slane %v334_v19, %v340_v20 }
   0xe   : > { %s1848_s26 = sshll.u32 %s2578_s25, 2  ;;  %s1849_s19 = sshll.u32 %s2578_s25, 4 }
   0xf   : > { %s280_s29 = scalar_lea.vmem %s2569_s0, %s1848_s26  ;;  %v376_v25 = vshrl.u32 %v341_v23, 16  ;;  %v383_v26 = vshrl.u32 %v348_v24, 16  ;;  %v350_v28 = vpack.i.b16 %v341_v23, %v341_v23  ;;  %v357_v30 = vpack.i.b16 %v348_v24, %v348_v24  ;;  %s285_s22 = scalar_lea.vmem %s2575_s6, %s1849_s19 }
  0x10   : > { %v1984_v0 = vld.sshfl [vmem:[%s280_s29] sm:$0x33 pattern:$0x76325410]  ;;  %s289_s19 = scalar_lea.vmem %s2576_s7, %s1848_s26 }
  0x11   : > { %304 = vrot.lane.b32.xlu0 %v1984_v0, %s1922_s30  ;;  %414 = vrot.lane.b32.xlu1 %v1984_v0, %s1923_s8  ;;  %v1992_v1 = vcombine.high %v1984_v0, %v1984_v0  ;;  %v377_v32 = vpack.i.b16 %v376_v25, %v376_v25  ;;  %v384_v33 = vpack.i.b16 %v383_v26, %v383_v26 }
  0x12   : > { %v2044_v34 = vrot.slane %v350_v28, %v354_v29  ;;  %v2046_v35 = vrot.slane %v357_v30, %v354_v29 }
  0x13   : > { %v2050_v38 = vrot.slane %v377_v32, %v354_v29  ;;  %v2052_v39 = vrot.slane %v384_v33, %v354_v29 }
  0x15   : > { %306 = vrot.lane.b32.xlu0 %v1992_v1, %s1922_s30  ;;  %416 = vrot.lane.b32.xlu1 %v1992_v1, %s1923_s8 }
  0x19   : > { %394 = vrot.lane.b32.xlu1 %v1992_v1, %s1924_s9  ;;  %392 = vrot.lane.b32.xlu0 %v1984_v0, %s1924_s9 }
  0x1d   : > { %403 = vrot.lane.b32.xlu1 %v1984_v0, %s1925_s10  ;;  %405 = vrot.lane.b32.xlu0 %v1992_v1, %s1925_s10 }
  0x83   : > { %v305_v2 = vpop.permute.xlu0 %304  ;;  %v415_v3 = vpop.permute.xlu1 %414 }
  0x84   : > { %v2007_v4 = vsel %vm308_vm0, 0, %v305_v2 }
  0x85   : > { %315 = vrot.lane.b32.xlu1 %v2007_v4, %s1924_s9  ;;  %v446_v56 = vrot.slane %v2007_v4, 6 }
  0x87   : > { %v307_v5 = vpop.permute.xlu0 %306  ;;  %v417_v6 = vpop.permute.xlu1 %416 }
  0x88   : > { %v2012_v7 = vsel %vm308_vm0, %v305_v2, %v307_v5  ;;  %v2019_v8 = vsel %vm418_vm1, %v417_v6, 0  ;;  %v2026_v9 = vsel %vm418_vm1, %v415_v3, %v417_v6 }
  0x89   : > { %365 = vrot.lane.b32.xlu1 %v2007_v4, %s1925_s10  ;;  %367 = vrot.lane.b32.xlu0 %v2012_v7, %s1925_s10  ;;  %v447_v59 = vrot.slane %v2012_v7, 6  ;;  %v465_v19 = vrot.slane %v2019_v8, 2  ;;  %v464_v20 = vrot.slane %v2026_v9, 2 }
  0x8b   : > { %v395_v18 = vpop.permute.xlu1 %394  ;;  %v393_v21 = vpop.permute.xlu0 %392 }
  0x8c   : > { %v396_v36 = vsel %vm319_vm2, %v393_v21, %v395_v18  ;;  %v399_v42 = vsel %vm319_vm2, 0, %v393_v21 }
  0x8d   : > { %426 = vrot.lane.b32.xlu1 %v2019_v8, %s1924_s9  ;;  %317 = vrot.lane.b32.xlu0 %v2012_v7, %s1924_s9  ;;  %v402_v48 = vmul.bf16 %v396_v36, %v2046_v35  ;;  %v401_v51 = vmul.bf16 %v399_v42, %v2044_v34 }
  0x8f   : > { %v404_v22 = vpop.permute.xlu1 %403  ;;  %v406_v27 = vpop.permute.xlu0 %405  ;;  %v455_v62 = vrot.slane %v402_v48, 2  ;;  %v454_v6 = vrot.slane %v401_v51, 2 }
  0x90   : > { %v407_v43 = vsel %vm369_vm3, %v404_v22, %v406_v27  ;;  %v410_v46 = vsel %vm369_vm3, %v406_v27, 0 }
  0x91   : > { %437 = vrot.lane.b32.xlu1 %v2019_v8, %s1925_s10  ;;  %424 = vrot.lane.b32.xlu0 %v2026_v9, %s1924_s9  ;;  %v412_v52 = vmul.bf16 %v407_v43, %v2050_v38  ;;  %v413_v57 = vmul.bf16 %v410_v46, %v2052_v39 }
  0x93   : > { %v458_v2 = vrot.slane %v412_v52, 6 }
  0x95   : > { %435 = vrot.lane.b32.xlu0 %v2026_v9, %s1925_s10  ;;  %v487_v27 = vsel %vm466_vm4, %v1984_v0, %v458_v2  ;;  %v293_v0 = vld [vmem:[%s2570_s1] sm:$0xf] }
  0x99   : > { %503 = vperm.xlu0 %1886, %v294_v11   ;;  %v459_v11 = vrot.slane %v413_v57, 6 }
  0x9b   : > { %v490_v26 = vsel %vm466_vm4, %v1992_v1, %v459_v11 }
  0xf7   : > { %v316_v31 = vpop.permute.xlu1 %315 }
  0xf8   : > { %v324_v37 = vsel %vm319_vm2, 0, %v316_v31 }
  0xf9   : > { %v363_v49 = vmul.bf16 %v2044_v34, %v324_v37 }
  0xfb   : > { %v366_v40 = vpop.permute.xlu1 %365  ;;  %v368_v41 = vpop.permute.xlu0 %367  ;;  %v469_v63 = vsel %vm466_vm4, %v363_v49, %v446_v56 }
  0xfc   : > { %v370_v44 = vsel %vm369_vm3, %v366_v40, %v368_v41  ;;  %v374_v45 = vsel %vm369_vm3, %v368_v41, 0 }
  0xfd   : > { %v390_v47 = vmul.bf16 %v2050_v38, %v370_v44  ;;  %v391_v50 = vmul.bf16 %v2052_v39, %v374_v45 }
  0xff   : > { %v450_v53 = vrot.slane %v390_v47, 4  ;;  %v427_v54 = vpop.permute.xlu1 %426  ;;  %v318_v55 = vpop.permute.xlu0 %317  ;;  %v451_v61 = vrot.slane %v391_v50, 4 }
 0x100   : > { %v320_v58 = vsel %vm319_vm2, %v316_v31, %v318_v55  ;;  %v1811_v55 = vld [vmem:[%s2572_s3 + $0x8] sm:$0xff] }
 0x101   : > { %v364_v60 = vmul.bf16 %v2046_v35, %v320_v58  ;;  %v475_v4 = vsel %vm473_vm5, %v469_v63, %v450_v53 }
 0x102   : > { %v480_v18 = vsel %vm478_vm6, %v475_v4, %v454_v6 }
 0x103   : > { %v425_v3 = vpop.permute.xlu0 %424  ;;  %v472_v5 = vsel %vm466_vm4, %v364_v60, %v447_v59  ;;  %v438_v14 = vpop.permute.xlu1 %437 }
 0x104   : > { %v428_v12 = vsel %vm319_vm2, %v425_v3, %v427_v54  ;;  %v431_v13 = vsel %vm319_vm2, 0, %v425_v3  ;;  %v477_v7 = vsel %vm473_vm5, %v472_v5, %v451_v61  ;;  %v442_v24 = vsel %vm369_vm3, %v438_v14, 0 }
 0x105   : > { %v433_v15 = vmul.bf16 %v431_v13, %v2044_v34  ;;  %v434_v16 = vmul.bf16 %v428_v12, %v2046_v35  ;;  %v483_v17 = vsel %vm478_vm6, %v477_v7, %v455_v62  ;;  %v445_v30 = vmul.bf16 %v442_v24, %v2052_v39 }
 0x106   : > { %516 = vmatprep.subr.bf16.mxu1 %v483_v17 }
 0x107   : > { %v462_v21 = vrot.slane %v433_v15, 4  ;;  %v463_v22 = vrot.slane %v434_v16, 4  ;;  %517 = vmatpush1.bf16.msra.mxu1 %v480_v18  ;;  %v436_v23 = vpop.permute.xlu0 %435 }
 0x108   : > { %v439_v25 = vsel %vm369_vm3, %v436_v23, %v438_v14 }
 0x109   : > { %v494_v28 = vsel %vm473_vm5, %v490_v26, %v463_v22  ;;  %v492_v8 = vsel %vm473_vm5, %v487_v27, %v462_v21  ;;  %v444_v31 = vmul.bf16 %v439_v25, %v2050_v38 }
 0x10a   : > { %v499_v9 = vsel %vm478_vm6, %v494_v28, %v465_v19  ;;  %v496_v29 = vsel %vm478_vm6, %v492_v8, %v464_v20 }
 0x10b   : > { %518 = vmatprep.subr.bf16.mxu1 %v499_v9  ;;  %v511_v1 = vsel %vm466_vm4, %v444_v31, 0 }
 0x10c   : > { %519 = vmatpush1.bf16.msra.mxu1 %v496_v29 }
 0x10d   : > { %1809 = vmatprep.subr.msk.bf16.mxu1 %vm466_vm4, %v445_v30 }
 0x110   : > { %521 = vmatpush1.bf16.msra.mxu1 %v511_v1 }
 0x113   : > { %1810 = vmatmul.mubr.msk.bf16.vlgmr.msra.gmra.mrb[0].mxu1 %vm506_vm7, %v293_v0 }
 0x114   : > { %739 = vmatprep.mubr.bf16.mxu1 %v1926_v10 }
 0x118   : > { %v504_v32 = vpop.permute.xlu0 %503 }
 0x1e6   : > { %v550_v33 = vpop.f32.mrb[0].mxu1 }
 0x1e7   : > { %v551_v36 = vadd.f32 %v550_v33, %v504_v32  ;;  %v552_v37 = vpop.f32.mrb[1].mxu1 }
 0x1e8   : > { %v553_v40 = vadd.f32 %v552_v37, %v504_v32  ;;  %v554_v41 = vpop.f32.mrb[2].mxu1 }
 0x1e9   : > { %v557_v42 = vmax.f32 %v551_v36, 0.0  ;;  %v555_v43 = vpop.f32.mrb[3].mxu1 }
 0x1ea   : > { %v558_v45 = vmax.f32 %v553_v40, 0.0 }
 0x1eb   : > { %v2100_v44 = vpack.c.bf16 %v557_v42, %v557_v42 }
 0x1ec   : > { %v2106_v46 = vpack.c.bf16 %v558_v45, %v558_v45 }
 0x1ed   : > { %618 = vrot.lane.b32.xlu0 %v2100_v44, %s1923_s8  ;;  %566 = vrot.lane.b32.xlu1 %v2100_v44, %s1922_s30 }
 0x1f1   : > { %596 = vrot.lane.b32.xlu0 %v2100_v44, %s1924_s9  ;;  %568 = vrot.lane.b32.xlu1 %v2106_v46, %s1922_s30 }
 0x1f5   : > { %620 = vrot.lane.b32.xlu1 %v2106_v46, %s1923_s8 }
 0x1f9   : > { %598 = vrot.lane.b32.xlu1 %v2106_v46, %s1924_s9 }
 0x25f   : > { %v567_v47 = vpop.permute.xlu1 %566  ;;  %v619_v52 = vpop.permute.xlu0 %618 }
 0x260   : > { %v572_v48 = vsel %vm308_vm0, 0, %v567_v47 }
 0x261   : > { %574 = vrot.lane.b32.xlu0 %v572_v48, %s1924_s9  ;;  %v648_v7 = vrot.slane %v572_v48, 4 }
 0x263   : > { %v569_v49 = vpop.permute.xlu1 %568  ;;  %v597_v56 = vpop.permute.xlu0 %596 }
 0x264   : > { %v570_v50 = vsel %vm308_vm0, %v567_v47, %v569_v49  ;;  %v603_v61 = vsel %vm319_vm2, 0, %v597_v56 }
 0x265   : > { %587 = vrot.lane.b32.xlu0 %v570_v50, %s1925_s10  ;;  %576 = vrot.lane.b32.xlu1 %v570_v50, %s1924_s9  ;;  %v605_v4 = vmul.bf16 %v603_v61, %v2044_v34  ;;  %v649_v11 = vrot.slane %v570_v50, 4  ;;  %v561_v50 = vld [vmem:[%s2571_s2] sm:$0xf] }
 0x267   : > { %v621_v51 = vpop.permute.xlu1 %620  ;;  %v652_v21 = vrot.slane %v605_v4, 4 }
 0x268   : > { %v2125_v53 = vsel %vm418_vm1, %v619_v52, %v621_v51  ;;  %v624_v54 = vsel %vm418_vm1, %v621_v51, 0 }
 0x269   : > { %609 = vrot.lane.b32.xlu0 %v2106_v46, %s1925_s10  ;;  %585 = vrot.lane.b32.xlu1 %v572_v48, %s1925_s10  ;;  %v659_v32 = vrot.slane %v624_v54, 4  ;;  %v658_v40 = vrot.slane %v2125_v53, 4 }
 0x26b   : > { %v599_v57 = vpop.permute.xlu1 %598 }
 0x26c   : > { %v600_v59 = vsel %vm319_vm2, %v597_v56, %v599_v57 }
 0x26d   : > { %607 = vrot.lane.b32.xlu1 %v2100_v44, %s1925_s10  ;;  %626 = vrot.lane.b32.xlu0 %v2125_v53, %s1924_s9  ;;  %v606_v62 = vmul.bf16 %v600_v59, %v2046_v35 }
 0x26f   : > { %v653_v14 = vrot.slane %v606_v62, 4 }
 0x271   : > { %628 = vrot.lane.b32.xlu1 %v624_v54, %s1924_s9  ;;  %637 = vrot.lane.b32.xlu0 %v2125_v53, %s1925_s10 }
 0x275   : > { %639 = vrot.lane.b32.xlu1 %v624_v54, %s1925_s10  ;;  %694 = vperm.xlu0 %1886, %v1811_v55  }
 0x2d3   : > { %v575_v58 = vpop.permute.xlu0 %574 }
 0x2d4   : > { %v581_v60 = vsel %vm319_vm2, 0, %v575_v58 }
 0x2d5   : > { %v583_v3 = vmul.bf16 %v581_v60, %v2044_v34 }
 0x2d7   : > { %v588_v63 = vpop.permute.xlu0 %587  ;;  %v577_v2 = vpop.permute.xlu1 %576  ;;  %v662_v20 = vsel %vm473_vm5, %v583_v3, %v648_v7 }
 0x2d8   : > { %v592_v5 = vsel %vm369_vm3, %v588_v63, 0  ;;  %v578_v6 = vsel %vm319_vm2, %v575_v58, %v577_v2 }
 0x2d9   : > { %v595_v12 = vmul.bf16 %v592_v5, %v2052_v39  ;;  %v584_v13 = vmul.bf16 %v578_v6, %v2046_v35 }
 0x2db   : > { %v610_v15 = vpop.permute.xlu0 %609  ;;  %v586_v16 = vpop.permute.xlu1 %585  ;;  %v666_v17 = vsel %vm473_vm5, %v584_v13, %v649_v11  ;;  %v674_v24 = vsel %vm473_vm5, %v595_v12, %v653_v14  ;;  %v1815_v12 = vld [vmem:[%s2572_s3 + $0x10] sm:$0xff] }
 0x2dc   : > { %v614_v18 = vsel %vm369_vm3, %v610_v15, 0  ;;  %v589_v19 = vsel %vm369_vm3, %v586_v16, %v588_v63  ;;  %707 = vmatprep.subr.bf16.mxu1 %v666_v17 }
 0x2dd   : > { %v617_v22 = vmul.bf16 %v614_v18, %v2052_v39  ;;  %v594_v23 = vmul.bf16 %v589_v19, %v2050_v38  ;;  %708 = vmatpush1.bf16.msra.mxu1 %v662_v20 }
 0x2de   : > { %709 = vmatprep.subr.bf16.mxu1 %v674_v24 }
 0x2df   : > { %v657_v25 = vrot.slane %v617_v22, 4  ;;  %v627_v26 = vpop.permute.xlu0 %626  ;;  %v608_v27 = vpop.permute.xlu1 %607  ;;  %v670_v28 = vsel %vm473_vm5, %v594_v23, %v652_v21 }
 0x2e0   : > { %v611_v8 = vsel %vm369_vm3, %v608_v27, %v610_v15  ;;  %v633_v30 = vsel %vm319_vm2, 0, %v627_v26 }
 0x2e1   : > { %v616_v9 = vmul.bf16 %v611_v8, %v2050_v38  ;;  %710 = vmatpush1.bf16.msra.mxu1 %v670_v28  ;;  %v682_v29 = vsel %vm473_vm5, %v2106_v46, %v657_v25  ;;  %v635_v33 = vmul.bf16 %v633_v30, %v2044_v34 }
 0x2e2   : > { %711 = vmatprep.subr.bf16.mxu1 %v682_v29 }
 0x2e3   : > { %v656_v31 = vrot.slane %v616_v9, 4  ;;  %v629_v1 = vpop.permute.xlu1 %628  ;;  %v638_v41 = vpop.permute.xlu0 %637  ;;  %v686_v49 = vsel %vm473_vm5, %v635_v33, %v658_v40 }
 0x2e4   : > { %v630_v0 = vsel %vm319_vm2, %v627_v26, %v629_v1 }
 0x2e5   : > { %v636_v36 = vmul.bf16 %v630_v0, %v2046_v35  ;;  %v678_v37 = vsel %vm473_vm5, %v2100_v44, %v656_v31 }
 0x2e6   : > { %712 = vmatpush1.bf16.msra.mxu1 %v678_v37 }
 0x2e7   : > { %v640_v42 = vpop.permute.xlu1 %639  ;;  %v690_v43 = vsel %vm473_vm5, %v636_v36, %v659_v32 }
 0x2e8   : > { %v641_v45 = vsel %vm369_vm3, %v638_v41, %v640_v42  ;;  %v644_v46 = vsel %vm369_vm3, %v640_v42, 0  ;;  %713 = vmatprep.subr.bf16.mxu1 %v690_v43 }
 0x2e9   : > { %v646_v47 = vmul.bf16 %v641_v45, %v2050_v38  ;;  %v647_v48 = vmul.bf16 %v644_v46, %v2052_v39 }
 0x2ea   : > { %714 = vmatpush1.bf16.msra.mxu1 %v686_v49 }
 0x2eb   : > { %1812 = vmatprep.subr.msk.bf16.mxu1 %vm473_vm5, %v647_v48  ;;  %v702_v44 = vsel %vm473_vm5, %v646_v47, 0 }
 0x2ee   : > { %716 = vmatpush1.bf16.msra.mxu1 %v702_v44 }
 0x2f1   : > { %1813 = vmatmul.mubr.msk.bf16.vlgmr.msra.gmra.mrb[4].mxu1 %vm697_vm8, %v561_v50 }
 0x2f2   : > { %1121 = vmatprep.mubr.bf16.mxu1 %v1926_v10 }
 0x2f4   : > { %v695_v51 = vpop.permute.xlu0 %694 }
 0x3c4   : > { %v741_v52 = vpop.f32.mrb[4].mxu1 }
 0x3c5   : > { %v742_v53 = vadd.f32 %v741_v52, %v695_v51  ;;  %v743_v54 = vpop.f32.mrb[5].mxu1 }
 0x3c6   : > { %v744_v55 = vadd.f32 %v743_v54, %v695_v51  ;;  %v745_v56 = vpop.f32.mrb[6].mxu1 }
 0x3c7   : > { %v748_v57 = vmax.f32 %v742_v53, 0.0  ;;  %v746_v58 = vpop.f32.mrb[7].mxu1 }
 0x3c8   : > { %v749_v59 = vmax.f32 %v744_v55, 0.0 }
 0x3c9   : > { %v2181_v60 = vpack.c.bf16 %v748_v57, %v748_v57 }
 0x3ca   : > { %v2183_v61 = vpack.c.bf16 %v749_v59, %v749_v59 }
 0x3cb   : > { %758 = vrot.lane.b32.xlu1 %v2181_v60, %s1922_s30 }
 0x3cc   : > { %760 = vrot.lane.b32.xlu0 %v2183_v61, %s1922_s30 }
 0x3cf   : > { %810 = vrot.lane.b32.xlu1 %v2181_v60, %s1923_s8 }
 0x3d0   : > { %812 = vrot.lane.b32.xlu0 %v2183_v61, %s1923_s8 }
 0x3d3   : > { %788 = vrot.lane.b32.xlu1 %v2181_v60, %s1924_s9 }
 0x3d4   : > { %790 = vrot.lane.b32.xlu0 %v2183_v61, %s1924_s9 }
 0x43d   : > { %v759_v62 = vpop.permute.xlu1 %758 }
 0x43e   : > { %v761_v63 = vpop.permute.xlu0 %760  ;;  %v764_v2 = vsel %vm308_vm0, 0, %v759_v62 }
 0x43f   : > { %766 = vrot.lane.b32.xlu1 %v764_v2, %s1924_s9  ;;  %v762_v3 = vsel %vm308_vm0, %v759_v62, %v761_v63  ;;  %v840_v25 = vrot.slane %v764_v2, 4 }
 0x440   : > { %768 = vrot.lane.b32.xlu0 %v762_v3, %s1924_s9  ;;  %v841_v22 = vrot.slane %v762_v3, 4 }
 0x441   : > { %v811_v5 = vpop.permute.xlu1 %810 }
 0x442   : > { %v813_v6 = vpop.permute.xlu0 %812 }
 0x443   : > { %779 = vrot.lane.b32.xlu1 %v762_v3, %s1925_s10  ;;  %v2208_v4 = vsel %vm418_vm1, %v811_v5, %v813_v6  ;;  %v816_v11 = vsel %vm418_vm1, %v813_v6, 0  ;;  %v1814_v3 = vld [vmem:[%s2571_s2 + $0x4] sm:$0xf] }
 0x444   : > { %777 = vrot.lane.b32.xlu0 %v764_v2, %s1925_s10  ;;  %v851_v51 = vrot.slane %v816_v11, 4  ;;  %v850_v56 = vrot.slane %v2208_v4, 4 }
 0x445   : > { %v789_v13 = vpop.permute.xlu1 %788 }
 0x446   : > { %v791_v7 = vpop.permute.xlu0 %790  ;;  %v795_v15 = vsel %vm319_vm2, 0, %v789_v13 }
 0x447   : > { %801 = vrot.lane.b32.xlu1 %v2183_v61, %s1925_s10  ;;  %v792_v14 = vsel %vm319_vm2, %v789_v13, %v791_v7  ;;  %v797_v23 = vmul.bf16 %v795_v15, %v2044_v34 }
 0x448   : > { %799 = vrot.lane.b32.xlu0 %v2181_v60, %s1925_s10  ;;  %v798_v19 = vmul.bf16 %v792_v14, %v2046_v35 }
 0x449   : > { %v844_v1 = vrot.slane %v797_v23, 4 }
 0x44a   : > { %v845_v9 = vrot.slane %v798_v19, 4 }
 0x44b   : > { %818 = vrot.lane.b32.xlu1 %v2208_v4, %s1924_s9 }
 0x44c   : > { %820 = vrot.lane.b32.xlu0 %v816_v11, %s1924_s9 }
 0x44f   : > { %829 = vrot.lane.b32.xlu1 %v2208_v4, %s1925_s10 }
 0x450   : > { %831 = vrot.lane.b32.xlu0 %v816_v11, %s1925_s10 }
 0x453   : > { %886 = vperm.xlu1 %1887, %v1815_v12  }
 0x4b1   : > { %v767_v16 = vpop.permute.xlu1 %766 }
 0x4b2   : > { %v773_v17 = vsel %vm319_vm2, 0, %v767_v16  ;;  %v769_v18 = vpop.permute.xlu0 %768 }
 0x4b3   : > { %v775_v20 = vmul.bf16 %v773_v17, %v2044_v34  ;;  %v770_v21 = vsel %vm319_vm2, %v767_v16, %v769_v18 }
 0x4b4   : > { %v776_v24 = vmul.bf16 %v770_v21, %v2046_v35 }
 0x4b5   : > { %v780_v26 = vpop.permute.xlu1 %779  ;;  %v854_v31 = vsel %vm473_vm5, %v775_v20, %v840_v25 }
 0x4b6   : > { %v784_v27 = vsel %vm369_vm3, %v780_v26, 0  ;;  %v778_v28 = vpop.permute.xlu0 %777  ;;  %v858_v8 = vsel %vm473_vm5, %v776_v24, %v841_v22 }
 0x4b7   : > { %v787_v29 = vmul.bf16 %v784_v27, %v2052_v39  ;;  %v781_v30 = vsel %vm369_vm3, %v778_v28, %v780_v26  ;;  %898 = vmatprep.subr.bf16.mxu0 %v858_v8  ;;  %v1819_v26 = vld [vmem:[%s2572_s3 + $0x18] sm:$0xff] }
 0x4b8   : > { %v786_v0 = vmul.bf16 %v781_v30, %v2050_v38  ;;  %899 = vmatpush1.bf16.msra.mxu0 %v854_v31 }
 0x4b9   : > { %v802_v32 = vpop.permute.xlu1 %801  ;;  %v866_v33 = vsel %vm473_vm5, %v787_v29, %v845_v9 }
 0x4ba   : > { %v806_v36 = vsel %vm369_vm3, %v802_v32, 0  ;;  %v800_v37 = vpop.permute.xlu0 %799  ;;  %900 = vmatprep.subr.bf16.mxu0 %v866_v33  ;;  %v862_v40 = vsel %vm473_vm5, %v786_v0, %v844_v1 }
 0x4bb   : > { %v809_v41 = vmul.bf16 %v806_v36, %v2052_v39  ;;  %v803_v42 = vsel %vm369_vm3, %v800_v37, %v802_v32 }
 0x4bc   : > { %v808_v43 = vmul.bf16 %v803_v42, %v2050_v38  ;;  %901 = vmatpush1.bf16.msra.mxu0 %v862_v40 }
 0x4bd   : > { %v849_v45 = vrot.slane %v809_v41, 4  ;;  %v819_v46 = vpop.permute.xlu1 %818 }
 0x4be   : > { %v848_v47 = vrot.slane %v808_v43, 4  ;;  %v825_v48 = vsel %vm319_vm2, 0, %v819_v46  ;;  %v821_v49 = vpop.permute.xlu0 %820 }
 0x4bf   : > { %v822_v44 = vsel %vm319_vm2, %v819_v46, %v821_v49  ;;  %v874_v50 = vsel %vm473_vm5, %v2183_v61, %v849_v45  ;;  %v827_v52 = vmul.bf16 %v825_v48, %v2044_v34 }
 0x4c0   : > { %v828_v53 = vmul.bf16 %v822_v44, %v2046_v35  ;;  %902 = vmatprep.subr.bf16.mxu0 %v874_v50  ;;  %v870_v54 = vsel %vm473_vm5, %v2181_v60, %v848_v47 }
 0x4c1   : > { %903 = vmatpush1.bf16.msra.mxu0 %v870_v54  ;;  %v830_v55 = vpop.permute.xlu1 %829  ;;  %v878_v2 = vsel %vm473_vm5, %v827_v52, %v850_v56 }
 0x4c2   : > { %v832_v57 = vpop.permute.xlu0 %831  ;;  %v882_v58 = vsel %vm473_vm5, %v828_v53, %v851_v51 }
 0x4c3   : > { %v833_v59 = vsel %vm369_vm3, %v830_v55, %v832_v57  ;;  %v836_v61 = vsel %vm369_vm3, %v832_v57, 0  ;;  %904 = vmatprep.subr.bf16.mxu0 %v882_v58 }
 0x4c4   : > { %v838_v62 = vmul.bf16 %v833_v59, %v2050_v38  ;;  %v839_v63 = vmul.bf16 %v836_v61, %v2052_v39 }
 0x4c5   : > { %905 = vmatpush1.bf16.msra.mxu0 %v878_v2 }
 0x4c6   : > { %1816 = vmatprep.subr.msk.bf16.mxu0 %vm473_vm5, %v839_v63  ;;  %v893_v60 = vsel %vm473_vm5, %v838_v62, 0 }
 0x4c9   : > { %907 = vmatpush1.bf16.msra.mxu0 %v893_v60 }
 0x4cc   : > { %1817 = vmatmul.mubr.msk.bf16.vlgmr.msra.gmra.mrb[0].mxu0 %vm697_vm8, %v1814_v3 }
 0x4cd   : > { %1312 = vmatprep.mubr.bf16.mxu0 %v1926_v10 }
 0x4d2   : > { %v887_v5 = vpop.permute.xlu1 %886 }
 0x59f   : > { %v932_v6 = vpop.f32.mrb[0].mxu0 }
 0x5a0   : > { %v933_v4 = vadd.f32 %v932_v6, %v887_v5  ;;  %v934_v11 = vpop.f32.mrb[1].mxu0 }
 0x5a1   : > { %v935_v12 = vadd.f32 %v934_v11, %v887_v5  ;;  %v936_v13 = vpop.f32.mrb[2].mxu0 }
 0x5a2   : > { %v939_v7 = vmax.f32 %v933_v4, 0.0  ;;  %v937_v14 = vpop.f32.mrb[3].mxu0 }
 0x5a3   : > { %v940_v15 = vmax.f32 %v935_v12, 0.0 }
 0x5a4   : > { %v2262_v16 = vpack.c.bf16 %v939_v7, %v939_v7 }
 0x5a5   : > { %v2264_v17 = vpack.c.bf16 %v940_v15, %v940_v15 }
 0x5a6   : > { %949 = vrot.lane.b32.xlu0 %v2262_v16, %s1922_s30 }
 0x5a7   : > { %951 = vrot.lane.b32.xlu1 %v2264_v17, %s1922_s30 }
 0x5aa   : > { %1001 = vrot.lane.b32.xlu0 %v2262_v16, %s1923_s8 }
 0x5ab   : > { %1003 = vrot.lane.b32.xlu1 %v2264_v17, %s1923_s8 }
 0x5ae   : > { %979 = vrot.lane.b32.xlu0 %v2262_v16, %s1924_s9 }
 0x5af   : > { %981 = vrot.lane.b32.xlu1 %v2264_v17, %s1924_s9 }
 0x618   : > { %v950_v18 = vpop.permute.xlu0 %949 }
 0x619   : > { %v952_v19 = vpop.permute.xlu1 %951  ;;  %v955_v20 = vsel %vm308_vm0, 0, %v950_v18 }
 0x61a   : > { %957 = vrot.lane.b32.xlu0 %v955_v20, %s1924_s9  ;;  %v953_v21 = vsel %vm308_vm0, %v950_v18, %v952_v19  ;;  %v1031_v40 = vrot.slane %v955_v20, 4 }
 0x61b   : > { %959 = vrot.lane.b32.xlu1 %v953_v21, %s1924_s9  ;;  %v1032_v33 = vrot.slane %v953_v21, 4 }
 0x61c   : > { %v1002_v22 = vpop.permute.xlu0 %1001 }
 0x61d   : > { %v1004_v23 = vpop.permute.xlu1 %1003 }
 0x61e   : > { %970 = vrot.lane.b32.xlu0 %v953_v21, %s1925_s10  ;;  %v2289_v24 = vsel %vm418_vm1, %v1002_v22, %v1004_v23  ;;  %v1007_v25 = vsel %vm418_vm1, %v1004_v23, 0  ;;  %v1818_v21 = vld [vmem:[%s2571_s2 + $0x8] sm:$0xf] }
 0x61f   : > { %968 = vrot.lane.b32.xlu1 %v955_v20, %s1925_s10  ;;  %v1042_v5 = vrot.slane %v1007_v25, 4  ;;  %v1041_v13 = vrot.slane %v2289_v24, 4 }
 0x620   : > { %v980_v27 = vpop.permute.xlu0 %979 }
 0x621   : > { %v982_v28 = vpop.permute.xlu1 %981  ;;  %v986_v9 = vsel %vm319_vm2, 0, %v980_v27 }
 0x622   : > { %992 = vrot.lane.b32.xlu0 %v2264_v17, %s1925_s10  ;;  %v983_v8 = vsel %vm319_vm2, %v980_v27, %v982_v28  ;;  %v988_v36 = vmul.bf16 %v986_v9, %v2044_v34 }
 0x623   : > { %990 = vrot.lane.b32.xlu1 %v2262_v16, %s1925_s10  ;;  %v989_v1 = vmul.bf16 %v983_v8, %v2046_v35 }
 0x624   : > { %v1035_v44 = vrot.slane %v988_v36, 4 }
 0x625   : > { %v1036_v46 = vrot.slane %v989_v1, 4 }
 0x626   : > { %1009 = vrot.lane.b32.xlu0 %v2289_v24, %s1924_s9 }
 0x627   : > { %1011 = vrot.lane.b32.xlu1 %v1007_v25, %s1924_s9 }
 0x62a   : > { %1020 = vrot.lane.b32.xlu0 %v2289_v24, %s1925_s10 }
 0x62b   : > { %1022 = vrot.lane.b32.xlu1 %v1007_v25, %s1925_s10 }
 0x62e   : > { %1077 = vperm.xlu0 %1886, %v1819_v26  }
 0x68c   : > { %v958_v29 = vpop.permute.xlu0 %957 }
 0x68d   : > { %v964_v30 = vsel %vm319_vm2, 0, %v958_v29  ;;  %v960_v31 = vpop.permute.xlu1 %959 }
 0x68e   : > { %v966_v0 = vmul.bf16 %v964_v30, %v2044_v34  ;;  %v961_v32 = vsel %vm319_vm2, %v958_v29, %v960_v31 }
 0x68f   : > { %v967_v37 = vmul.bf16 %v961_v32, %v2046_v35 }
 0x690   : > { %v971_v41 = vpop.permute.xlu0 %970  ;;  %v1045_v49 = vsel %vm473_vm5, %v966_v0, %v1031_v40  ;;  %v1823_v40 = vld [vmem:[%s2572_s3 + $0x20] sm:$0xff] }
 0x691   : > { %v975_v42 = vsel %vm369_vm3, %v971_v41, 0  ;;  %v969_v43 = vpop.permute.xlu1 %968  ;;  %v1049_v45 = vsel %vm473_vm5, %v967_v37, %v1032_v33 }
 0x692   : > { %v978_v47 = vmul.bf16 %v975_v42, %v2052_v39  ;;  %v972_v48 = vsel %vm369_vm3, %v969_v43, %v971_v41  ;;  %1089 = vmatprep.subr.bf16.mxu1 %v1049_v45 }
 0x693   : > { %v977_v50 = vmul.bf16 %v972_v48, %v2050_v38  ;;  %1090 = vmatpush1.bf16.msra.mxu1 %v1045_v49 }
 0x694   : > { %v993_v51 = vpop.permute.xlu0 %992  ;;  %v1057_v52 = vsel %vm473_vm5, %v978_v47, %v1036_v46 }
 0x695   : > { %v997_v53 = vsel %vm369_vm3, %v993_v51, 0  ;;  %v991_v54 = vpop.permute.xlu1 %990  ;;  %1091 = vmatprep.subr.bf16.mxu1 %v1057_v52  ;;  %v1053_v55 = vsel %vm473_vm5, %v977_v50, %v1035_v44 }
 0x696   : > { %v1000_v56 = vmul.bf16 %v997_v53, %v2052_v39  ;;  %v994_v57 = vsel %vm369_vm3, %v991_v54, %v993_v51 }
 0x697   : > { %v999_v58 = vmul.bf16 %v994_v57, %v2050_v38  ;;  %1092 = vmatpush1.bf16.msra.mxu1 %v1053_v55 }
 0x698   : > { %v1040_v59 = vrot.slane %v1000_v56, 4  ;;  %v1010_v61 = vpop.permute.xlu0 %1009 }
 0x699   : > { %v1039_v62 = vrot.slane %v999_v58, 4  ;;  %v1016_v63 = vsel %vm319_vm2, 0, %v1010_v61  ;;  %v1012_v2 = vpop.permute.xlu1 %1011 }
 0x69a   : > { %v1013_v60 = vsel %vm319_vm2, %v1010_v61, %v1012_v2  ;;  %v1065_v3 = vsel %vm473_vm5, %v2264_v17, %v1040_v59  ;;  %v1018_v6 = vmul.bf16 %v1016_v63, %v2044_v34 }
 0x69b   : > { %v1019_v4 = vmul.bf16 %v1013_v60, %v2046_v35  ;;  %1093 = vmatprep.subr.bf16.mxu1 %v1065_v3  ;;  %v1061_v11 = vsel %vm473_vm5, %v2262_v16, %v1039_v62 }
 0x69c   : > { %1094 = vmatpush1.bf16.msra.mxu1 %v1061_v11  ;;  %v1021_v12 = vpop.permute.xlu0 %1020  ;;  %v1069_v20 = vsel %vm473_vm5, %v1018_v6, %v1041_v13 }
 0x69d   : > { %v1023_v7 = vpop.permute.xlu1 %1022  ;;  %v1073_v14 = vsel %vm473_vm5, %v1019_v4, %v1042_v5 }
 0x69e   : > { %v1024_v15 = vsel %vm369_vm3, %v1021_v12, %v1023_v7  ;;  %v1027_v17 = vsel %vm369_vm3, %v1023_v7, 0  ;;  %1095 = vmatprep.subr.bf16.mxu1 %v1073_v14 }
 0x69f   : > { %v1029_v18 = vmul.bf16 %v1024_v15, %v2050_v38  ;;  %v1030_v19 = vmul.bf16 %v1027_v17, %v2052_v39 }
 0x6a0   : > { %1096 = vmatpush1.bf16.msra.mxu1 %v1069_v20 }
 0x6a1   : > { %1820 = vmatprep.subr.msk.bf16.mxu1 %vm473_vm5, %v1030_v19  ;;  %v1084_v16 = vsel %vm473_vm5, %v1029_v18, 0 }
 0x6a4   : > { %1098 = vmatpush1.bf16.msra.mxu1 %v1084_v16 }
 0x6a7   : > { %1821 = vmatmul.mubr.msk.bf16.vlgmr.msra.gmra.mrb[8].mxu1 %vm697_vm8, %v1818_v21 }
 0x6a8   : > { %1503 = vmatprep.mubr.bf16.mxu1 %v1926_v10 }
 0x6ad   : > { %v1078_v22 = vpop.permute.xlu0 %1077 }
 0x77a   : > { %v1123_v23 = vpop.f32.mrb[8].mxu1 }
 0x77b   : > { %v1124_v24 = vadd.f32 %v1123_v23, %v1078_v22  ;;  %v1125_v25 = vpop.f32.mrb[9].mxu1 }
 0x77c   : > { %v1126_v26 = vadd.f32 %v1125_v25, %v1078_v22  ;;  %v1127_v27 = vpop.f32.mrb[10].mxu1 }
 0x77d   : > { %v1130_v28 = vmax.f32 %v1124_v24, 0.0  ;;  %v1128_v8 = vpop.f32.mrb[11].mxu1 }
 0x77e   : > { %v1131_v9 = vmax.f32 %v1126_v26, 0.0 }
 0x77f   : > { %v2343_v29 = vpack.c.bf16 %v1130_v28, %v1130_v28 }
 0x780   : > { %v2345_v30 = vpack.c.bf16 %v1131_v9, %v1131_v9 }
 0x781   : > { %1140 = vrot.lane.b32.xlu1 %v2343_v29, %s1922_s30 }
 0x782   : > { %1142 = vrot.lane.b32.xlu0 %v2345_v30, %s1922_s30 }
 0x785   : > { %1192 = vrot.lane.b32.xlu1 %v2343_v29, %s1923_s8 }
 0x786   : > { %1194 = vrot.lane.b32.xlu0 %v2345_v30, %s1923_s8 }
 0x789   : > { %1170 = vrot.lane.b32.xlu1 %v2343_v29, %s1924_s9 }
 0x78a   : > { %1172 = vrot.lane.b32.xlu0 %v2345_v30, %s1924_s9 }
 0x7f3   : > { %v1141_v10 = vpop.permute.xlu1 %1140 }
 0x7f4   : > { %v1143_v31 = vpop.permute.xlu0 %1142  ;;  %v1146_v1 = vsel %vm308_vm0, 0, %v1141_v10 }
 0x7f5   : > { %1148 = vrot.lane.b32.xlu1 %v1146_v1, %s1924_s9  ;;  %v1144_v0 = vsel %vm308_vm0, %v1141_v10, %v1143_v31  ;;  %v1222_v54 = vrot.slane %v1146_v1, 4 }
 0x7f6   : > { %1150 = vrot.lane.b32.xlu0 %v1144_v0, %s1924_s9  ;;  %v1223_v51 = vrot.slane %v1144_v0, 4 }
 0x7f7   : > { %v1193_v32 = vpop.permute.xlu1 %1192 }
 0x7f8   : > { %v1195_v33 = vpop.permute.xlu0 %1194 }
 0x7f9   : > { %1161 = vrot.lane.b32.xlu1 %v1144_v0, %s1925_s10  ;;  %v2370_v36 = vsel %vm418_vm1, %v1193_v32, %v1195_v33  ;;  %v1198_v37 = vsel %vm418_vm1, %v1195_v33, 0 }
 0x7fa   : > { %1159 = vrot.lane.b32.xlu0 %v1146_v1, %s1925_s10  ;;  %v1233_v21 = vrot.slane %v1198_v37, 4  ;;  %v1232_v26 = vrot.slane %v2370_v36, 4  ;;  %v1822_v1 = vld [vmem:[%s2571_s2 + $0xc] sm:$0xf] }
 0x7fb   : > { %v1171_v41 = vpop.permute.xlu1 %1170 }
 0x7fc   : > { %v1173_v42 = vpop.permute.xlu0 %1172  ;;  %v1177_v45 = vsel %vm319_vm2, 0, %v1171_v41 }
 0x7fd   : > { %1183 = vrot.lane.b32.xlu1 %v2345_v30, %s1925_s10  ;;  %v1174_v43 = vsel %vm319_vm2, %v1171_v41, %v1173_v42  ;;  %v1179_v52 = vmul.bf16 %v1177_v45, %v2044_v34 }
 0x7fe   : > { %1181 = vrot.lane.b32.xlu0 %v2343_v29, %s1925_s10  ;;  %v1180_v49 = vmul.bf16 %v1174_v43, %v2046_v35 }
 0x7ff   : > { %v1226_v2 = vrot.slane %v1179_v52, 4 }
 0x800   : > { %v1227_v59 = vrot.slane %v1180_v49, 4 }
 0x801   : > { %1200 = vrot.lane.b32.xlu1 %v2370_v36, %s1924_s9 }
 0x802   : > { %1202 = vrot.lane.b32.xlu0 %v1198_v37, %s1924_s9 }
 0x805   : > { %1211 = vrot.lane.b32.xlu1 %v2370_v36, %s1925_s10 }
 0x806   : > { %1213 = vrot.lane.b32.xlu0 %v1198_v37, %s1925_s10 }
 0x809   : > { %1268 = vperm.xlu1 %1887, %v1823_v40  }
 0x867   : > { %v1149_v46 = vpop.permute.xlu1 %1148 }
 0x868   : > { %v1155_v47 = vsel %vm319_vm2, 0, %v1149_v46  ;;  %v1151_v48 = vpop.permute.xlu0 %1150 }
 0x869   : > { %v1157_v44 = vmul.bf16 %v1155_v47, %v2044_v34  ;;  %v1152_v50 = vsel %vm319_vm2, %v1149_v46, %v1151_v48 }
 0x86a   : > { %v1158_v53 = vmul.bf16 %v1152_v50, %v2046_v35 }
 0x86b   : > { %v1162_v55 = vpop.permute.xlu1 %1161  ;;  %v1236_v63 = vsel %vm473_vm5, %v1157_v44, %v1222_v54  ;;  %v1827_v54 = vld [vmem:[%s2572_s3 + $0x28] sm:$0xff] }
 0x86c   : > { %v1166_v56 = vsel %vm369_vm3, %v1162_v55, 0  ;;  %v1160_v57 = vpop.permute.xlu0 %1159  ;;  %v1240_v58 = vsel %vm473_vm5, %v1158_v53, %v1223_v51 }
 0x86d   : > { %v1169_v61 = vmul.bf16 %v1166_v56, %v2052_v39  ;;  %v1163_v62 = vsel %vm369_vm3, %v1160_v57, %v1162_v55  ;;  %1280 = vmatprep.subr.bf16.mxu0 %v1240_v58 }
 0x86e   : > { %v1168_v60 = vmul.bf16 %v1163_v62, %v2050_v38  ;;  %1281 = vmatpush1.bf16.msra.mxu0 %v1236_v63 }
 0x86f   : > { %v1184_v3 = vpop.permute.xlu1 %1183  ;;  %v1248_v5 = vsel %vm473_vm5, %v1169_v61, %v1227_v59 }
 0x870   : > { %v1188_v6 = vsel %vm369_vm3, %v1184_v3, 0  ;;  %v1182_v4 = vpop.permute.xlu0 %1181  ;;  %1282 = vmatprep.subr.bf16.mxu0 %v1248_v5  ;;  %v1244_v11 = vsel %vm473_vm5, %v1168_v60, %v1226_v2 }
 0x871   : > { %v1191_v12 = vmul.bf16 %v1188_v6, %v2052_v39  ;;  %v1185_v13 = vsel %vm369_vm3, %v1182_v4, %v1184_v3 }
 0x872   : > { %v1190_v7 = vmul.bf16 %v1185_v13, %v2050_v38  ;;  %1283 = vmatpush1.bf16.msra.mxu0 %v1244_v11 }
 0x873   : > { %v1231_v14 = vrot.slane %v1191_v12, 4  ;;  %v1201_v15 = vpop.permute.xlu1 %1200 }
 0x874   : > { %v1230_v17 = vrot.slane %v1190_v7, 4  ;;  %v1207_v18 = vsel %vm319_vm2, 0, %v1201_v15  ;;  %v1203_v19 = vpop.permute.xlu0 %1202 }
 0x875   : > { %v1204_v20 = vsel %vm319_vm2, %v1201_v15, %v1203_v19  ;;  %v1256_v16 = vsel %vm473_vm5, %v2345_v30, %v1231_v14  ;;  %v1209_v22 = vmul.bf16 %v1207_v18, %v2044_v34 }
 0x876   : > { %v1210_v23 = vmul.bf16 %v1204_v20, %v2046_v35  ;;  %1284 = vmatprep.subr.bf16.mxu0 %v1256_v16  ;;  %v1252_v24 = vsel %vm473_vm5, %v2343_v29, %v1230_v17 }
 0x877   : > { %1285 = vmatpush1.bf16.msra.mxu0 %v1252_v24  ;;  %v1212_v25 = vpop.permute.xlu1 %1211  ;;  %v1260_v31 = vsel %vm473_vm5, %v1209_v22, %v1232_v26 }
 0x878   : > { %v1214_v27 = vpop.permute.xlu0 %1213  ;;  %v1264_v28 = vsel %vm473_vm5, %v1210_v23, %v1233_v21 }
 0x879   : > { %v1215_v8 = vsel %vm369_vm3, %v1212_v25, %v1214_v27  ;;  %v1218_v9 = vsel %vm369_vm3, %v1214_v27, 0  ;;  %1286 = vmatprep.subr.bf16.mxu0 %v1264_v28 }
 0x87a   : > { %v1220_v30 = vmul.bf16 %v1215_v8, %v2050_v38  ;;  %v1221_v10 = vmul.bf16 %v1218_v9, %v2052_v39 }
 0x87b   : > { %1287 = vmatpush1.bf16.msra.mxu0 %v1260_v31 }
 0x87c   : > { %1824 = vmatprep.subr.msk.bf16.mxu0 %vm473_vm5, %v1221_v10  ;;  %v1275_v29 = vsel %vm473_vm5, %v1220_v30, 0 }
 0x87f   : > { %1289 = vmatpush1.bf16.msra.mxu0 %v1275_v29 }
 0x882   : > { %1825 = vmatmul.mubr.msk.bf16.vlgmr.msra.gmra.mrb[4].mxu0 %vm697_vm8, %v1822_v1 }
 0x888   : > { %v1269_v0 = vpop.permute.xlu1 %1268 }
 0x955   : > { %v1314_v32 = vpop.f32.mrb[4].mxu0 }
 0x956   : > { %v1315_v33 = vadd.f32 %v1314_v32, %v1269_v0  ;;  %v1316_v36 = vpop.f32.mrb[5].mxu0 }
 0x957   : > { %v1317_v37 = vadd.f32 %v1316_v36, %v1269_v0  ;;  %v1318_v40 = vpop.f32.mrb[6].mxu0 }
 0x958   : > { %v1321_v41 = vmax.f32 %v1315_v33, 0.0  ;;  %v1319_v42 = vpop.f32.mrb[7].mxu0 }
 0x959   : > { %v1322_v43 = vmax.f32 %v1317_v37, 0.0 }
 0x95a   : > { %v2423_v45 = vpack.c.bf16 %v1321_v41, %v1321_v41 }
 0x95b   : > { %v2425_v46 = vpack.c.bf16 %v1322_v43, %v1322_v43 }
 0x95c   : > { %1331 = vrot.lane.b32.xlu0 %v2423_v45, %s1922_s30 }
 0x95d   : > { %1333 = vrot.lane.b32.xlu1 %v2425_v46, %s1922_s30 }
 0x960   : > { %1383 = vrot.lane.b32.xlu0 %v2423_v45, %s1923_s8 }
 0x961   : > { %1385 = vrot.lane.b32.xlu1 %v2425_v46, %s1923_s8 }
 0x964   : > { %1361 = vrot.lane.b32.xlu0 %v2423_v45, %s1924_s9 }
 0x965   : > { %1363 = vrot.lane.b32.xlu1 %v2425_v46, %s1924_s9 }
 0x9ce   : > { %v1332_v47 = vpop.permute.xlu0 %1331 }
 0x9cf   : > { %v1334_v48 = vpop.permute.xlu1 %1333  ;;  %v1337_v49 = vsel %vm308_vm0, 0, %v1332_v47 }
 0x9d0   : > { %1339 = vrot.lane.b32.xlu0 %v1337_v49, %s1924_s9  ;;  %v1335_v44 = vsel %vm308_vm0, %v1332_v47, %v1334_v48  ;;  %v1413_v4 = vrot.slane %v1337_v49, 4  ;;  %v1826_v47 = vld [vmem:[%s2571_s2 + $0x10] sm:$0xf] }
 0x9d1   : > { %1341 = vrot.lane.b32.xlu1 %v1335_v44, %s1924_s9  ;;  %v1414_v3 = vrot.slane %v1335_v44, 4 }
 0x9d2   : > { %v1384_v50 = vpop.permute.xlu0 %1383 }
 0x9d3   : > { %v1386_v51 = vpop.permute.xlu1 %1385 }
 0x9d4   : > { %1352 = vrot.lane.b32.xlu0 %v1335_v44, %s1925_s10  ;;  %v2450_v52 = vsel %vm418_vm1, %v1384_v50, %v1386_v51  ;;  %v1389_v53 = vsel %vm418_vm1, %v1386_v51, 0  ;;  %v1900_v44 = vld [vmem:[%s2574_s5 + $0x48] sm:$0xff]  }
 0x9d5   : > { %1350 = vrot.lane.b32.xlu1 %v1337_v49, %s1925_s10  ;;  %v1424_v1 = vrot.slane %v1389_v53, 4  ;;  %v1423_v37 = vrot.slane %v2450_v52, 4  ;;  %v1899_v49 = vld [vmem:[%s2574_s5] sm:$0xff]  }
 0x9d6   : > { %v1362_v55 = vpop.permute.xlu0 %1361 }
 0x9d7   : > { %v1364_v56 = vpop.permute.xlu1 %1363  ;;  %v1368_v58 = vsel %vm319_vm2, 0, %v1362_v55 }
 0x9d8   : > { %1374 = vrot.lane.b32.xlu0 %v2425_v46, %s1925_s10  ;;  %v1365_v57 = vsel %vm319_vm2, %v1362_v55, %v1364_v56  ;;  %v1370_v5 = vmul.bf16 %v1368_v58, %v2044_v34  ;;  %v1901_v55 = vld [vmem:[%s2574_s5 + $0x8] sm:$0xff]   ;;  %v1903_v58 = vld [vmem:[%s2574_s5 + $0x10] sm:$0xff]  }
 0x9d9   : > { %1372 = vrot.lane.b32.xlu1 %v2423_v45, %s1925_s10  ;;  %v1371_v63 = vmul.bf16 %v1365_v57, %v2046_v35  ;;  %v1902_v57 = vld [vmem:[%s2574_s5 + $0x50] sm:$0xff]  }
 0x9da   : > { %v1417_v19 = vrot.slane %v1370_v5, 4  ;;  %v1911_v5 = vld [vmem:[%s2574_s5 + $0x30] sm:$0xff]  }
 0x9db   : > { %v1418_v14 = vrot.slane %v1371_v63, 4  ;;  %v1907_v63 = vld [vmem:[%s2574_s5 + $0x20] sm:$0xff]  }
 0x9dc   : > { %1391 = vrot.lane.b32.xlu0 %v2450_v52, %s1924_s9 }
 0x9dd   : > { %1393 = vrot.lane.b32.xlu1 %v1389_v53, %s1924_s9 }
 0x9e0   : > { %1402 = vrot.lane.b32.xlu0 %v2450_v52, %s1925_s10 }
 0x9e1   : > { %1404 = vrot.lane.b32.xlu1 %v1389_v53, %s1925_s10 }
 0x9e4   : > { %1459 = vperm.xlu0 %1886, %v1827_v54  }
 0xa42   : > { %v1340_v59 = vpop.permute.xlu0 %1339 }
 0xa43   : > { %v1346_v61 = vsel %vm319_vm2, 0, %v1340_v59  ;;  %v1342_v62 = vpop.permute.xlu1 %1341 }
 0xa44   : > { %v1348_v2 = vmul.bf16 %v1346_v61, %v2044_v34  ;;  %v1343_v60 = vsel %vm319_vm2, %v1340_v59, %v1342_v62  ;;  %v1904_v59 = vld [vmem:[%s2574_s5 + $0x58] sm:$0xff]   ;;  %v1906_v62 = vld [vmem:[%s2574_s5 + $0x60] sm:$0xff]  }
 0xa45   : > { %v1349_v6 = vmul.bf16 %v1343_v60, %v2046_v35  ;;  %v1905_v61 = vld [vmem:[%s2574_s5 + $0x18] sm:$0xff]   ;;  %v1909_v60 = vld [vmem:[%s2574_s5 + $0x28] sm:$0xff]  }
 0xa46   : > { %v1353_v11 = vpop.permute.xlu0 %1352  ;;  %v1427_v18 = vsel %vm473_vm5, %v1348_v2, %v1413_v4  ;;  %v1908_v2 = vld [vmem:[%s2574_s5 + $0x68] sm:$0xff]   ;;  %v1913_v4 = vld [vmem:[%s2574_s5 + $0x38] sm:$0xff]  }
 0xa47   : > { %v1357_v12 = vsel %vm369_vm3, %v1353_v11, 0  ;;  %v1351_v13 = vpop.permute.xlu1 %1350  ;;  %v1431_v7 = vsel %vm473_vm5, %v1349_v6, %v1414_v3  ;;  %v1910_v3 = vld [vmem:[%s2574_s5 + $0x70] sm:$0xff]   ;;  %v1912_v6 = vld [vmem:[%s2574_s5 + $0x78] sm:$0xff]  }
 0xa48   : > { %v1360_v15 = vmul.bf16 %v1357_v12, %v2052_v39  ;;  %v1354_v17 = vsel %vm369_vm3, %v1351_v13, %v1353_v11  ;;  %1471 = vmatprep.subr.bf16.mxu1 %v1431_v7 }
 0xa49   : > { %v1359_v20 = vmul.bf16 %v1354_v17, %v2050_v38  ;;  %1472 = vmatpush1.bf16.msra.mxu1 %v1427_v18 }
 0xa4a   : > { %v1375_v16 = vpop.permute.xlu0 %1374  ;;  %v1439_v21 = vsel %vm473_vm5, %v1360_v15, %v1418_v14 }
 0xa4b   : > { %v1379_v22 = vsel %vm369_vm3, %v1375_v16, 0  ;;  %v1373_v23 = vpop.permute.xlu1 %1372  ;;  %1473 = vmatprep.subr.bf16.mxu1 %v1439_v21  ;;  %v1435_v24 = vsel %vm473_vm5, %v1359_v20, %v1417_v19 }
 0xa4c   : > { %v1382_v25 = vmul.bf16 %v1379_v22, %v2052_v39  ;;  %v1376_v26 = vsel %vm369_vm3, %v1373_v23, %v1375_v16 }
 0xa4d   : > { %v1381_v27 = vmul.bf16 %v1376_v26, %v2050_v38  ;;  %1474 = vmatpush1.bf16.msra.mxu1 %v1435_v24 }
 0xa4e   : > { %v1422_v28 = vrot.slane %v1382_v25, 4  ;;  %v1392_v8 = vpop.permute.xlu0 %1391 }
 0xa4f   : > { %v1421_v9 = vrot.slane %v1381_v27, 4  ;;  %v1398_v30 = vsel %vm319_vm2, 0, %v1392_v8  ;;  %v1394_v10 = vpop.permute.xlu1 %1393 }
 0xa50   : > { %v1395_v31 = vsel %vm319_vm2, %v1392_v8, %v1394_v10  ;;  %v1447_v29 = vsel %vm473_vm5, %v2425_v46, %v1422_v28  ;;  %v1400_v0 = vmul.bf16 %v1398_v30, %v2044_v34 }
 0xa51   : > { %v1401_v32 = vmul.bf16 %v1395_v31, %v2046_v35  ;;  %1475 = vmatprep.subr.bf16.mxu1 %v1447_v29  ;;  %v1443_v33 = vsel %vm473_vm5, %v2423_v45, %v1421_v9 }
 0xa52   : > { %1476 = vmatpush1.bf16.msra.mxu1 %v1443_v33  ;;  %v1403_v36 = vpop.permute.xlu0 %1402  ;;  %v1451_v46 = vsel %vm473_vm5, %v1400_v0, %v1423_v37 }
 0xa53   : > { %v1405_v40 = vpop.permute.xlu1 %1404  ;;  %v1455_v41 = vsel %vm473_vm5, %v1401_v32, %v1424_v1 }
 0xa54   : > { %v1406_v42 = vsel %vm369_vm3, %v1403_v36, %v1405_v40  ;;  %v1409_v43 = vsel %vm369_vm3, %v1405_v40, 0  ;;  %1477 = vmatprep.subr.bf16.mxu1 %v1455_v41 }
 0xa55   : > { %v1411_v34 = vmul.bf16 %v1406_v42, %v2050_v38  ;;  %v1412_v35 = vmul.bf16 %v1409_v43, %v2052_v39  ;;  %v1898_v39 = vld [vmem:[%s2574_s5 + $0x40] sm:$0xff]  }
 0xa56   : > { %1478 = vmatpush1.bf16.msra.mxu1 %v1451_v46  ;;  %1850 = vmatprep.subr.bf16.mxu0 %v1898_v39 }
 0xa57   : > { %1828 = vmatprep.subr.msk.bf16.mxu1 %vm473_vm5, %v1412_v35  ;;  %v1466_v45 = vsel %vm473_vm5, %v1411_v34, 0  ;;  %1851 = vmatpush3.bf16.msra.mxu0 %v1899_v49 }
 0xa58   : > { %1852 = vmatprep.subr.bf16.mxu0 %v1900_v44 }
 0xa5a   : > { %1480 = vmatpush1.bf16.msra.mxu1 %v1466_v45 }
 0xa5b   : > { %1853 = vmatpush3.bf16.msra.mxu0 %v1901_v55 }
 0xa5c   : > { %1854 = vmatprep.subr.bf16.mxu0 %v1902_v57 }
 0xa5d   : > { %1829 = vmatmul.mubr.msk.bf16.vlgmr.msra.gmra.mrb[12].mxu1 %vm697_vm8, %v1826_v47 }
 0xa5f   : > { %1855 = vmatpush3.bf16.msra.mxu0 %v1903_v58 }
 0xa60   : > { %1856 = vmatprep.subr.bf16.mxu0 %v1904_v59 }
 0xa63   : > { %v1460_v48 = vpop.permute.xlu0 %1459  ;;  %1857 = vmatpush3.bf16.msra.mxu0 %v1905_v61 }
 0xa64   : > { %1858 = vmatprep.subr.bf16.mxu0 %v1906_v62 }
 0xa67   : > { %1859 = vmatpush3.bf16.msra.mxu0 %v1907_v63 }
 0xa68   : > { %1860 = vmatprep.subr.bf16.mxu0 %v1908_v2 }
 0xa6b   : > { %1861 = vmatpush3.bf16.msra.mxu0 %v1909_v60 }
 0xa6c   : > { %1862 = vmatprep.subr.bf16.mxu0 %v1910_v3 }
 0xa6f   : > { %1863 = vmatpush3.bf16.msra.mxu0 %v1911_v5 }
 0xa70   : > { %1864 = vmatprep.subr.bf16.mxu0 %v1912_v6 }
 0xa73   : > { %1865 = vmatpush3.bf16.msra.mxu0 %v1913_v4 }
 0xb30   : > { %v1505_v38 = vpop.f32.mrb[12].mxu1 }
 0xb31   : > { %v1506_v50 = vadd.f32 %v1505_v38, %v1460_v48  ;;  %v1507_v51 = vpop.f32.mrb[13].mxu1 }
 0xb32   : > { %v1508_v52 = vadd.f32 %v1507_v51, %v1460_v48  ;;  %v1509_v53 = vpop.f32.mrb[14].mxu1 }
 0xb33   : > { %1512 = vst [vmem:[%s285_s22] sm:$0xff] %v1506_v50  ;;  %v1510_v54 = vpop.f32.mrb[15].mxu1 }
 0xb34   : > { %1513 = vst [vmem:[%s285_s22 + $0x8] sm:$0xff] %v1508_v52  ;;  %v1888_v56 = vpack.i.bf16 %v1506_v50, %v1508_v52 }
 0xb36   : > { %1889 = vrot.lane.b32.xlu1 %v1888_v56, %s1925_s10 }
 0xba8   : > { %v1890_v11 = vpop.permute.xlu1 %1889 }
 0xba9   : > { %v1892_v12 = vunpack.i.h.bf16 %v1890_v11  ;;  %v1891_v13 = vunpack.i.l.bf16 %v1890_v11 }
 0xbab   : > { %v1520_v7 = vsel %vm369_vm3, %v1892_v12, %v1891_v13  ;;  %v1523_v14 = vsel %vm369_vm3, %v1891_v13, 0.0 }
 0xbac   : > { %v1524_v15 = vmax.f32 %v1506_v50, %v1520_v7  ;;  %v1525_v17 = vmax.f32 %v1508_v52, %v1523_v14 }
 0xbae   : > { %v1893_v18 = vpack.i.bf16 %v1524_v15, %v1525_v17 }
 0xbb0   : > { %1894 = vrot.lane.b32.xlu0 %v1893_v18, %s1923_s8 }
 0xc22   : > { %v1895_v19 = vpop.permute.xlu0 %1894 }
 0xc23   : > { %v1897_v20 = vunpack.i.h.bf16 %v1895_v19  ;;  %v1896_v16 = vunpack.i.l.bf16 %v1895_v19 }
 0xc25   : > { %v1532_v21 = vsel %vm418_vm1, %v1897_v20, %v1896_v16  ;;  %v1535_v22 = vsel %vm418_vm1, %v1896_v16, 0.0 }
 0xc26   : > { %v1536_v23 = vmax.f32 %v1524_v15, %v1532_v21  ;;  %v1537_v24 = vmax.f32 %v1525_v17, %v1535_v22 }
 0xc28   : > { %v1538_v25 = vpack.c.bf16 %v1536_v23, %v1536_v23  ;;  %v1539_v26 = vpack.c.bf16 %v1537_v24, %v1537_v24 }
 0xc2a   : > { %1700 = vmatprep.mubr.bf16.mxu0 %v1539_v26 }
 0xc2b   : > { %1701 = vmatmul.mubr.bf16.vlgmr.msra.gmra.mrb[8].mxu0 %v1538_v25 }
 0xcfe   : > { %v1866_v27 = vpop.f32.mrb[8].mxu0 }
 0xcff   : > { %v1867_v28 = vpop.f32.mrb[9].mxu0 }
 0xd00   : > { %v1868_v8 = vadd.f32 %v1867_v28, %v1866_v27  ;;  %v1869_v9 = vpop.f32.mrb[10].mxu0 }
 0xd01   : > { %v1870_v30 = vpop.f32.mrb[11].mxu0 }
 0xd02   : > { %v1708_v10 = vpack.c.bf16 %v1868_v8, %v1868_v8 }
 0xd04   : > { %1710 = vst.msk [vmem:[%s289_s19] sm:$0xf] %vm1709_vm9, %v1708_v10 }
 0xd05 PF: > { %s18_s24 = sadd.s32 1, %s1920_s24  }
 0xd06   : > { %p15_p4 = scmp.ge.s32.totalorder %s18_s24, 4  }
 0xd08   :  { %17 = sbr.rel (!%p15_p4) target bundleno = 1 (0x1), region = 95 }

// kernel: encoder_forward.3
= control target key start
LH: loop header
LB: loop body
LE: loop exit
PB: predicated region body
PF: predicated region fallthrough
CT: control target
= control target key end

     0   :  { %13 = vsyncpa [#allocation3], 0  ;;  %s2008_s0 = inlined_call_operand.vmem [shape: bf16[2,8,64], index: 0, kind: input, shape index: {}]   ;;  %s2009_s1 = inlined_call_operand.vmem [shape: bf16[16,72], index: 1, kind: input, shape index: {}]   ;;  %s2010_s2 = inlined_call_operand.vmem [shape: bf16[5,16,144], index: 2, kind: input, shape index: {}]   ;;  %s2011_s3 = inlined_call_operand.vmem [shape: f32[6,16,1], index: 3, kind: input, shape index: {}]   ;;  %s2012_s4 = inlined_call_operand.vmem [shape: bf16[2,64], index: 4, kind: input, shape index: {}]   ;;  %s2013_s5 = inlined_call_operand.vmem [shape: bf16[64,16], index: 5, kind: input, shape index: {}]   ;;  %s2014_s6 = inlined_call_operand.vmem [shape: f32[2,16,64], index: 6, kind: output, shape index: {0}]   ;;  %s2015_s7 = inlined_call_operand.hbm [shape: bf16[2,16,16], index: 7, kind: output, shape index: {1}]  }
   0x1   :  { %15 = vsyncpa [#allocation3 + $0x1], 0  ;;  %s1579_s24 = smov 0   ;;  %s1581_s25 = smov 0  }
   0x2   :  { %s1583_s26 = smov 0   ;;  %s1585_s27 = smov 0  }
   0x3 LB: > { %s1600_s28 = sadd.s32 4294967295, %s1527_s27   ;;  %s1277_s29 = sadd.s32 4294967294, %s1527_s27   ;;  %s1527_s27 = sphi %s1585_s27, %s2023_s27   ;;  %s1523_s26 = sphi %s1583_s26, %s2022_s26   ;;  %s1519_s25 = sphi %s1581_s25, %s2021_s25   ;;  %s1515_s24 = sphi %s1579_s24, %s2020_s24  }
   0x4   : > { %s1604_s30 = sadd.s32 1, %s1527_s27   ;;  %s185_s8 = sadd.s32 1, %s1523_s26 }
   0x5   : > { %s182_s9 = ssub.s32 %s1527_s27, %s1604_s30  ;;  %p195_p0 = scmp.ne.s32.totalorder %s1523_s26, %s1519_s25 }
   0x6   : > { %p183_p1 = scmp.eq.s32.totalorder %s182_s9, 0  ;;  %p196_p2 = scmp.eq.s32.totalorder %s1600_s28, 1 }
   0x7   : > { %p201_p3 = scmp.ne.s32.totalorder %s1519_s25, %s1515_s24  ;;  %p202_p4 = scmp.eq.s32.totalorder %s1277_s29, 1 }
   0x8   : > { %s1615_s10 = scalar_select %p183_p1, %s1523_s26, %s185_s8  }
   0x9   : > { %p1617_p5 = por %p196_p2, %p195_p0  ;;  %p1621_p6 = por %p202_p4, %p201_p3 }
   0xa   : > { %p1280_p7 = scmp.ge.s32.totalorder %s1527_s27, 1  ;;  %p242_p8 = scmp.lt.s32.totalorder %s1527_s27, 3 }
   0xc   : > { %p243_p9 = pnand %p1280_p7, %p242_p8 }
   0xd   : > { %p278_p10 = scmp.lt.s32.totalorder (!%p243_p9), %s1600_s28, 1  ;;  %s1529_s18 = smov (!%p243_p9), 8   ;;  %v1531_v2 = vmov (!%p243_p9), 0.0   ;;  %vm299_vm0 = vcmask (!%p243_p9), 64512   ;;  %vm346_vm1 = vcmask (!%p243_p9), 457728   ;;  %vm1534_vm2 = vmmov (!%p243_p9), 0  }
   0xe   : > { %246 = sbr.rel (%p243_p9) target bundleno = 3422 (0xd5e), region = 44  ;;  %s1530_s19 = smov (!%p243_p9), 120   ;;  %1358 = vmatprep.subr.bf16.mxu0 (!%p243_p9), %v1531_v2  ;;  %1368 = vmatprep.mubr.msk.bf16.mxu0 (!%p243_p9), %vm1534_vm2, %v1531_v2  ;;  %v292_v7 = vld [vmem:[%s2011_s3] sm:$0xff] (!%p243_p9)  ;;  %v1535_v8 = vmov (!%p243_p9), 0   ;;  %v293_v9 = vld [vmem:[%s2011_s3 + $0x8] sm:$0xff] (!%p243_p9)  ;;  %v313_v10 = vlaneseq (!%p243_p9)  ;;  %vm306_vm3 = vcmask (!%p243_p9), 7168   ;;  %vm1718_vm8 = vmneg (!%p243_p9), %vm299_vm0 }
   0xf   : > { %s1532_s20 = smov (!%p243_p9), 127   ;;  %s1533_s21 = smov (!%p243_p9), 1   ;;  %1432 = vset.pattern.permute.xlu0 (!%p243_p9), %v1535_v8  ;;  %1433 = vset.pattern.permute.xlu1 (!%p243_p9), %v1535_v8  ;;  %v288_v12 = vld [vmem:[%s2012_s4] sm:$0x1] (!%p243_p9)  ;;  %vm368_vm4 = vcmask (!%p243_p9), 1043456   ;;  %vm320_vm5 = vcmask (!%p243_p9), 515072  }
  0x10   : > { %528 = vmatprep.subr.bf16.mxu1 (!%p243_p9), %v1535_v8  ;;  %v314_v11 = vshrl.u32 (!%p243_p9), %v313_v10, 7  ;;  %v311_v13 = vpack.i.b16 (!%p243_p9), %v288_v12, %v288_v12  ;;  %v324_v15 = vshrl.u32 (!%p243_p9), %v288_v12, 16  ;;  %v1445_v46 = vld [vmem:[%s2009_s1] sm:$0xff] (!%p243_p9)   ;;  %vm400_vm6 = vcmask (!%p243_p9), 588800   ;;  %v1289_v62 = vld [vmem:[%s2011_s3 + $0x18] sm:$0xff] (!%p243_p9)  ;;  %v1288_v63 = vld [vmem:[%s2011_s3 + $0x10] sm:$0xff] (!%p243_p9) }
  0x11   : > { %vm524_vm7 = vcmask (!%p243_p9), 130048   ;;  %vm1053_vm9 = vcmask (!%p243_p9), 523264   ;;  %vm1165_vm10 = vcmask (!%p243_p9), 125952   ;;  %s1536_s15 = smov (!%p243_p9), [#allocation2]  }
  0x12   : > { %v315_v14 = vsub.s32 (!%p243_p9), 0, %v314_v11  ;;  %v325_v18 = vpack.i.b16 (!%p243_p9), %v324_v15, %v324_v15  ;;  %s1469_s16 = sshll.u32 (!%p243_p9), %s1536_s15, 4  ;;  %s1470_s16 = int_to_ptr.vmem [resolvable:$false] %s1469_s16 }
  0x14   : > { %v1664_v16 = vrot.slane (!%p243_p9), %v311_v13, %v315_v14  ;;  %v1668_v23 = vrot.slane (!%p243_p9), %v325_v18, %v315_v14 }
  0x15   : > { %s1629_s13 = scalar_select %p278_p10, %s1600_s28, 1 }
  0x17   : > { %s1282_s14 = sshll.u32 %s1629_s13, 2  ;;  %s1343_s23 = sshll.u32 %s1629_s13, 4 }
  0x18   : > { %s281_s17 = scalar_lea.vmem %s2008_s0, %s1282_s14  ;;  %s286_s9 = scalar_lea.vmem %s2014_s6, %s1343_s23 }
  0x19   : > { %v1635_v0 = vld [vmem:[%s281_s17] sm:$0xf]  ;;  %s1471_s17 = scalar_lea.vmem %s1470_s16, 256 }
  0x1a   : > { %v1285_v1 = vcombine.low %v1635_v0, %v1635_v0 }
  0x1c   : > { %297 = vrot.lane.b32.xlu0 %v1285_v1, %s1529_s18 }
  0x20   : > { %344 = vrot.lane.b32.xlu0 %v1285_v1, %s1530_s19 }
  0x8e   : > { %v298_v3 = vpop.permute.xlu0 %297 }
  0x8f   : > { %v302_v4 = vsel %vm299_vm0, 0, %v298_v3 }
  0x90   : > { %318 = vrot.lane.b32.xlu0 %v302_v4, %s1532_s20  ;;  %304 = vrot.lane.b32.xlu1 %v302_v4, %s1533_s21  ;;  %v362_v20 = vrot.slane %v302_v4, 4 }
  0x92   : > { %v345_v5 = vpop.permute.xlu0 %344 }
  0x93   : > { %v348_v6 = vsel %vm346_vm1, %v345_v5, 0 }
  0x94   : > { %332 = vrot.lane.b32.xlu1 %v1285_v1, %s1533_s21  ;;  %350 = vrot.lane.b32.xlu0 %v348_v6, %s1533_s21  ;;  %v367_v42 = vrot.slane %v348_v6, 4 }
  0x98   : > { %338 = vrot.lane.b32.xlu1 %v1285_v1, %s1532_s20  ;;  %387 = vperm.xlu0 %1432, %v292_v7  }
  0x9c   : > { %356 = vrot.lane.b32.xlu1 %v348_v6, %s1532_s20 }
  0xa0   : > { %392 = vperm.xlu1 %1433, %v293_v9  }
 0x102   : > { %v305_v17 = vpop.permute.xlu1 %304  ;;  %v319_v22 = vpop.permute.xlu0 %318 }
 0x103   : > { %v308_v19 = vsel %vm306_vm3, 0, %v305_v17  ;;  %v322_v26 = vsel %vm320_vm5, %v319_v22, 0 }
 0x104   : > { %v317_v21 = vmul.bf16 %v1664_v16, %v308_v19  ;;  %v331_v29 = vmul.bf16 %v1668_v23, %v322_v26 }
 0x106   : > { %v333_v24 = vpop.permute.xlu1 %332  ;;  %v371_v25 = vsel %vm368_vm4, %v317_v21, %v362_v20  ;;  %v351_v31 = vpop.permute.xlu0 %350 }
 0x107   : > { %v335_v27 = vsel %vm306_vm3, 0, %v333_v24  ;;  %1359 = vmatpush3.bf16.msra.mxu0 %v371_v25  ;;  %v353_v36 = vsel %vm306_vm3, 0, %v351_v31  ;;  %v1446_v24 = vld [vmem:[%s2010_s2] ss:$8 sps:$4 sm:$0xff]  }
 0x108   : > { %v337_v28 = vmul.bf16 %v335_v27, %v1664_v16  ;;  %1360 = vmatprep.subr.bf16.mxu0 %v1531_v2  ;;  %v355_v39 = vmul.bf16 %v353_v36, %v1664_v16 }
 0x10a   : > { %v364_v30 = vrot.slane %v337_v28, 4  ;;  %v339_v32 = vpop.permute.xlu1 %338  ;;  %v383_v44 = vsel %vm368_vm4, %v355_v39, %v367_v42  ;;  %v1449_v42 = vld [vmem:[%s2010_s2 + $0x14] ss:$8 sps:$4 sm:$0xff]  }
 0x10b   : > { %v341_v33 = vsel %vm320_vm5, %v339_v32, 0 }
 0x10c   : > { %v343_v34 = vmul.bf16 %v341_v33, %v1668_v23  ;;  %v375_v35 = vsel %vm368_vm4, %v331_v29, %v364_v30 }
 0x10d   : > { %1361 = vmatpush3.bf16.msra.mxu0 %v375_v35 }
 0x10e   : > { %v366_v37 = vrot.slane %v343_v34, 4  ;;  %v357_v38 = vpop.permute.xlu1 %356  ;;  %1362 = vmatprep.subr.bf16.mxu0 %v1531_v2 }
 0x10f   : > { %v359_v41 = vsel %vm320_vm5, %v357_v38, 0 }
 0x110   : > { %v379_v40 = vsel %vm368_vm4, %v1635_v0, %v366_v37  ;;  %v361_v43 = vmul.bf16 %v359_v41, %v1668_v23  ;;  %v1448_v0 = vld [vmem:[%s2010_s2 + $0x4] ss:$8 sps:$4 sm:$0xff]  }
 0x111   : > { %1363 = vmatpush3.bf16.msra.mxu0 %v379_v40  ;;  %1294 = vmatprep.mubr.msk.bf16.mxu1 %vm524_vm7, %v1448_v0  ;;  %v1298_v40 = vld [vmem:[%s2011_s3 + $0x28] sm:$0xff]  ;;  %v1297_v41 = vld [vmem:[%s2011_s3 + $0x20] sm:$0xff] }
 0x112   : > { %1364 = vmatprep.subr.bf16.mxu0 %v1531_v2  ;;  %v405_v45 = vsel %vm368_vm4, %v361_v43, 0 }
 0x115   : > { %1365 = vmatpush3.bf16.msra.mxu0 %v383_v44 }
 0x116   : > { %1366 = vmatprep.subr.bf16.mxu0 %v1531_v2 }
 0x117   : > { %v388_v47 = vpop.permute.xlu0 %387 }
 0x119   : > { %1367 = vmatpush3.bf16.msra.mxu0 %v405_v45 }
 0x11a   : > { %649 = vmatprep.subr.bf16.mxu0 %v1535_v8 }
 0x11c   : > { %1369 = vmatmul.mubr.msk.bf16.vlgmr.msra.gmra.mrb[0].mxu0 %vm400_vm6, %v1445_v46 }
 0x11d   : > { %1303 = vmatprep.mubr.msk.bf16.mxu0 %vm524_vm7, %v1449_v42 }
 0x11f   : > { %v393_v49 = vpop.permute.xlu1 %392 }
 0x1ef   : > { %v441_v48 = vpop.f32.mrb[0].mxu0 }
 0x1f0   : > { %v442_v50 = vadd.f32 %v441_v48, %v388_v47  ;;  %v1370_v51 = vpop.f32.mrb[1].mxu0 }
 0x1f1   : > { %v444_v52 = vpop.f32.mrb[2].mxu0 }
 0x1f2   : > { %v445_v53 = vadd.f32 %v444_v52, %v393_v49  ;;  %v1371_v54 = vpop.f32.mrb[3].mxu0  ;;  %v448_v55 = vmax.f32 %v442_v50, 0.0 }
 0x1f4   : > { %v449_v56 = vmax.f32 %v445_v53, 0.0 }
 0x1f6   : > { %v450_v57 = vpack.c.bf16 %v449_v56, %v448_v55 }
 0x1f8   : > { %487 = vrot.lane.b32.xlu0 %v450_v57, %s1530_s19  ;;  %457 = vrot.lane.b32.xlu1 %v450_v57, %s1529_s18 }
 0x26a   : > { %v458_v58 = vpop.permute.xlu1 %457  ;;  %v488_v60 = vpop.permute.xlu0 %487 }
 0x26b   : > { %v460_v59 = vsel %vm299_vm0, 0, %v458_v58  ;;  %v490_v61 = vsel %vm346_vm1, %v488_v60, 0 }
 0x26c   : > { %469 = vrot.lane.b32.xlu0 %v460_v59, %s1532_s20  ;;  %463 = vrot.lane.b32.xlu1 %v460_v59, %s1533_s21 }
 0x270   : > { %481 = vrot.lane.b32.xlu0 %v450_v57, %s1532_s20  ;;  %475 = vrot.lane.b32.xlu1 %v450_v57, %s1533_s21 }
 0x274   : > { %499 = vrot.lane.b32.xlu0 %v490_v61, %s1532_s20  ;;  %493 = vrot.lane.b32.xlu1 %v490_v61, %s1533_s21 }
 0x278   : > { %512 = vperm.xlu0 %1432, %v1289_v62   ;;  %507 = vperm.xlu1 %1433, %v1288_v63  }
 0x2de   : > { %v464_v1 = vpop.permute.xlu1 %463  ;;  %v470_v5 = vpop.permute.xlu0 %469 }
 0x2df   : > { %v466_v3 = vsel %vm306_vm3, 0, %v464_v1  ;;  %v472_v7 = vsel %vm320_vm5, %v470_v5, 0 }
 0x2e0   : > { %v468_v4 = vmul.bf16 %v466_v3, %v1664_v16  ;;  %v474_v10 = vmul.bf16 %v472_v7, %v1668_v23 }
 0x2e2   : > { %529 = vmatpush1.bf16.msra.mxu1 %v468_v4  ;;  %v476_v9 = vpop.permute.xlu1 %475  ;;  %v482_v13 = vpop.permute.xlu0 %481 }
 0x2e3   : > { %530 = vmatprep.subr.bf16.mxu1 %v1535_v8  ;;  %v478_v11 = vsel %vm306_vm3, 0, %v476_v9  ;;  %v484_v14 = vsel %vm320_vm5, %v482_v13, 0 }
 0x2e4   : > { %v480_v12 = vmul.bf16 %v478_v11, %v1664_v16  ;;  %v486_v17 = vmul.bf16 %v484_v14, %v1668_v23 }
 0x2e6   : > { %1293 = vmatpush1.bf16.msk.msra.mxu1 %vm1718_vm8, %v458_v58  ;;  %v494_v15 = vpop.permute.xlu1 %493  ;;  %v500_v20 = vpop.permute.xlu0 %499 }
 0x2e7   : > { %532 = vmatprep.subr.bf16.mxu1 %v1535_v8  ;;  %v496_v18 = vsel %vm306_vm3, 0, %v494_v15  ;;  %v502_v21 = vsel %vm320_vm5, %v500_v20, 0 }
 0x2e8   : > { %v498_v19 = vmul.bf16 %v496_v18, %v1664_v16  ;;  %v504_v22 = vmul.bf16 %v502_v21, %v1668_v23  ;;  %v1306_v18 = vld [vmem:[%s2011_s3 + $0x30] sm:$0xff] }
 0x2ea   : > { %533 = vmatpush1.bf16.msra.mxu1 %v474_v10 }
 0x2eb   : > { %534 = vmatprep.subr.bf16.mxu1 %v1535_v8 }
 0x2ee   : > { %535 = vmatpush1.bf16.msra.mxu1 %v480_v12 }
 0x2ef   : > { %536 = vmatprep.subr.bf16.mxu1 %v1535_v8 }
 0x2f2   : > { %537 = vmatpush1.bf16.msra.mxu1 %v450_v57 }
 0x2f3   : > { %538 = vmatprep.subr.bf16.mxu1 %v1535_v8 }
 0x2f6   : > { %539 = vmatpush1.bf16.msra.mxu1 %v486_v17  ;;  %v1307_v17 = vld [vmem:[%s2011_s3 + $0x38] sm:$0xff] }
 0x2f7   : > { %540 = vmatprep.subr.bf16.mxu1 %v1535_v8  ;;  %v508_v25 = vpop.permute.xlu1 %507  ;;  %v513_v29 = vpop.permute.xlu0 %512 }
 0x2fa   : > { %541 = vmatpush1.bf16.msra.mxu1 %v498_v19  ;;  %v1452_v19 = vld [vmem:[%s2010_s2 + $0x24] ss:$8 sps:$4 sm:$0xff]  }
 0x2fb   : > { %542 = vmatprep.subr.bf16.mxu1 %v1535_v8 }
 0x2fe   : > { %543 = vmatpush1.bf16.msra.mxu1 %v490_v61  ;;  %v1451_v61 = vld [vmem:[%s2010_s2 + $0x10] ss:$8 sps:$4 sm:$0xff]  }
 0x2ff   : > { %544 = vmatprep.subr.bf16.mxu1 %v1535_v8 }
 0x302   : > { %545 = vmatpush1.bf16.msra.mxu1 %v504_v22 }
 0x303   : > { %770 = vmatprep.subr.bf16.mxu1 %v1535_v8 }
 0x305   : > { %561 = vmatmul.mubr.bf16.vlgmr.msra.gmra.mrb[0].mxu1 %v1446_v24 }
 0x306   : > { %1312 = vmatprep.mubr.msk.bf16.mxu1 %vm524_vm7, %v1452_v19 }
 0x3d8   : > { %v562_v26 = vpop.f32.mrb[0].mxu1 }
 0x3d9   : > { %v563_v27 = vadd.f32 %v562_v26, %v508_v25  ;;  %v564_v28 = vpop.f32.mrb[1].mxu1 }
 0x3da   : > { %v565_v30 = vpop.f32.mrb[2].mxu1 }
 0x3db   : > { %v566_v31 = vadd.f32 %v565_v30, %v513_v29  ;;  %v567_v32 = vpop.f32.mrb[3].mxu1  ;;  %v569_v33 = vmax.f32 %v563_v27, 0.0 }
 0x3dd   : > { %v570_v34 = vmax.f32 %v566_v31, 0.0 }
 0x3df   : > { %v571_v35 = vpack.c.bf16 %v570_v34, %v569_v33 }
 0x3e1   : > { %609 = vrot.lane.b32.xlu0 %v571_v35, %s1530_s19  ;;  %579 = vrot.lane.b32.xlu1 %v571_v35, %s1529_s18 }
 0x453   : > { %v580_v36 = vpop.permute.xlu1 %579  ;;  %v610_v38 = vpop.permute.xlu0 %609 }
 0x454   : > { %v582_v37 = vsel %vm299_vm0, 0, %v580_v36  ;;  %v612_v39 = vsel %vm346_vm1, %v610_v38, 0 }
 0x455   : > { %591 = vrot.lane.b32.xlu0 %v582_v37, %s1532_s20  ;;  %585 = vrot.lane.b32.xlu1 %v582_v37, %s1533_s21 }
 0x459   : > { %603 = vrot.lane.b32.xlu0 %v571_v35, %s1532_s20  ;;  %597 = vrot.lane.b32.xlu1 %v571_v35, %s1533_s21 }
 0x45d   : > { %621 = vrot.lane.b32.xlu0 %v612_v39, %s1532_s20  ;;  %615 = vrot.lane.b32.xlu1 %v612_v39, %s1533_s21 }
 0x461   : > { %634 = vperm.xlu0 %1432, %v1298_v40   ;;  %629 = vperm.xlu1 %1433, %v1297_v41  }
 0x4c7   : > { %v586_v43 = vpop.permute.xlu1 %585  ;;  %v592_v46 = vpop.permute.xlu0 %591 }
 0x4c8   : > { %v588_v44 = vsel %vm306_vm3, 0, %v586_v43  ;;  %v594_v47 = vsel %vm320_vm5, %v592_v46, 0 }
 0x4c9   : > { %v590_v45 = vmul.bf16 %v588_v44, %v1664_v16  ;;  %v596_v49 = vmul.bf16 %v594_v47, %v1668_v23 }
 0x4cb   : > { %650 = vmatpush1.bf16.msra.mxu0 %v590_v45  ;;  %v598_v48 = vpop.permute.xlu1 %597  ;;  %v604_v52 = vpop.permute.xlu0 %603 }
 0x4cc   : > { %651 = vmatprep.subr.bf16.mxu0 %v1535_v8  ;;  %v600_v50 = vsel %vm306_vm3, 0, %v598_v48  ;;  %v606_v53 = vsel %vm320_vm5, %v604_v52, 0 }
 0x4cd   : > { %v602_v51 = vmul.bf16 %v600_v50, %v1664_v16  ;;  %v608_v55 = vmul.bf16 %v606_v53, %v1668_v23 }
 0x4cf   : > { %1302 = vmatpush1.bf16.msk.msra.mxu0 %vm1718_vm8, %v580_v36  ;;  %v616_v54 = vpop.permute.xlu1 %615  ;;  %v622_v58 = vpop.permute.xlu0 %621 }
 0x4d0   : > { %653 = vmatprep.subr.bf16.mxu0 %v1535_v8  ;;  %v618_v56 = vsel %vm306_vm3, 0, %v616_v54  ;;  %v624_v59 = vsel %vm320_vm5, %v622_v58, 0 }
 0x4d1   : > { %v620_v57 = vmul.bf16 %v618_v56, %v1664_v16  ;;  %v626_v60 = vmul.bf16 %v624_v59, %v1668_v23  ;;  %v1315_v56 = vld [vmem:[%s2011_s3 + $0x40] sm:$0xff] }
 0x4d3   : > { %654 = vmatpush1.bf16.msra.mxu0 %v596_v49 }
 0x4d4   : > { %655 = vmatprep.subr.bf16.mxu0 %v1535_v8 }
 0x4d7   : > { %656 = vmatpush1.bf16.msra.mxu0 %v602_v51 }
 0x4d8   : > { %657 = vmatprep.subr.bf16.mxu0 %v1535_v8 }
 0x4db   : > { %658 = vmatpush1.bf16.msra.mxu0 %v571_v35 }
 0x4dc   : > { %659 = vmatprep.subr.bf16.mxu0 %v1535_v8 }
 0x4df   : > { %660 = vmatpush1.bf16.msra.mxu0 %v608_v55  ;;  %v1316_v55 = vld [vmem:[%s2011_s3 + $0x48] sm:$0xff] }
 0x4e0   : > { %661 = vmatprep.subr.bf16.mxu0 %v1535_v8  ;;  %v630_v62 = vpop.permute.xlu1 %629  ;;  %v635_v3 = vpop.permute.xlu0 %634 }
 0x4e3   : > { %662 = vmatpush1.bf16.msra.mxu0 %v620_v57  ;;  %v1455_v57 = vld [vmem:[%s2010_s2 + $0x34] ss:$8 sps:$4 sm:$0xff]  }
 0x4e4   : > { %663 = vmatprep.subr.bf16.mxu0 %v1535_v8 }
 0x4e7   : > { %664 = vmatpush1.bf16.msra.mxu0 %v612_v39  ;;  %v1454_v39 = vld [vmem:[%s2010_s2 + $0x20] ss:$8 sps:$4 sm:$0xff]  }
 0x4e8   : > { %665 = vmatprep.subr.bf16.mxu0 %v1535_v8 }
 0x4eb   : > { %666 = vmatpush1.bf16.msra.mxu0 %v626_v60 }
 0x4ec   : > { %891 = vmatprep.subr.bf16.mxu0 %v1535_v8 }
 0x4ee   : > { %682 = vmatmul.mubr.bf16.vlgmr.msra.gmra.mrb[4].mxu0 %v1451_v61 }
 0x4ef   : > { %1321 = vmatprep.mubr.msk.bf16.mxu0 %vm524_vm7, %v1455_v57 }
 0x5c1   : > { %v683_v63 = vpop.f32.mrb[4].mxu0 }
 0x5c2   : > { %v684_v0 = vadd.f32 %v683_v63, %v630_v62  ;;  %v685_v1 = vpop.f32.mrb[5].mxu0 }
 0x5c3   : > { %v686_v4 = vpop.f32.mrb[6].mxu0 }
 0x5c4   : > { %v687_v5 = vadd.f32 %v686_v4, %v635_v3  ;;  %v688_v7 = vpop.f32.mrb[7].mxu0  ;;  %v690_v9 = vmax.f32 %v684_v0, 0.0 }
 0x5c6   : > { %v691_v10 = vmax.f32 %v687_v5, 0.0 }
 0x5c8   : > { %v692_v11 = vpack.c.bf16 %v691_v10, %v690_v9 }
 0x5ca   : > { %730 = vrot.lane.b32.xlu0 %v692_v11, %s1530_s19  ;;  %700 = vrot.lane.b32.xlu1 %v692_v11, %s1529_s18 }
 0x63c   : > { %v701_v12 = vpop.permute.xlu1 %700  ;;  %v731_v14 = vpop.permute.xlu0 %730 }
 0x63d   : > { %v703_v13 = vsel %vm299_vm0, 0, %v701_v12  ;;  %v733_v15 = vsel %vm346_vm1, %v731_v14, 0 }
 0x63e   : > { %712 = vrot.lane.b32.xlu0 %v703_v13, %s1532_s20  ;;  %706 = vrot.lane.b32.xlu1 %v703_v13, %s1533_s21 }
 0x642   : > { %724 = vrot.lane.b32.xlu0 %v692_v11, %s1532_s20  ;;  %718 = vrot.lane.b32.xlu1 %v692_v11, %s1533_s21 }
 0x646   : > { %742 = vrot.lane.b32.xlu0 %v733_v15, %s1532_s20  ;;  %736 = vrot.lane.b32.xlu1 %v733_v15, %s1533_s21 }
 0x64a   : > { %755 = vperm.xlu0 %1432, %v1307_v17   ;;  %750 = vperm.xlu1 %1433, %v1306_v18  }
 0x6b0   : > { %v707_v20 = vpop.permute.xlu1 %706  ;;  %v713_v24 = vpop.permute.xlu0 %712 }
 0x6b1   : > { %v709_v21 = vsel %vm306_vm3, 0, %v707_v20  ;;  %v715_v25 = vsel %vm320_vm5, %v713_v24, 0 }
 0x6b2   : > { %v711_v22 = vmul.bf16 %v709_v21, %v1664_v16  ;;  %v717_v27 = vmul.bf16 %v715_v25, %v1668_v23 }
 0x6b4   : > { %771 = vmatpush1.bf16.msra.mxu1 %v711_v22  ;;  %v719_v26 = vpop.permute.xlu1 %718  ;;  %v725_v30 = vpop.permute.xlu0 %724 }
 0x6b5   : > { %772 = vmatprep.subr.bf16.mxu1 %v1535_v8  ;;  %v721_v28 = vsel %vm306_vm3, 0, %v719_v26  ;;  %v727_v31 = vsel %vm320_vm5, %v725_v30, 0 }
 0x6b6   : > { %v723_v29 = vmul.bf16 %v721_v28, %v1664_v16  ;;  %v729_v33 = vmul.bf16 %v727_v31, %v1668_v23 }
 0x6b8   : > { %1311 = vmatpush1.bf16.msk.msra.mxu1 %vm1718_vm8, %v701_v12  ;;  %v737_v32 = vpop.permute.xlu1 %736  ;;  %v743_v36 = vpop.permute.xlu0 %742 }
 0x6b9   : > { %774 = vmatprep.subr.bf16.mxu1 %v1535_v8  ;;  %v739_v34 = vsel %vm306_vm3, 0, %v737_v32  ;;  %v745_v37 = vsel %vm320_vm5, %v743_v36, 0 }
 0x6ba   : > { %v741_v35 = vmul.bf16 %v739_v34, %v1664_v16  ;;  %v747_v38 = vmul.bf16 %v745_v37, %v1668_v23  ;;  %v1324_v34 = vld [vmem:[%s2011_s3 + $0x50] sm:$0xff] }
 0x6bc   : > { %775 = vmatpush1.bf16.msra.mxu1 %v717_v27 }
 0x6bd   : > { %776 = vmatprep.subr.bf16.mxu1 %v1535_v8 }
 0x6c0   : > { %777 = vmatpush1.bf16.msra.mxu1 %v723_v29 }
 0x6c1   : > { %778 = vmatprep.subr.bf16.mxu1 %v1535_v8 }
 0x6c4   : > { %779 = vmatpush1.bf16.msra.mxu1 %v692_v11 }
 0x6c5   : > { %780 = vmatprep.subr.bf16.mxu1 %v1535_v8 }
 0x6c8   : > { %781 = vmatpush1.bf16.msra.mxu1 %v729_v33  ;;  %v1325_v33 = vld [vmem:[%s2011_s3 + $0x58] sm:$0xff] }
 0x6c9   : > { %782 = vmatprep.subr.bf16.mxu1 %v1535_v8  ;;  %v751_v40 = vpop.permute.xlu1 %750  ;;  %v756_v44 = vpop.permute.xlu0 %755 }
 0x6cc   : > { %783 = vmatpush1.bf16.msra.mxu1 %v741_v35  ;;  %v1458_v35 = vld [vmem:[%s2010_s2 + $0x44] ss:$8 sps:$4 sm:$0xff]  }
 0x6cd   : > { %784 = vmatprep.subr.bf16.mxu1 %v1535_v8 }
 0x6d0   : > { %785 = vmatpush1.bf16.msra.mxu1 %v733_v15  ;;  %v1457_v15 = vld [vmem:[%s2010_s2 + $0x30] ss:$8 sps:$4 sm:$0xff]  }
 0x6d1   : > { %786 = vmatprep.subr.bf16.mxu1 %v1535_v8 }
 0x6d4   : > { %787 = vmatpush1.bf16.msra.mxu1 %v747_v38 }
 0x6d5   : > { %1012 = vmatprep.subr.bf16.mxu1 %v1535_v8 }
 0x6d7   : > { %803 = vmatmul.mubr.bf16.vlgmr.msra.gmra.mrb[4].mxu1 %v1454_v39 }
 0x6d8   : > { %1330 = vmatprep.mubr.msk.bf16.mxu1 %vm524_vm7, %v1458_v35 }
 0x7aa   : > { %v804_v41 = vpop.f32.mrb[4].mxu1 }
 0x7ab   : > { %v805_v42 = vadd.f32 %v804_v41, %v751_v40  ;;  %v806_v43 = vpop.f32.mrb[5].mxu1 }
 0x7ac   : > { %v807_v45 = vpop.f32.mrb[6].mxu1 }
 0x7ad   : > { %v808_v46 = vadd.f32 %v807_v45, %v756_v44  ;;  %v809_v47 = vpop.f32.mrb[7].mxu1  ;;  %v811_v48 = vmax.f32 %v805_v42, 0.0 }
 0x7af   : > { %v812_v49 = vmax.f32 %v808_v46, 0.0 }
 0x7b1   : > { %v813_v50 = vpack.c.bf16 %v812_v49, %v811_v48 }
 0x7b3   : > { %851 = vrot.lane.b32.xlu0 %v813_v50, %s1530_s19  ;;  %821 = vrot.lane.b32.xlu1 %v813_v50, %s1529_s18 }
 0x825   : > { %v822_v51 = vpop.permute.xlu1 %821  ;;  %v852_v53 = vpop.permute.xlu0 %851 }
 0x826   : > { %v824_v52 = vsel %vm299_vm0, 0, %v822_v51  ;;  %v854_v54 = vsel %vm346_vm1, %v852_v53, 0  ;;  %v1460_v53 = vld [vmem:[%s2010_s2 + $0x40] ss:$8 sps:$4 sm:$0xff]  }
 0x827   : > { %833 = vrot.lane.b32.xlu0 %v824_v52, %s1532_s20  ;;  %827 = vrot.lane.b32.xlu1 %v824_v52, %s1533_s21 }
 0x82b   : > { %845 = vrot.lane.b32.xlu0 %v813_v50, %s1532_s20  ;;  %839 = vrot.lane.b32.xlu1 %v813_v50, %s1533_s21 }
 0x82f   : > { %863 = vrot.lane.b32.xlu0 %v854_v54, %s1532_s20  ;;  %857 = vrot.lane.b32.xlu1 %v854_v54, %s1533_s21 }
 0x833   : > { %876 = vperm.xlu0 %1432, %v1316_v55   ;;  %871 = vperm.xlu1 %1433, %v1315_v56  }
 0x899   : > { %v828_v58 = vpop.permute.xlu1 %827  ;;  %v834_v61 = vpop.permute.xlu0 %833 }
 0x89a   : > { %v830_v59 = vsel %vm306_vm3, 0, %v828_v58  ;;  %v836_v62 = vsel %vm320_vm5, %v834_v61, 0 }
 0x89b   : > { %v832_v60 = vmul.bf16 %v830_v59, %v1664_v16  ;;  %v838_v0 = vmul.bf16 %v836_v62, %v1668_v23  ;;  %v1463_v62 = vld [vmem:[%s2013_s5 + $0x10] sm:$0xff]  }
 0x89d   : > { %892 = vmatpush1.bf16.msra.mxu0 %v832_v60  ;;  %v840_v63 = vpop.permute.xlu1 %839  ;;  %v846_v4 = vpop.permute.xlu0 %845  ;;  %v1462_v60 = vld [vmem:[%s2013_s5 + $0x8] sm:$0xff]  }
 0x89e   : > { %893 = vmatprep.subr.bf16.mxu0 %v1535_v8  ;;  %v842_v1 = vsel %vm306_vm3, 0, %v840_v63  ;;  %v848_v5 = vsel %vm320_vm5, %v846_v4, 0  ;;  %v1464_v63 = vld [vmem:[%s2013_s5 + $0x18] sm:$0xff]  }
 0x89f   : > { %v844_v3 = vmul.bf16 %v842_v1, %v1664_v16  ;;  %v850_v9 = vmul.bf16 %v848_v5, %v1668_v23 }
 0x8a1   : > { %1320 = vmatpush1.bf16.msk.msra.mxu0 %vm1718_vm8, %v822_v51  ;;  %v858_v7 = vpop.permute.xlu1 %857  ;;  %v864_v12 = vpop.permute.xlu0 %863 }
 0x8a2   : > { %895 = vmatprep.subr.bf16.mxu0 %v1535_v8  ;;  %v860_v10 = vsel %vm306_vm3, 0, %v858_v7  ;;  %v866_v13 = vsel %vm320_vm5, %v864_v12, 0 }
 0x8a3   : > { %v862_v11 = vmul.bf16 %v860_v10, %v1664_v16  ;;  %v868_v14 = vmul.bf16 %v866_v13, %v1668_v23 }
 0x8a5   : > { %896 = vmatpush1.bf16.msra.mxu0 %v838_v0 }
 0x8a6   : > { %897 = vmatprep.subr.bf16.mxu0 %v1535_v8 }
 0x8a9   : > { %898 = vmatpush1.bf16.msra.mxu0 %v844_v3 }
 0x8aa   : > { %899 = vmatprep.subr.bf16.mxu0 %v1535_v8 }
 0x8ad   : > { %900 = vmatpush1.bf16.msra.mxu0 %v813_v50 }
 0x8ae   : > { %901 = vmatprep.subr.bf16.mxu0 %v1535_v8 }
 0x8b1   : > { %902 = vmatpush1.bf16.msra.mxu0 %v850_v9 }
 0x8b2   : > { %903 = vmatprep.subr.bf16.mxu0 %v1535_v8  ;;  %v872_v17 = vpop.permute.xlu1 %871  ;;  %v877_v21 = vpop.permute.xlu0 %876 }
 0x8b5   : > { %904 = vmatpush1.bf16.msra.mxu0 %v862_v11 }
 0x8b6   : > { %905 = vmatprep.subr.bf16.mxu0 %v1535_v8 }
 0x8b9   : > { %906 = vmatpush1.bf16.msra.mxu0 %v854_v54 }
 0x8ba   : > { %907 = vmatprep.subr.bf16.mxu0 %v1535_v8 }
 0x8bd   : > { %908 = vmatpush1.bf16.msra.mxu0 %v868_v14 }
 0x8be   : > { %1372 = vmatprep.subr.bf16.mxu0 %v1531_v2 }
 0x8c0   : > { %924 = vmatmul.mubr.bf16.vlgmr.msra.gmra.mrb[8].mxu0 %v1457_v15 }
 0x8c1   : > { %1380 = vmatprep.mubr.msk.bf16.mxu0 %vm1534_vm2, %v1531_v2 }
 0x993   : > { %v925_v18 = vpop.f32.mrb[8].mxu0 }
 0x994   : > { %v926_v19 = vadd.f32 %v925_v18, %v872_v17  ;;  %v927_v20 = vpop.f32.mrb[9].mxu0 }
 0x995   : > { %v928_v22 = vpop.f32.mrb[10].mxu0 }
 0x996   : > { %v929_v24 = vadd.f32 %v928_v22, %v877_v21  ;;  %v930_v25 = vpop.f32.mrb[11].mxu0  ;;  %v932_v26 = vmax.f32 %v926_v19, 0.0 }
 0x998   : > { %v933_v27 = vmax.f32 %v929_v24, 0.0 }
 0x99a   : > { %v934_v28 = vpack.c.bf16 %v933_v27, %v932_v26 }
 0x99c   : > { %972 = vrot.lane.b32.xlu0 %v934_v28, %s1530_s19  ;;  %942 = vrot.lane.b32.xlu1 %v934_v28, %s1529_s18 }
 0xa0e   : > { %v943_v29 = vpop.permute.xlu1 %942  ;;  %v973_v31 = vpop.permute.xlu0 %972 }
 0xa0f   : > { %v945_v30 = vsel %vm299_vm0, 0, %v943_v29  ;;  %v975_v32 = vsel %vm346_vm1, %v973_v31, 0 }
 0xa10   : > { %954 = vrot.lane.b32.xlu0 %v945_v30, %s1532_s20  ;;  %948 = vrot.lane.b32.xlu1 %v945_v30, %s1533_s21 }
 0xa14   : > { %966 = vrot.lane.b32.xlu0 %v934_v28, %s1532_s20  ;;  %960 = vrot.lane.b32.xlu1 %v934_v28, %s1533_s21 }
 0xa18   : > { %984 = vrot.lane.b32.xlu0 %v975_v32, %s1532_s20  ;;  %978 = vrot.lane.b32.xlu1 %v975_v32, %s1533_s21 }
 0xa1c   : > { %997 = vperm.xlu0 %1432, %v1325_v33   ;;  %992 = vperm.xlu1 %1433, %v1324_v34  }
 0xa82   : > { %v949_v36 = vpop.permute.xlu1 %948  ;;  %v955_v39 = vpop.permute.xlu0 %954 }
 0xa83   : > { %v951_v37 = vsel %vm306_vm3, 0, %v949_v36  ;;  %v957_v40 = vsel %vm320_vm5, %v955_v39, 0 }
 0xa84   : > { %v953_v38 = vmul.bf16 %v951_v37, %v1664_v16  ;;  %v959_v42 = vmul.bf16 %v957_v40, %v1668_v23 }
 0xa86   : > { %1013 = vmatpush1.bf16.msra.mxu1 %v953_v38  ;;  %v961_v41 = vpop.permute.xlu1 %960  ;;  %v967_v45 = vpop.permute.xlu0 %966 }
 0xa87   : > { %1014 = vmatprep.subr.bf16.mxu1 %v1535_v8  ;;  %v963_v43 = vsel %vm306_vm3, 0, %v961_v41  ;;  %v969_v46 = vsel %vm320_vm5, %v967_v45, 0 }
 0xa88   : > { %v965_v44 = vmul.bf16 %v963_v43, %v1664_v16  ;;  %v971_v6 = vmul.bf16 %v969_v46, %v1668_v23 }
 0xa8a   : > { %1329 = vmatpush1.bf16.msk.msra.mxu1 %vm1718_vm8, %v943_v29  ;;  %v979_v47 = vpop.permute.xlu1 %978  ;;  %v985_v50 = vpop.permute.xlu0 %984 }
 0xa8b   : > { %1016 = vmatprep.subr.bf16.mxu1 %v1535_v8  ;;  %v981_v48 = vsel %vm306_vm3, 0, %v979_v47  ;;  %v987_v51 = vsel %vm320_vm5, %v985_v50, 0 }
 0xa8c   : > { %v983_v49 = vmul.bf16 %v981_v48, %v1664_v16  ;;  %v989_v52 = vmul.bf16 %v987_v51, %v1668_v23 }
 0xa8e   : > { %1017 = vmatpush1.bf16.msra.mxu1 %v959_v42 }
 0xa8f   : > { %1018 = vmatprep.subr.bf16.mxu1 %v1535_v8 }
 0xa92   : > { %1019 = vmatpush1.bf16.msra.mxu1 %v965_v44 }
 0xa93   : > { %1020 = vmatprep.subr.bf16.mxu1 %v1535_v8 }
 0xa96   : > { %1021 = vmatpush1.bf16.msra.mxu1 %v934_v28 }
 0xa97   : > { %1022 = vmatprep.subr.bf16.mxu1 %v1535_v8 }
 0xa9a   : > { %1023 = vmatpush1.bf16.msra.mxu1 %v971_v6 }
 0xa9b   : > { %1024 = vmatprep.subr.bf16.mxu1 %v1535_v8  ;;  %v993_v54 = vpop.permute.xlu1 %992  ;;  %v998_v23 = vpop.permute.xlu0 %997 }
 0xa9e   : > { %1025 = vmatpush1.bf16.msra.mxu1 %v983_v49 }
 0xa9f   : > { %1026 = vmatprep.subr.bf16.mxu1 %v1535_v8 }
 0xaa2   : > { %1027 = vmatpush1.bf16.msra.mxu1 %v975_v32 }
 0xaa3   : > { %1028 = vmatprep.subr.bf16.mxu1 %v1535_v8  ;;  %v1461_v8 = vld [vmem:[%s2013_s5] sm:$0xff]  }
 0xaa4   : > { %1373 = vmatpush3.bf16.msra.mxu0 %v1461_v8 }
 0xaa5   : > { %1374 = vmatprep.subr.bf16.mxu0 %v1531_v2 }
 0xaa6   : > { %1029 = vmatpush1.bf16.msra.mxu1 %v989_v52 }
 0xaa8   : > { %1375 = vmatpush3.bf16.msra.mxu0 %v1462_v60 }
 0xaa9   : > { %1045 = vmatmul.mubr.bf16.vlgmr.msra.gmra.mrb[8].mxu1 %v1460_v53  ;;  %1376 = vmatprep.subr.bf16.mxu0 %v1531_v2 }
 0xaac   : > { %1377 = vmatpush3.bf16.msra.mxu0 %v1463_v62 }
 0xaad   : > { %1378 = vmatprep.subr.bf16.mxu0 %v1531_v2 }
 0xab0   : > { %1379 = vmatpush3.bf16.msra.mxu0 %v1464_v63 }
 0xb7c   : > { %v1046_v16 = vpop.f32.mrb[8].mxu1 }
 0xb7d   : > { %v1047_v55 = vadd.f32 %v1046_v16, %v993_v54  ;;  %v1048_v56 = vpop.f32.mrb[9].mxu1 }
 0xb7e   : > { %v1049_v57 = vpop.f32.mrb[10].mxu1 }
 0xb7f   : > { %1054 = vst.msk [vmem:[%s286_s9] sm:$0xff] %vm1053_vm9, %v1047_v55  ;;  %v1050_v58 = vadd.f32 %v1049_v57, %v998_v23  ;;  %v1051_v59 = vpop.f32.mrb[11].mxu1 }
 0xb81   : > { %1055 = vst.msk [vmem:[%s286_s9 + $0x8] sm:$0xff] %vm1053_vm9, %v1050_v58  ;;  %v1434_v61 = vpack.i.bf16 %v1050_v58, %v1047_v55  ;;  %s1346_s9 = sshll.u32 %s1600_s28, 7 }
 0xb82   : > { %s1965_s14 = scalar_lea.hbm %s2015_s7, %s1346_s9 }
 0xb83   : > { %1435 = vrot.lane.b32.xlu1 %v1434_v61, %s1532_s20  ;;  %s275_s20 = sand.u32 1, %s1519_s25  }
 0xb84   : > { %s1281_s23 = sshll.u32 %s275_s20, 3  ;;  %s1967_s28 = scalar_lea.sflag [#allocation3], %s275_s20 }
 0xb85   : > { %s277_s29 = scalar_lea.vmem [#allocation2], %s1281_s23 }
 0xb86   : > { %s1190_s8 = sshll.u32 %s277_s29, 4  ;;  %s1960_s8 = int_to_ptr.vmem [resolvable:$true] %s1190_s8 }
 0xb87   : > { %s1465_s13 = scalar_lea.vmem %s1960_s8, 128  ;;  %p1472_p0 = scmp.lt.s32.totalorder %s1960_s8, %s1470_s16 }
 0xb88   : > { %p1466_p11 = scmp.ne.s32.totalorder %s1960_s8, %s1465_s13  ;;  %p1473_p1 = scmp.lt.s32.totalorder %s1471_s17, %s1465_s13 }
 0xb8a   : > { %p1467_p12 = pnand %p1466_p11, %p1617_p5  ;;  %p1474_p2 = por %p1473_p1, %p1472_p0 }
 0xb8c   : > { %p1468_p13 = pneg %p1467_p12 }
 0xb8e   : > { %p1475_p3 = pnand %p1474_p2, %p1468_p13 }
 0xbf5   : > { %v1436_v0 = vpop.permute.xlu1 %1435 }
 0xbf6   : > { %v1438_v1 = vunpack.i.h.bf16 %v1436_v0  ;;  %v1437_v3 = vunpack.i.l.bf16 %v1436_v0 }
 0xbf8   : > { %v1065_v4 = vsel %vm320_vm5, %v1438_v1, 0.0  ;;  %v1064_v5 = vsel %vm320_vm5, %v1437_v3, 0.0 }
 0xbf9   : > { %v1067_v7 = vmax.f32 %v1050_v58, %v1065_v4  ;;  %v1066_v9 = vmax.f32 %v1047_v55, %v1064_v5 }
 0xbfb   : > { %v1439_v10 = vpack.i.bf16 %v1067_v7, %v1066_v9 }
 0xbfd   : > { %1440 = vrot.lane.b32.xlu0 %v1439_v10, %s1530_s19 }
 0xc6f   : > { %v1441_v2 = vpop.permute.xlu0 %1440 }
 0xc70   : > { %v1443_v11 = vunpack.i.h.bf16 %v1441_v2  ;;  %v1442_v12 = vunpack.i.l.bf16 %v1441_v2 }
 0xc72   : > { %v1077_v13 = vsel %vm346_vm1, %v1443_v11, 0.0  ;;  %v1076_v14 = vsel %vm346_vm1, %v1442_v12, 0.0 }
 0xc73   : > { %v1079_v15 = vmax.f32 %v1067_v7, %v1077_v13  ;;  %v1078_v17 = vmax.f32 %v1066_v9, %v1076_v14 }
 0xc75   : > { %v1080_v18 = vpack.c.bf16 %v1079_v15, %v1078_v17 }
 0xc77   : > { %1381 = vmatmul.mubr.msk.bf16.vlgmr.msra.gmra.mrb[12].mxu0 %vm1053_vm9, %v1080_v18 }
 0xd4a   : > { %v1150_v19 = vpop.f32.mrb[12].mxu0 }
 0xd4b   : > { %v1344_v20 = vpack.c.bf16 %v1150_v19, %v1150_v19  ;;  %v1382_v21 = vpop.f32.mrb[13].mxu0 }
 0xd4c   : > { %v1153_v22 = vpop.f32.mrb[14].mxu0 }
 0xd4d   : > { %1166 = vst.msk [vmem:[%s277_s29] sm:$0xf] %vm1165_vm10, %v1344_v20  ;;  %v1345_v24 = vpack.c.bf16 %v1153_v22, %v1153_v22  ;;  %v1383_v25 = vpop.f32.mrb[15].mxu0 }
 0xd4f   : > { %1167 = vst.msk [vmem:[%s277_s29 + $0x4] sm:$0xf] %vm1165_vm10, %v1345_v24 }
 0xd50   : > { %1478 = shalt.err (!%p1475_p3)
}
 0xd51   : > { %s1479_s21 = scalar_lea.hbm %s1965_s14, 128  ;;  %s1483_s23 = scalar_lea.hbm %s2015_s7, 256 }
 0xd52   : > { %p1480_p4 = scmp.ne.s32.totalorder %s1965_s14, %s1479_s21  ;;  %p1484_p9 = scmp.lt.u32.totalorder %s1965_s14, %s2015_s7 }
 0xd53   : > { %p1485_p10 = scmp.lt.u32.totalorder %s1483_s23, %s1479_s21  ;;  %p1487_p12 = scmp.lt.u32.totalorder %s1479_s21, %s1965_s14 }
 0xd54   : > { %p1481_p7 = pnand %p1480_p4, %p1617_p5 }
 0xd55   : > { %p1486_p11 = por %p1485_p10, %p1484_p9 }
 0xd56   : > { %p1482_p8 = pneg %p1481_p7 }
 0xd57   : > { %p1488_p13 = por %p1487_p12, %p1486_p11 }
 0xd59   : > { %p1489_p0 = pnand %p1488_p13, %p1482_p8 }
 0xd5b   : > { %1492 = shalt.err (!%p1489_p0)
}
 0xd5c   : > { %s1537_s19 = smov 64   ;;  %s1538_s18 = smov 4  }
 0xd5d   : > { %1384 = dma.vmem_to_hbm [thread:$0]  (%p1617_p5), %s1960_s8, 128, %s1965_s14, %s1967_s28, %s1537_s19, %s1537_s19, %s1538_s18  }
 0xd5e PF: > { %p1390_p1 = scmp.ge.s32.totalorder %s1527_s27, 2  ;;  %s1213_s13 = sand.u32 1, %s1515_s24  }
 0xd5f   : > { %s1214_s15 = scalar_lea.sflag [#allocation3], %s1213_s13 }
 0xd60   : > { %p1387_p2 = pnand %p1390_p1, %p1621_p6 }
 0xd62   : > { %1510 = dma.done.wait (!%p1387_p2), %s1214_s15, 128  }
 0xd63   : > { %1512 = vsyncadd (!%p1387_p2), %s1214_s15, 4294967168  ;;  %p18_p3 = scmp.ge.s32.totalorder %s1604_s30, 4   ;;  %s2020_s24 = smov %s1519_s25 }
 0xd64   : > { %s2021_s25 = smov %s1523_s26  ;;  %s2022_s26 = smov %s1615_s10 }
 0xd65   : > { %s2023_s27 = smov %s1604_s30  ;;  %20 = sbr.rel (!%p18_p3) target bundleno = 3 (0x3), region = 100 }
 0xd6c   :  { %1219 = vsyncpa [#allocation3], 1 }
 0xd6d   :  { %1221 = vsyncpa [#allocation3 + $0x1], 1 }

</bundles_post_ra>
